<compile_context>
chip_gen: v7x
topology: tpu7x:2x2x1
jax: 0.10.0
libtpu: 0.0.40
codegen_flags: <defaults>
</compile_context>

<pallas_src>
import jax
import jax.numpy as jnp
from jax.experimental import pallas as pl
from jax.experimental.pallas import tpu as pltpu

SELU_ALPHA = 1.6732632423543772
SELU_SCALE = 1.0507009873554805

_VMEM = pl.BlockSpec(memory_space=pltpu.MemorySpace.VMEM)


def _selu(y):
    # exp clamped so the unselected branch never produces inf.
    return SELU_SCALE * jnp.where(
        y > 0.0, y, SELU_ALPHA * (jnp.exp(jnp.minimum(y, 0.0)) - 1.0))


# ----------------------------- Pallas kernels ------------------------------

def _mm_selu_kernel(x_ref, w_ref, b_ref, o_ref):
    """o = selu(x @ w + b).  x,w bf16; accumulate + epilogue in f32."""
    y = jnp.dot(x_ref[...], w_ref[...], preferred_element_type=jnp.float32)
    o_ref[...] = _selu(y + b_ref[...]).astype(o_ref.dtype)


def _conv_pool_kernel(cols_ref, w_ref, b_ref, o_ref):
    """Fused conv2 + SELU + MaxPool2d(2,2).

    cols_ref: (4, M, K) -- the 4 conv-output positions inside each pooling
    window.  max-pool folded into the epilogue (SELU is monotone)."""
    w = w_ref[...]
    y = jnp.dot(cols_ref[0], w, preferred_element_type=jnp.float32)
    for q in range(1, 4):
        y = jnp.maximum(
            y, jnp.dot(cols_ref[q], w, preferred_element_type=jnp.float32))
    o_ref[...] = _selu(y + b_ref[...]).astype(o_ref.dtype)


def _bottleneck_kernel(cols_ref, w4_ref, b4_ref, w1_ref, b1_ref,
                       w2_ref, b2_ref, wt_ref, bt_ref, enc_ref, dec1_ref):
    """Fused conv4 + SELU + encoderLi + SELU + decoderLi + SELU + deconv1 + SELU.

    cols_ref: (9, B, 144) -- conv4 im2col, one slab per output pixel.
    w4: (144,64); w1: (9,64,256) (Linear rows grouped per pixel);
    w2: (256,576); wt: (576,512) dense deconv1 (3x3 -> 4x4) matrix."""
    acc = jnp.zeros(enc_ref.shape, jnp.float32)
    for p in range(9):
        hp = _selu(jnp.dot(cols_ref[p], w4_ref[...],
                           preferred_element_type=jnp.float32) + b4_ref[...])
        acc = acc + jnp.dot(hp.astype(jnp.bfloat16), w1_ref[p],
                            preferred_element_type=jnp.float32)
    enc = _selu(acc + b1_ref[...])
    enc_ref[...] = enc
    dec = _selu(jnp.dot(enc.astype(jnp.bfloat16), w2_ref[...],
                        preferred_element_type=jnp.float32) + b2_ref[...])
    dec1 = _selu(jnp.dot(dec.astype(jnp.bfloat16), wt_ref[...],
                         preferred_element_type=jnp.float32) + bt_ref[...])
    dec1_ref[...] = dec1.astype(dec1_ref.dtype)


def _decoder_tail_kernel(x_ref, w2_ref, b2_ref, w3_ref, b3_ref,
                         w4_ref, b4_ref, o_ref):
    """Fused deconv2 -> deconv3 -> deconv4 (k=2, s=2 each) + SELUs + Tanh.

    Rows stay in (b, h1, w1) order; columns grow (i1,j1,c16) ->
    (i1,j1,i2,j2,c8) -> (i1,j1,i2,j2,i3,j3,c3) via block-diagonal weights, so
    no in-kernel reshapes are needed."""
    y = _selu(jnp.dot(x_ref[...], w2_ref[...],
                      preferred_element_type=jnp.float32) + b2_ref[...])
    y = _selu(jnp.dot(y.astype(jnp.bfloat16), w3_ref[...],
                      preferred_element_type=jnp.float32) + b3_ref[...])
    y = jnp.tanh(_selu(jnp.dot(y.astype(jnp.bfloat16), w4_ref[...],
                               preferred_element_type=jnp.float32) + b4_ref[...]))
    o_ref[...] = y.astype(o_ref.dtype)


# ------------------------------ layer wrappers ------------------------------

def _im2col_nhwc(x, k, stride, padding):
    """x: (B,H,W,C) -> (B, Ho, Wo, k*k*C) with (di, dj, c) column order."""
    x = jnp.pad(x, ((0, 0), (padding, padding), (padding, padding), (0, 0)))
    B, H, W, C = x.shape
    Ho = (H - k) // stride + 1
    Wo = (W - k) // stride + 1
    cols = []
    for di in range(k):
        for dj in range(k):
            cols.append(x[:, di:di + stride * (Ho - 1) + 1:stride,
                          dj:dj + stride * (Wo - 1) + 1:stride, :])
    return jnp.concatenate(cols, axis=-1), Ho, Wo


def conv_selu(x, w, b, *, k, stride, padding):
    """PyTorch Conv2d + SELU (NHWC activations, bf16 in/out)."""
    cols, Ho, Wo = _im2col_nhwc(x, k, stride, padding)
    B = x.shape[0]
    Cout = w.shape[1]
    y = pl.pallas_call(
        _mm_selu_kernel,
        out_shape=jax.ShapeDtypeStruct((B * Ho * Wo, Cout), jnp.bfloat16),
        in_specs=[_VMEM, _VMEM, _VMEM],
        out_specs=_VMEM,
    )(cols.reshape(B * Ho * Wo, -1), w, b)
    return y.reshape(B, Ho, Wo, Cout)


def conv_selu_maxpool(x, w, b, *, k, stride, padding):
    """PyTorch Conv2d + SELU + MaxPool2d(2,2), pool fused into the kernel."""
    cols, Ho, Wo = _im2col_nhwc(x, k, stride, padding)   # (B, Ho, Wo, K)
    B = x.shape[0]
    Cout = w.shape[1]
    K = cols.shape[-1]
    Hp, Wp = Ho // 2, Wo // 2
    cols = cols[:, :2 * Hp, :2 * Wp, :].reshape(B, Hp, 2, Wp, 2, K)
    cols = cols.transpose(2, 4, 0, 1, 3, 5).reshape(4, B * Hp * Wp, K)
    y = pl.pallas_call(
        _conv_pool_kernel,
        out_shape=jax.ShapeDtypeStruct((B * Hp * Wp, Cout), jnp.bfloat16),
        in_specs=[_VMEM, _VMEM, _VMEM],
        out_specs=_VMEM,
    )(cols, w, b)
    return y.reshape(B, Hp, Wp, Cout)


def bottleneck(x, packed):
    """conv4 + encoderLi + decoderLi + deconv1 in one pallas_call."""
    cols, Ho, Wo = _im2col_nhwc(x, 3, 2, 2)              # (B, 3, 3, 144)
    B = x.shape[0]
    cols = cols.reshape(B, Ho * Wo, -1).transpose(1, 0, 2)   # (9, B, 144)
    w4, b4 = packed["conv4"]
    w1, b1 = packed["encLi"]
    w2, b2 = packed["decLi"]
    wt, bt = packed["deconv1"]
    enc, dec1 = pl.pallas_call(
        _bottleneck_kernel,
        out_shape=(jax.ShapeDtypeStruct((B, 256), jnp.float32),
                   jax.ShapeDtypeStruct((B, 512), jnp.bfloat16)),
        in_specs=[_VMEM] * 9,
        out_specs=(_VMEM, _VMEM),
    )(cols, w4, b4, w1, b1, w2, b2, wt, bt)
    return enc, dec1


def decoder_tail(dec1, packed):
    """deconv2 -> deconv3 -> deconv4 (+Tanh) in one pallas_call."""
    B = dec1.shape[0]
    # dec1 columns are (oh, ow, c32) over the 4x4 deconv1 grid -> per-pixel rows.
    x = dec1.reshape(B * 16, 32)
    w2, b2 = packed["deconv2"]
    w3, b3 = packed["deconv3"]
    w4, b4 = packed["deconv4"]
    y = pl.pallas_call(
        _decoder_tail_kernel,
        out_shape=jax.ShapeDtypeStruct((B * 16, 192), jnp.float32),
        in_specs=[_VMEM] * 7,
        out_specs=_VMEM,
    )(x, w2, b2, w3, b3, w4, b4)
    # Single spatial un-shuffle: rows (b,h1,w1); cols (i1,j1,i2,j2,i3,j3,c).
    y = y.reshape(B, 4, 4, 2, 2, 2, 2, 2, 2, 3)
    return y.transpose(0, 9, 1, 3, 5, 7, 2, 4, 6, 8).reshape(B, 3, 32, 32)


# ------------------------------ parameters ----------------------------------

def init_params(key):
    """PyTorch-layout parameters (Conv: (Cout,Cin,k,k), ConvT: (Cin,Cout,k,k),
    Linear: (out,in))."""
    keys = iter(jax.random.split(key, 20))

    def conv(cout, cin, k):
        fan = cin * k * k
        w = jax.random.normal(next(keys), (cout, cin, k, k), jnp.float32) / jnp.sqrt(fan)
        b = 0.01 * jax.random.normal(next(keys), (cout,), jnp.float32)
        return w, b

    def deconv(cin, cout, k):
        fan = cin * k * k
        w = jax.random.normal(next(keys), (cin, cout, k, k), jnp.float32) / jnp.sqrt(fan)
        b = 0.01 * jax.random.normal(next(keys), (cout,), jnp.float32)
        return w, b

    def linear(fout, fin):
        w = jax.random.normal(next(keys), (fout, fin), jnp.float32) / jnp.sqrt(fin)
        b = 0.01 * jax.random.normal(next(keys), (fout,), jnp.float32)
        return w, b

    return {
        "conv1": conv(8, 3, 3), "conv2": conv(16, 8, 3),
        "conv3": conv(32, 16, 3), "conv4": conv(64, 32, 3),
        "encLi": linear(256, 576), "decLi": linear(576, 256),
        "deconv1": deconv(64, 32, 2), "deconv2": deconv(32, 16, 2),
        "deconv3": deconv(16, 8, 2), "deconv4": deconv(8, 3, 2),
    }


def pack_params(p):
    """One-time pack: matmul layouts, bf16 weights, f32 (1,N) bias rows."""
    def conv_pack(w, b):
        cout, cin, k, _ = w.shape
        wm = w.transpose(2, 3, 1, 0).reshape(k * k * cin, cout).astype(jnp.bfloat16)
        return wm, b.reshape(1, cout).astype(jnp.float32)

    def deconv_s2_pack(w, b):
        # ConvTranspose2d(k=2, s=2): per-input-pixel matmul (Cin, 4*Cout),
        # columns ordered (kh, kw, cout).
        cin, cout, k, _ = w.shape
        return w.transpose(0, 2, 3, 1).reshape(cin, k * k * cout), jnp.tile(b, (k * k,))

    q = {name: conv_pack(*p[name]) for name in ("conv1", "conv2", "conv3", "conv4")}

    # encoderLi: PyTorch flatten order is (c,h,w); conv4 pixels arrive one at a
    # time, so group the Linear rows per pixel: (9_pixel, 64_c, 256_out).
    w1, b1 = p["encLi"]
    w1m = (w1.reshape(256, 64, 3, 3).transpose(2, 3, 1, 0)
             .reshape(9, 64, 256)).astype(jnp.bfloat16)
    q["encLi"] = (w1m, b1.reshape(1, 256).astype(jnp.float32))

    # decoderLi: reorder output columns from (c,h,w) to (h,w,c).
    w2, b2 = p["decLi"]
    w2m = (w2.reshape(64, 3, 3, 256).transpose(1, 2, 0, 3)
             .reshape(576, 256).T).astype(jnp.bfloat16)
    b2m = b2.reshape(64, 3, 3).transpose(1, 2, 0).reshape(1, 576).astype(jnp.float32)
    q["decLi"] = (w2m, b2m)

    # deconv1: ConvTranspose2d(64,32,2,1) on the fixed 3x3 -> 4x4 grid as one
    # dense matrix T[(ih,iw,ci), (oh,ow,co)] = W[ci,co,oh-ih,ow-iw].
    wd, bd = p["deconv1"]
    cin, cout, k, _ = wd.shape
    Hi, Ho = 3, 4
    T = jnp.zeros((Hi, Hi, cin, Ho, Ho, cout), jnp.float32)
    for ih in range(Hi):
        for iw in range(Hi):
            for kh in range(k):
                for kw in range(k):
                    T = T.at[ih, iw, :, ih + kh, iw + kw, :].set(wd[:, :, kh, kw])
    q["deconv1"] = (T.reshape(Hi * Hi * cin, Ho * Ho * cout).astype(jnp.bfloat16),
                    jnp.tile(bd, (Ho * Ho,)).reshape(1, Ho * Ho * cout).astype(jnp.float32))

    # deconv2/3/4 (k=2, s=2): per-pixel matmuls; deconv3/4 block-diagonal so the
    # three layers chain inside one kernel without reshapes (<100 KiB total).
    w2p, b2p = deconv_s2_pack(*p["deconv2"])           # (32, 64),  (64,)
    w3p, b3p = deconv_s2_pack(*p["deconv3"])           # (16, 32),  (32,)
    w4p, b4p = deconv_s2_pack(*p["deconv4"])           # (8, 12),   (12,)
    q["deconv2"] = (w2p.astype(jnp.bfloat16),
                    b2p.reshape(1, -1).astype(jnp.float32))
    q["deconv3"] = (jnp.kron(jnp.eye(4, dtype=jnp.float32), w3p).astype(jnp.bfloat16),
                    jnp.tile(b3p, (4,)).reshape(1, -1).astype(jnp.float32))
    q["deconv4"] = (jnp.kron(jnp.eye(16, dtype=jnp.float32), w4p).astype(jnp.bfloat16),
                    jnp.tile(b4p, (16,)).reshape(1, -1).astype(jnp.float32))
    return q


# ------------------------------ model ---------------------------------------

def autoencoder_forward(packed, x_nchw):
    x = x_nchw.transpose(0, 2, 3, 1).astype(jnp.bfloat16)                # NHWC
    h = conv_selu(x, *packed["conv1"], k=3, stride=2, padding=2)         # (B,17,17,8)
    h = conv_selu_maxpool(h, *packed["conv2"], k=3, stride=2, padding=2) # (B,5,5,16)
    h = conv_selu(h, *packed["conv3"], k=3, stride=2, padding=2)         # (B,4,4,32)
    encodedl, dec1 = bottleneck(h, packed)                # (B,256) f32, (B,512) bf16
    decoded = decoder_tail(dec1, packed)                  # (B,3,32,32) f32
    return encodedl, decoded


if __name__ == "__main__":
    key = jax.random.PRNGKey(0)
    k_x, k_p = jax.random.split(key)
    # 32x32 input is required by the architecture (64*3*3 = 576 flatten).
    x = jax.random.normal(k_x, (2, 3, 32, 32), jnp.float32)
    params = init_params(k_p)
    packed = pack_params(params)                          # one-time pack

    encodedl, decoded = jax.jit(autoencoder_forward)(packed, x)
    jax.block_until_ready((encodedl, decoded))

    assert encodedl.shape == (2, 256) and encodedl.dtype == jnp.float32
    assert decoded.shape == (2, 3, 32, 32) and decoded.dtype == jnp.float32
    assert bool(jnp.all(jnp.isfinite(encodedl))) and bool(jnp.all(jnp.isfinite(decoded)))
    print("KERNEL_OK")
</pallas_src>

<mosaic_0001>
module attributes {stable_mosaic.version = 11 : i64} {
  func.func @_mm_selu_kernel(%arg0: memref<578x27xbf16, #tpu.memory_space<vmem>>, %arg1: memref<27x8xbf16, #tpu.memory_space<vmem>>, %arg2: memref<1x8xf32, #tpu.memory_space<vmem>>, %arg3: memref<578x8xbf16, #tpu.memory_space<vmem>>) attributes {dimension_semantics = [], scalar_prefetch = 0 : i64, scratch_operands = 0 : i64, tpu.core_type = #tpu.core_type<tc>} {
    %c0 = arith.constant 0 : index
    %c0_0 = arith.constant 0 : index
    %0 = vector.load %arg0[%c0, %c0_0] : memref<578x27xbf16, #tpu.memory_space<vmem>>, vector<578x27xbf16>
    %c0_1 = arith.constant 0 : index
    %c0_2 = arith.constant 0 : index
    %1 = vector.load %arg1[%c0_1, %c0_2] : memref<27x8xbf16, #tpu.memory_space<vmem>>, vector<27x8xbf16>
    %cst = arith.constant dense<0.000000e+00> : vector<578x8xf32>
    %2 = tpu.matmul %0, %1, %cst {dimension_numbers = #tpu.dot_dimension_numbers<[1], [0], [0], [1], [0, 0, 1, 1], [], []>} : vector<578x27xbf16>, vector<27x8xbf16>, vector<578x8xf32> -> vector<578x8xf32>
    %c0_3 = arith.constant 0 : index
    %c0_4 = arith.constant 0 : index
    %3 = vector.load %arg2[%c0_3, %c0_4] : memref<1x8xf32, #tpu.memory_space<vmem>>, vector<1x8xf32>
    %4 = vector.broadcast %3 : vector<1x8xf32> to vector<578x8xf32>
    %5 = arith.addf %2, %4 : vector<578x8xf32>
    %cst_5 = arith.constant 0.000000e+00 : f32
    %6 = vector.broadcast %cst_5 : f32 to vector<578x8xf32>
    %7 = arith.cmpf ogt, %5, %6 : vector<578x8xf32>
    %cst_6 = arith.constant 0.000000e+00 : f32
    %8 = vector.broadcast %cst_6 : f32 to vector<578x8xf32>
    %9 = arith.minimumf %5, %8 : vector<578x8xf32>
    %10 = math.exp %9 : vector<578x8xf32>
    %cst_7 = arith.constant 1.000000e+00 : f32
    %11 = vector.broadcast %cst_7 : f32 to vector<578x8xf32>
    %12 = arith.subf %10, %11 : vector<578x8xf32>
    %cst_8 = arith.constant 1.67326319 : f32
    %13 = vector.broadcast %cst_8 : f32 to vector<578x8xf32>
    %14 = arith.mulf %13, %12 : vector<578x8xf32>
    %15 = arith.select %7, %5, %14 : vector<578x8xi1>, vector<578x8xf32>
    %cst_9 = arith.constant 1.05070102 : f32
    %16 = vector.broadcast %cst_9 : f32 to vector<578x8xf32>
    %17 = arith.mulf %16, %15 : vector<578x8xf32>
    %18 = arith.truncf %17 : vector<578x8xf32> to vector<578x8xbf16>
    %c0_10 = arith.constant 0 : index
    %c0_11 = arith.constant 0 : index
    %19 = vector.load %arg3[%c0_10, %c0_11] : memref<578x8xbf16, #tpu.memory_space<vmem>>, vector<578x8xbf16>
    tpu.vector_store %arg3[%c0_10, %c0_11], %18 {strides = array<i32>} : memref<578x8xbf16, #tpu.memory_space<vmem>>, vector<578x8xbf16>,
    return
  }
}

module attributes {stable_mosaic.version = 11 : i64} {
  func.func @_conv_pool_kernel(%arg0: memref<4x50x72xbf16, #tpu.memory_space<vmem>>, %arg1: memref<72x16xbf16, #tpu.memory_space<vmem>>, %arg2: memref<1x16xf32, #tpu.memory_space<vmem>>, %arg3: memref<50x16xbf16, #tpu.memory_space<vmem>>) attributes {dimension_semantics = [], scalar_prefetch = 0 : i64, scratch_operands = 0 : i64, tpu.core_type = #tpu.core_type<tc>} {
    %c0 = arith.constant 0 : index
    %c0_0 = arith.constant 0 : index
    %0 = vector.load %arg1[%c0, %c0_0] : memref<72x16xbf16, #tpu.memory_space<vmem>>, vector<72x16xbf16>
    %c0_1 = arith.constant 0 : index
    %c0_2 = arith.constant 0 : index
    %c0_3 = arith.constant 0 : index
    %1 = vector.load %arg0[%c0_1, %c0_2, %c0_3] : memref<4x50x72xbf16, #tpu.memory_space<vmem>>, vector<1x50x72xbf16>
    %2 = vector.shape_cast %1 : vector<1x50x72xbf16> to vector<50x72xbf16>
    %cst = arith.constant dense<0.000000e+00> : vector<50x16xf32>
    %3 = tpu.matmul %2, %0, %cst {dimension_numbers = #tpu.dot_dimension_numbers<[1], [0], [0], [1], [0, 0, 1, 1], [], []>} : vector<50x72xbf16>, vector<72x16xbf16>, vector<50x16xf32> -> vector<50x16xf32>
    %c1 = arith.constant 1 : index
    %c0_4 = arith.constant 0 : index
    %c0_5 = arith.constant 0 : index
    %4 = vector.load %arg0[%c1, %c0_4, %c0_5] : memref<4x50x72xbf16, #tpu.memory_space<vmem>>, vector<1x50x72xbf16>
    %5 = vector.shape_cast %4 : vector<1x50x72xbf16> to vector<50x72xbf16>
    %cst_6 = arith.constant dense<0.000000e+00> : vector<50x16xf32>
    %6 = tpu.matmul %5, %0, %cst_6 {dimension_numbers = #tpu.dot_dimension_numbers<[1], [0], [0], [1], [0, 0, 1, 1], [], []>} : vector<50x72xbf16>, vector<72x16xbf16>, vector<50x16xf32> -> vector<50x16xf32>
    %7 = arith.maximumf %3, %6 : vector<50x16xf32>
    %c2 = arith.constant 2 : index
    %c0_7 = arith.constant 0 : index
    %c0_8 = arith.constant 0 : index
    %8 = vector.load %arg0[%c2, %c0_7, %c0_8] : memref<4x50x72xbf16, #tpu.memory_space<vmem>>, vector<1x50x72xbf16>
    %9 = vector.shape_cast %8 : vector<1x50x72xbf16> to vector<50x72xbf16>
    %cst_9 = arith.constant dense<0.000000e+00> : vector<50x16xf32>
    %10 = tpu.matmul %9, %0, %cst_9 {dimension_numbers = #tpu.dot_dimension_numbers<[1], [0], [0], [1], [0, 0, 1, 1], [], []>} : vector<50x72xbf16>, vector<72x16xbf16>, vector<50x16xf32> -> vector<50x16xf32>
    %11 = arith.maximumf %7, %10 : vector<50x16xf32>
    %c3 = arith.constant 3 : index
    %c0_10 = arith.constant 0 : index
    %c0_11 = arith.constant 0 : index
    %12 = vector.load %arg0[%c3, %c0_10, %c0_11] : memref<4x50x72xbf16, #tpu.memory_space<vmem>>, vector<1x50x72xbf16>
    %13 = vector.shape_cast %12 : vector<1x50x72xbf16> to vector<50x72xbf16>
    %cst_12 = arith.constant dense<0.000000e+00> : vector<50x16xf32>
    %14 = tpu.matmul %13, %0, %cst_12 {dimension_numbers = #tpu.dot_dimension_numbers<[1], [0], [0], [1], [0, 0, 1, 1], [], []>} : vector<50x72xbf16>, vector<72x16xbf16>, vector<50x16xf32> -> vector<50x16xf32>
    %15 = arith.maximumf %11, %14 : vector<50x16xf32>
    %c0_13 = arith.constant 0 : index
    %c0_14 = arith.constant 0 : index
    %16 = vector.load %arg2[%c0_13, %c0_14] : memref<1x16xf32, #tpu.memory_space<vmem>>, vector<1x16xf32>
    %17 = vector.broadcast %16 : vector<1x16xf32> to vector<50x16xf32>
    %18 = arith.addf %15, %17 : vector<50x16xf32>
    %cst_15 = arith.constant 0.000000e+00 : f32
    %19 = vector.broadcast %cst_15 : f32 to vector<50x16xf32>
    %20 = arith.cmpf ogt, %18, %19 : vector<50x16xf32>
    %cst_16 = arith.constant 0.000000e+00 : f32
    %21 = vector.broadcast %cst_16 : f32 to vector<50x16xf32>
    %22 = arith.minimumf %18, %21 : vector<50x16xf32>
    %23 = math.exp %22 : vector<50x16xf32>
    %cst_17 = arith.constant 1.000000e+00 : f32
    %24 = vector.broadcast %cst_17 : f32 to vector<50x16xf32>
    %25 = arith.subf %23, %24 : vector<50x16xf32>
    %cst_18 = arith.constant 1.67326319 : f32
    %26 = vector.broadcast %cst_18 : f32 to vector<50x16xf32>
    %27 = arith.mulf %26, %25 : vector<50x16xf32>
    %28 = arith.select %20, %18, %27 : vector<50x16xi1>, vector<50x16xf32>
    %cst_19 = arith.constant 1.05070102 : f32
    %29 = vector.broadcast %cst_19 : f32 to vector<50x16xf32>
    %30 = arith.mulf %29, %28 : vector<50x16xf32>
    %31 = arith.truncf %30 : vector<50x16xf32> to vector<50x16xbf16>
    %c0_20 = arith.constant 0 : index
    %c0_21 = arith.constant 0 : index
    %32 = vector.load %arg3[%c0_20, %c0_21] : memref<50x16xbf16, #tpu.memory_space<vmem>>, vector<50x16xbf16>
    tpu.vector_store %arg3[%c0_20, %c0_21], %31 {strides = array<i32>} : memref<50x16xbf16, #tpu.memory_space<vmem>>, vector<50x16xbf16>,
    return
  }
}

module attributes {stable_mosaic.version = 11 : i64} {
  func.func @_mm_selu_kernel(%arg0: memref<32x144xbf16, #tpu.memory_space<vmem>>, %arg1: memref<144x32xbf16, #tpu.memory_space<vmem>>, %arg2: memref<1x32xf32, #tpu.memory_space<vmem>>, %arg3: memref<32x32xbf16, #tpu.memory_space<vmem>>) attributes {dimension_semantics = [], scalar_prefetch = 0 : i64, scratch_operands = 0 : i64, tpu.core_type = #tpu.core_type<tc>} {
    %c0 = arith.constant 0 : index
    %c0_0 = arith.constant 0 : index
    %0 = vector.load %arg0[%c0, %c0_0] : memref<32x144xbf16, #tpu.memory_space<vmem>>, vector<32x144xbf16>
    %c0_1 = arith.constant 0 : index
    %c0_2 = arith.constant 0 : index
    %1 = vector.load %arg1[%c0_1, %c0_2] : memref<144x32xbf16, #tpu.memory_space<vmem>>, vector<144x32xbf16>
    %cst = arith.constant dense<0.000000e+00> : vector<32x32xf32>
    %2 = tpu.matmul %0, %1, %cst {dimension_numbers = #tpu.dot_dimension_numbers<[1], [0], [0], [1], [0, 0, 1, 1], [], []>} : vector<32x144xbf16>, vector<144x32xbf16>, vector<32x32xf32> -> vector<32x32xf32>
    %c0_3 = arith.constant 0 : index
    %c0_4 = arith.constant 0 : index
    %3 = vector.load %arg2[%c0_3, %c0_4] : memref<1x32xf32, #tpu.memory_space<vmem>>, vector<1x32xf32>
    %4 = vector.broadcast %3 : vector<1x32xf32> to vector<32x32xf32>
    %5 = arith.addf %2, %4 : vector<32x32xf32>
    %cst_5 = arith.constant 0.000000e+00 : f32
    %6 = vector.broadcast %cst_5 : f32 to vector<32x32xf32>
    %7 = arith.cmpf ogt, %5, %6 : vector<32x32xf32>
    %cst_6 = arith.constant 0.000000e+00 : f32
    %8 = vector.broadcast %cst_6 : f32 to vector<32x32xf32>
    %9 = arith.minimumf %5, %8 : vector<32x32xf32>
    %10 = math.exp %9 : vector<32x32xf32>
    %cst_7 = arith.constant 1.000000e+00 : f32
    %11 = vector.broadcast %cst_7 : f32 to vector<32x32xf32>
    %12 = arith.subf %10, %11 : vector<32x32xf32>
    %cst_8 = arith.constant 1.67326319 : f32
    %13 = vector.broadcast %cst_8 : f32 to vector<32x32xf32>
    %14 = arith.mulf %13, %12 : vector<32x32xf32>
    %15 = arith.select %7, %5, %14 : vector<32x32xi1>, vector<32x32xf32>
    %cst_9 = arith.constant 1.05070102 : f32
    %16 = vector.broadcast %cst_9 : f32 to vector<32x32xf32>
    %17 = arith.mulf %16, %15 : vector<32x32xf32>
    %18 = arith.truncf %17 : vector<32x32xf32> to vector<32x32xbf16>
    %c0_10 = arith.constant 0 : index
    %c0_11 = arith.constant 0 : index
    %19 = vector.load %arg3[%c0_10, %c0_11] : memref<32x32xbf16, #tpu.memory_space<vmem>>, vector<32x32xbf16>
    tpu.vector_store %arg3[%c0_10, %c0_11], %18 {strides = array<i32>} : memref<32x32xbf16, #tpu.memory_space<vmem>>, vector<32x32xbf16>,
    return
  }
}

module attributes {stable_mosaic.version = 11 : i64} {
  func.func @_bottleneck_kernel(%arg0: memref<9x2x288xbf16, #tpu.memory_space<vmem>>, %arg1: memref<288x64xbf16, #tpu.memory_space<vmem>>, %arg2: memref<1x64xf32, #tpu.memory_space<vmem>>, %arg3: memref<9x64x256xbf16, #tpu.memory_space<vmem>>, %arg4: memref<1x256xf32, #tpu.memory_space<vmem>>, %arg5: memref<256x576xbf16, #tpu.memory_space<vmem>>, %arg6: memref<1x576xf32, #tpu.memory_space<vmem>>, %arg7: memref<576x512xbf16, #tpu.memory_space<vmem>>, %arg8: memref<1x512xf32, #tpu.memory_space<vmem>>, %arg9: memref<2x256xf32, #tpu.memory_space<vmem>>, %arg10: memref<2x512xbf16, #tpu.memory_space<vmem>>) attributes {dimension_semantics = [], scalar_prefetch = 0 : i64, scratch_operands = 0 : i64, tpu.core_type = #tpu.core_type<tc>} {
    %cst = arith.constant 0.000000e+00 : f32
    %0 = vector.broadcast %cst : f32 to vector<2x256xf32>
    %c0 = arith.constant 0 : index
    %c0_0 = arith.constant 0 : index
    %c0_1 = arith.constant 0 : index
    %1 = vector.load %arg0[%c0, %c0_0, %c0_1] : memref<9x2x288xbf16, #tpu.memory_space<vmem>>, vector<1x2x288xbf16>
    %2 = vector.shape_cast %1 : vector<1x2x288xbf16> to vector<2x288xbf16>
    %c0_2 = arith.constant 0 : index
    %c0_3 = arith.constant 0 : index
    %3 = vector.load %arg1[%c0_2, %c0_3] : memref<288x64xbf16, #tpu.memory_space<vmem>>, vector<288x64xbf16>
    %cst_4 = arith.constant dense<0.000000e+00> : vector<2x64xf32>
    %4 = tpu.matmul %2, %3, %cst_4 {dimension_numbers = #tpu.dot_dimension_numbers<[1], [0], [0], [1], [0, 0, 1, 1], [], []>} : vector<2x288xbf16>, vector<288x64xbf16>, vector<2x64xf32> -> vector<2x64xf32>
    %c0_5 = arith.constant 0 : index
    %c0_6 = arith.constant 0 : index
    %5 = vector.load %arg2[%c0_5, %c0_6] : memref<1x64xf32, #tpu.memory_space<vmem>>, vector<1x64xf32>
    %6 = vector.broadcast %5 : vector<1x64xf32> to vector<2x64xf32>
    %7 = arith.addf %4, %6 : vector<2x64xf32>
    %cst_7 = arith.constant 0.000000e+00 : f32
    %8 = vector.broadcast %cst_7 : f32 to vector<2x64xf32>
    %9 = arith.cmpf ogt, %7, %8 : vector<2x64xf32>
    %cst_8 = arith.constant 0.000000e+00 : f32
    %10 = vector.broadcast %cst_8 : f32 to vector<2x64xf32>
    %11 = arith.minimumf %7, %10 : vector<2x64xf32>
    %12 = math.exp %11 : vector<2x64xf32>
    %cst_9 = arith.constant 1.000000e+00 : f32
    %13 = vector.broadcast %cst_9 : f32 to vector<2x64xf32>
    %14 = arith.subf %12, %13 : vector<2x64xf32>
    %cst_10 = arith.constant 1.67326319 : f32
    %15 = vector.broadcast %cst_10 : f32 to vector<2x64xf32>
    %16 = arith.mulf %15, %14 : vector<2x64xf32>
    %17 = arith.select %9, %7, %16 : vector<2x64xi1>, vector<2x64xf32>
    %cst_11 = arith.constant 1.05070102 : f32
    %18 = vector.broadcast %cst_11 : f32 to vector<2x64xf32>
    %19 = arith.mulf %18, %17 : vector<2x64xf32>
    %20 = arith.truncf %19 : vector<2x64xf32> to vector<2x64xbf16>
    %c0_12 = arith.constant 0 : index
    %c0_13 = arith.constant 0 : index
    %c0_14 = arith.constant 0 : index
    %21 = vector.load %arg3[%c0_12, %c0_13, %c0_14] : memref<9x64x256xbf16, #tpu.memory_space<vmem>>, vector<1x64x256xbf16>
    %22 = vector.shape_cast %21 : vector<1x64x256xbf16> to vector<64x256xbf16>
    %cst_15 = arith.constant dense<0.000000e+00> : vector<2x256xf32>
    %23 = tpu.matmul %20, %22, %cst_15 {dimension_numbers = #tpu.dot_dimension_numbers<[1], [0], [0], [1], [0, 0, 1, 1], [], []>} : vector<2x64xbf16>, vector<64x256xbf16>, vector<2x256xf32> -> vector<2x256xf32>
    %24 = arith.addf %0, %23 : vector<2x256xf32>
    %c1 = arith.constant 1 : index
    %c0_16 = arith.constant 0 : index
    %c0_17 = arith.constant 0 : index
    %25 = vector.load %arg0[%c1, %c0_16, %c0_17] : memref<9x2x288xbf16, #tpu.memory_space<vmem>>, vector<1x2x288xbf16>
    %26 = vector.shape_cast %25 : vector<1x2x288xbf16> to vector<2x288xbf16>
    %c0_18 = arith.constant 0 : index
    %c0_19 = arith.constant 0 : index
    %27 = vector.load %arg1[%c0_18, %c0_19] : memref<288x64xbf16, #tpu.memory_space<vmem>>, vector<288x64xbf16>
    %cst_20 = arith.constant dense<0.000000e+00> : vector<2x64xf32>
    %28 = tpu.matmul %26, %27, %cst_20 {dimension_numbers = #tpu.dot_dimension_numbers<[1], [0], [0], [1], [0, 0, 1, 1], [], []>} : vector<2x288xbf16>, vector<288x64xbf16>, vector<2x64xf32> -> vector<2x64xf32>
    %c0_21 = arith.constant 0 : index
    %c0_22 = arith.constant 0 : index
    %29 = vector.load %arg2[%c0_21, %c0_22] : memref<1x64xf32, #tpu.memory_space<vmem>>, vector<1x64xf32>
    %30 = vector.broadcast %29 : vector<1x64xf32> to vector<2x64xf32>
    %31 = arith.addf %28, %30 : vector<2x64xf32>
    %cst_23 = arith.constant 0.000000e+00 : f32
    %32 = vector.broadcast %cst_23 : f32 to vector<2x64xf32>
    %33 = arith.cmpf ogt, %31, %32 : vector<2x64xf32>
    %cst_24 = arith.constant 0.000000e+00 : f32
    %34 = vector.broadcast %cst_24 : f32 to vector<2x64xf32>
    %35 = arith.minimumf %31, %34 : vector<2x64xf32>
    %36 = math.exp %35 : vector<2x64xf32>
    %cst_25 = arith.constant 1.000000e+00 : f32
    %37 = vector.broadcast %cst_25 : f32 to vector<2x64xf32>
    %38 = arith.subf %36, %37 : vector<2x64xf32>
    %cst_26 = arith.constant 1.67326319 : f32
    %39 = vector.broadcast %cst_26 : f32 to vector<2x64xf32>
    %40 = arith.mulf %39, %38 : vector<2x64xf32>
    %41 = arith.select %33, %31, %40 : vector<2x64xi1>, vector<2x64xf32>
    %cst_27 = arith.constant 1.05070102 : f32
    %42 = vector.broadcast %cst_27 : f32 to vector<2x64xf32>
    %43 = arith.mulf %42, %41 : vector<2x64xf32>
    %44 = arith.truncf %43 : vector<2x64xf32> to vector<2x64xbf16>
    %c1_28 = arith.constant 1 : index
    %c0_29 = arith.constant 0 : index
    %c0_30 = arith.constant 0 : index
    %45 = vector.load %arg3[%c1_28, %c0_29, %c0_30] : memref<9x64x256xbf16, #tpu.memory_space<vmem>>, vector<1x64x256xbf16>
    %46 = vector.shape_cast %45 : vector<1x64x256xbf16> to vector<64x256xbf16>
    %cst_31 = arith.constant dense<0.000000e+00> : vector<2x256xf32>
    %47 = tpu.matmul %44, %46, %cst_31 {dimension_numbers = #tpu.dot_dimension_numbers<[1], [0], [0], [1], [0, 0, 1, 1], [], []>} : vector<2x64xbf16>, vector<64x256xbf16>, vector<2x256xf32> -> vector<2x256xf32>
    %48 = arith.addf %24, %47 : vector<2x256xf32>
    %c2 = arith.constant 2 : index
    %c0_32 = arith.constant 0 : index
    %c0_33 = arith.constant 0 : index
    %49 = vector.load %arg0[%c2, %c0_32, %c0_33] : memref<9x2x288xbf16, #tpu.memory_space<vmem>>, vector<1x2x288xbf16>
    %50 = vector.shape_cast %49 : vector<1x2x288xbf16> to vector<2x288xbf16>
    %c0_34 = arith.constant 0 : index
    %c0_35 = arith.constant 0 : index
    %51 = vector.load %arg1[%c0_34, %c0_35] : memref<288x64xbf16, #tpu.memory_space<vmem>>, vector<288x64xbf16>
    %cst_36 = arith.constant dense<0.000000e+00> : vector<2x64xf32>
    %52 = tpu.matmul %50, %51, %cst_36 {dimension_numbers = #tpu.dot_dimension_numbers<[1], [0], [0], [1], [0, 0, 1, 1], [], []>} : vector<2x288xbf16>, vector<288x64xbf16>, vector<2x64xf32> -> vector<2x64xf32>
    %c0_37 = arith.constant 0 : index
    %c0_38 = arith.constant 0 : index
    %53 = vector.load %arg2[%c0_37, %c0_38] : memref<1x64xf32, #tpu.memory_space<vmem>>, vector<1x64xf32>
    %54 = vector.broadcast %53 : vector<1x64xf32> to vector<2x64xf32>
    %55 = arith.addf %52, %54 : vector<2x64xf32>
    %cst_39 = arith.constant 0.000000e+00 : f32
    %56 = vector.broadcast %cst_39 : f32 to vector<2x64xf32>
    %57 = arith.cmpf ogt, %55, %56 : vector<2x64xf32>
    %cst_40 = arith.constant 0.000000e+00 : f32
    %58 = vector.broadcast %cst_40 : f32 to vector<2x64xf32>
    %59 = arith.minimumf %55, %58 : vector<2x64xf32>
    %60 = math.exp %59 : vector<2x64xf32>
    %cst_41 = arith.constant 1.000000e+00 : f32
    %61 = vector.broadcast %cst_41 : f32 to vector<2x64xf32>
    %62 = arith.subf %60, %61 : vector<2x64xf32>
    %cst_42 = arith.constant 1.67326319 : f32
    %63 = vector.broadcast %cst_42 : f32 to vector<2x64xf32>
    %64 = arith.mulf %63, %62 : vector<2x64xf32>
    %65 = arith.select %57, %55, %64 : vector<2x64xi1>, vector<2x64xf32>
    %cst_43 = arith.constant 1.05070102 : f32
    %66 = vector.broadcast %cst_43 : f32 to vector<2x64xf32>
    %67 = arith.mulf %66, %65 : vector<2x64xf32>
    %68 = arith.truncf %67 : vector<2x64xf32> to vector<2x64xbf16>
    %c2_44 = arith.constant 2 : index
    %c0_45 = arith.constant 0 : index
    %c0_46 = arith.constant 0 : index
    %69 = vector.load %arg3[%c2_44, %c0_45, %c0_46] : memref<9x64x256xbf16, #tpu.memory_space<vmem>>, vector<1x64x256xbf16>
    %70 = vector.shape_cast %69 : vector<1x64x256xbf16> to vector<64x256xbf16>
    %cst_47 = arith.constant dense<0.000000e+00> : vector<2x256xf32>
    %71 = tpu.matmul %68, %70, %cst_47 {dimension_numbers = #tpu.dot_dimension_numbers<[1], [0], [0], [1], [0, 0, 1, 1], [], []>} : vector<2x64xbf16>, vector<64x256xbf16>, vector<2x256xf32> -> vector<2x256xf32>
    %72 = arith.addf %48, %71 : vector<2x256xf32>
    %c3 = arith.constant 3 : index
    %c0_48 = arith.constant 0 : index
    %c0_49 = arith.constant 0 : index
    %73 = vector.load %arg0[%c3, %c0_48, %c0_49] : memref<9x2x288xbf16, #tpu.memory_space<vmem>>, vector<1x2x288xbf16>
    %74 = vector.shape_cast %73 : vector<1x2x288xbf16> to vector<2x288xbf16>
    %c0_50 = arith.constant 0 : index
    %c0_51 = arith.constant 0 : index
    %75 = vector.load %arg1[%c0_50, %c0_51] : memref<288x64xbf16, #tpu.memory_space<vmem>>, vector<288x64xbf16>
    %cst_52 = arith.constant dense<0.000000e+00> : vector<2x64xf32>
    %76 = tpu.matmul %74, %75, %cst_52 {dimension_numbers = #tpu.dot_dimension_numbers<[1], [0], [0], [1], [0, 0, 1, 1], [], []>} : vector<2x288xbf16>, vector<288x64xbf16>, vector<2x64xf32> -> vector<2x64xf32>
    %c0_53 = arith.constant 0 : index
    %c0_54 = arith.constant 0 : index
    %77 = vector.load %arg2[%c0_53, %c0_54] : memref<1x64xf32, #tpu.memory_space<vmem>>, vector<1x64xf32>
    %78 = vector.broadcast %77 : vector<1x64xf32> to vector<2x64xf32>
    %79 = arith.addf %76, %78 : vector<2x64xf32>
    %cst_55 = arith.constant 0.000000e+00 : f32
    %80 = vector.broadcast %cst_55 : f32 to vector<2x64xf32>
    %81 = arith.cmpf ogt, %79, %80 : vector<2x64xf32>
    %cst_56 = arith.constant 0.000000e+00 : f32
    %82 = vector.broadcast %cst_56 : f32 to vector<2x64xf32>
    %83 = arith.minimumf %79, %82 : vector<2x64xf32>
    %84 = math.exp %83 : vector<2x64xf32>
    %cst_57 = arith.constant 1.000000e+00 : f32
    %85 = vector.broadcast %cst_57 : f32 to vector<2x64xf32>
    %86 = arith.subf %84, %85 : vector<2x64xf32>
    %cst_58 = arith.constant 1.67326319 : f32
    %87 = vector.broadcast %cst_58 : f32 to vector<2x64xf32>
    %88 = arith.mulf %87, %86 : vector<2x64xf32>
    %89 = arith.select %81, %79, %88 : vector<2x64xi1>, vector<2x64xf32>
    %cst_59 = arith.constant 1.05070102 : f32
    %90 = vector.broadcast %cst_59 : f32 to vector<2x64xf32>
    %91 = arith.mulf %90, %89 : vector<2x64xf32>
    %92 = arith.truncf %91 : vector<2x64xf32> to vector<2x64xbf16>
    %c3_60 = arith.constant 3 : index
    %c0_61 = arith.constant 0 : index
    %c0_62 = arith.constant 0 : index
    %93 = vector.load %arg3[%c3_60, %c0_61, %c0_62] : memref<9x64x256xbf16, #tpu.memory_space<vmem>>, vector<1x64x256xbf16>
    %94 = vector.shape_cast %93 : vector<1x64x256xbf16> to vector<64x256xbf16>
    %cst_63 = arith.constant dense<0.000000e+00> : vector<2x256xf32>
    %95 = tpu.matmul %92, %94, %cst_63 {dimension_numbers = #tpu.dot_dimension_numbers<[1], [0], [0], [1], [0, 0, 1, 1], [], []>} : vector<2x64xbf16>, vector<64x256xbf16>, vector<2x256xf32> -> vector<2x256xf32>
    %96 = arith.addf %72, %95 : vector<2x256xf32>
    %c4 = arith.constant 4 : index
    %c0_64 = arith.constant 0 : index
    %c0_65 = arith.constant 0 : index
    %97 = vector.load %arg0[%c4, %c0_64, %c0_65] : memref<9x2x288xbf16, #tpu.memory_space<vmem>>, vector<1x2x288xbf16>
    %98 = vector.shape_cast %97 : vector<1x2x288xbf16> to vector<2x288xbf16>
    %c0_66 = arith.constant 0 : index
    %c0_67 = arith.constant 0 : index
    %99 = vector.load %arg1[%c0_66, %c0_67] : memref<288x64xbf16, #tpu.memory_space<vmem>>, vector<288x64xbf16>
    %cst_68 = arith.constant dense<0.000000e+00> : vector<2x64xf32>
    %100 = tpu.matmul %98, %99, %cst_68 {dimension_numbers = #tpu.dot_dimension_numbers<[1], [0], [0], [1], [0, 0, 1, 1], [], []>} : vector<2x288xbf16>, vector<288x64xbf16>, vector<2x64xf32> -> vector<2x64xf32>
    %c0_69 = arith.constant 0 : index
    %c0_70 = arith.constant 0 : index
    %101 = vector.load %arg2[%c0_69, %c0_70] : memref<1x64xf32, #tpu.memory_space<vmem>>, vector<1x64xf32>
    %102 = vector.broadcast %101 : vector<1x64xf32> to vector<2x64xf32>
    %103 = arith.addf %100, %102 : vector<2x64xf32>
    %cst_71 = arith.constant 0.000000e+00 : f32
    %104 = vector.broadcast %cst_71 : f32 to vector<2x64xf32>
    %105 = arith.cmpf ogt, %103, %104 : vector<2x64xf32>
    %cst_72 = arith.constant 0.000000e+00 : f32
    %106 = vector.broadcast %cst_72 : f32 to vector<2x64xf32>
    %107 = arith.minimumf %103, %106 : vector<2x64xf32>
    %108 = math.exp %107 : vector<2x64xf32>
    %cst_73 = arith.constant 1.000000e+00 : f32
    %109 = vector.broadcast %cst_73 : f32 to vector<2x64xf32>
    %110 = arith.subf %108, %109 : vector<2x64xf32>
    %cst_74 = arith.constant 1.67326319 : f32
    %111 = vector.broadcast %cst_74 : f32 to vector<2x64xf32>
    %112 = arith.mulf %111, %110 : vector<2x64xf32>
    %113 = arith.select %105, %103, %112 : vector<2x64xi1>, vector<2x64xf32>
    %cst_75 = arith.constant 1.05070102 : f32
    %114 = vector.broadcast %cst_75 : f32 to vector<2x64xf32>
    %115 = arith.mulf %114, %113 : vector<2x64xf32>
    %116 = arith.truncf %115 : vector<2x64xf32> to vector<2x64xbf16>
    %c4_76 = arith.constant 4 : index
    %c0_77 = arith.constant 0 : index
    %c0_78 = arith.constant 0 : index
    %117 = vector.load %arg3[%c4_76, %c0_77, %c0_78] : memref<9x64x256xbf16, #tpu.memory_space<vmem>>, vector<1x64x256xbf16>
    %118 = vector.shape_cast %117 : vector<1x64x256xbf16> to vector<64x256xbf16>
    %cst_79 = arith.constant dense<0.000000e+00> : vector<2x256xf32>
    %119 = tpu.matmul %116, %118, %cst_79 {dimension_numbers = #tpu.dot_dimension_numbers<[1], [0], [0], [1], [0, 0, 1, 1], [], []>} : vector<2x64xbf16>, vector<64x256xbf16>, vector<2x256xf32> -> vector<2x256xf32>
    %120 = arith.addf %96, %119 : vector<2x256xf32>
    %c5 = arith.constant 5 : index
    %c0_80 = arith.constant 0 : index
    %c0_81 = arith.constant 0 : index
    %121 = vector.load %arg0[%c5, %c0_80, %c0_81] : memref<9x2x288xbf16, #tpu.memory_space<vmem>>, vector<1x2x288xbf16>
    %122 = vector.shape_cast %121 : vector<1x2x288xbf16> to vector<2x288xbf16>
    %c0_82 = arith.constant 0 : index
    %c0_83 = arith.constant 0 : index
    %123 = vector.load %arg1[%c0_82, %c0_83] : memref<288x64xbf16, #tpu.memory_space<vmem>>, vector<288x64xbf16>
    %cst_84 = arith.constant dense<0.000000e+00> : vector<2x64xf32>
    %124 = tpu.matmul %122, %123, %cst_84 {dimension_numbers = #tpu.dot_dimension_numbers<[1], [0], [0], [1], [0, 0, 1, 1], [], []>} : vector<2x288xbf16>, vector<288x64xbf16>, vector<2x64xf32> -> vector<2x64xf32>
    %c0_85 = arith.constant 0 : index
    %c0_86 = arith.constant 0 : index
    %125 = vector.load %arg2[%c0_85, %c0_86] : memref<1x64xf32, #tpu.memory_space<vmem>>, vector<1x64xf32>
    %126 = vector.broadcast %125 : vector<1x64xf32> to vector<2x64xf32>
    %127 = arith.addf %124, %126 : vector<2x64xf32>
    %cst_87 = arith.constant 0.000000e+00 : f32
    %128 = vector.broadcast %cst_87 : f32 to vector<2x64xf32>
    %129 = arith.cmpf ogt, %127, %128 : vector<2x64xf32>
    %cst_88 = arith.constant 0.000000e+00 : f32
    %130 = vector.broadcast %cst_88 : f32 to vector<2x64xf32>
    %131 = arith.minimumf %127, %130 : vector<2x64xf32>
    %132 = math.exp %131 : vector<2x64xf32>
    %cst_89 = arith.constant 1.000000e+00 : f32
    %133 = vector.broadcast %cst_89 : f32 to vector<2x64xf32>
    %134 = arith.subf %132, %133 : vector<2x64xf32>
    %cst_90 = arith.constant 1.67326319 : f32
    %135 = vector.broadcast %cst_90 : f32 to vector<2x64xf32>
    %136 = arith.mulf %135, %134 : vector<2x64xf32>
    %137 = arith.select %129, %127, %136 : vector<2x64xi1>, vector<2x64xf32>
    %cst_91 = arith.constant 1.05070102 : f32
    %138 = vector.broadcast %cst_91 : f32 to vector<2x64xf32>
    %139 = arith.mulf %138, %137 : vector<2x64xf32>
    %140 = arith.truncf %139 : vector<2x64xf32> to vector<2x64xbf16>
    %c5_92 = arith.constant 5 : index
    %c0_93 = arith.constant 0 : index
    %c0_94 = arith.constant 0 : index
    %141 = vector.load %arg3[%c5_92, %c0_93, %c0_94] : memref<9x64x256xbf16, #tpu.memory_space<vmem>>, vector<1x64x256xbf16>
    %142 = vector.shape_cast %141 : vector<1x64x256xbf16> to vector<64x256xbf16>
    %cst_95 = arith.constant dense<0.000000e+00> : vector<2x256xf32>
    %143 = tpu.matmul %140, %142, %cst_95 {dimension_numbers = #tpu.dot_dimension_numbers<[1], [0], [0], [1], [0, 0, 1, 1], [], []>} : vector<2x64xbf16>, vector<64x256xbf16>, vector<2x256xf32> -> vector<2x256xf32>
    %144 = arith.addf %120, %143 : vector<2x256xf32>
    %c6 = arith.constant 6 : index
    %c0_96 = arith.constant 0 : index
    %c0_97 = arith.constant 0 : index
    %145 = vector.load %arg0[%c6, %c0_96, %c0_97] : memref<9x2x288xbf16, #tpu.memory_space<vmem>>, vector<1x2x288xbf16>
    %146 = vector.shape_cast %145 : vector<1x2x288xbf16> to vector<2x288xbf16>
    %c0_98 = arith.constant 0 : index
    %c0_99 = arith.constant 0 : index
    %147 = vector.load %arg1[%c0_98, %c0_99] : memref<288x64xbf16, #tpu.memory_space<vmem>>, vector<288x64xbf16>
    %cst_100 = arith.constant dense<0.000000e+00> : vector<2x64xf32>
    %148 = tpu.matmul %146, %147, %cst_100 {dimension_numbers = #tpu.dot_dimension_numbers<[1], [0], [0], [1], [0, 0, 1, 1], [], []>} : vector<2x288xbf16>, vector<288x64xbf16>, vector<2x64xf32> -> vector<2x64xf32>
    %c0_101 = arith.constant 0 : index
    %c0_102 = arith.constant 0 : index
    %149 = vector.load %arg2[%c0_101, %c0_102] : memref<1x64xf32, #tpu.memory_space<vmem>>, vector<1x64xf32>
    %150 = vector.broadcast %149 : vector<1x64xf32> to vector<2x64xf32>
    %151 = arith.addf %148, %150 : vector<2x64xf32>
    %cst_103 = arith.constant 0.000000e+00 : f32
    %152 = vector.broadcast %cst_103 : f32 to vector<2x64xf32>
    %153 = arith.cmpf ogt, %151, %152 : vector<2x64xf32>
    %cst_104 = arith.constant 0.000000e+00 : f32
    %154 = vector.broadcast %cst_104 : f32 to vector<2x64xf32>
    %155 = arith.minimumf %151, %154 : vector<2x64xf32>
    %156 = math.exp %155 : vector<2x64xf32>
    %cst_105 = arith.constant 1.000000e+00 : f32
    %157 = vector.broadcast %cst_105 : f32 to vector<2x64xf32>
    %158 = arith.subf %156, %157 : vector<2x64xf32>
    %cst_106 = arith.constant 1.67326319 : f32
    %159 = vector.broadcast %cst_106 : f32 to vector<2x64xf32>
    %160 = arith.mulf %159, %158 : vector<2x64xf32>
    %161 = arith.select %153, %151, %160 : vector<2x64xi1>, vector<2x64xf32>
    %cst_107 = arith.constant 1.05070102 : f32
    %162 = vector.broadcast %cst_107 : f32 to vector<2x64xf32>
    %163 = arith.mulf %162, %161 : vector<2x64xf32>
    %164 = arith.truncf %163 : vector<2x64xf32> to vector<2x64xbf16>
    %c6_108 = arith.constant 6 : index
    %c0_109 = arith.constant 0 : index
    %c0_110 = arith.constant 0 : index
    %165 = vector.load %arg3[%c6_108, %c0_109, %c0_110] : memref<9x64x256xbf16, #tpu.memory_space<vmem>>, vector<1x64x256xbf16>
    %166 = vector.shape_cast %165 : vector<1x64x256xbf16> to vector<64x256xbf16>
    %cst_111 = arith.constant dense<0.000000e+00> : vector<2x256xf32>
    %167 = tpu.matmul %164, %166, %cst_111 {dimension_numbers = #tpu.dot_dimension_numbers<[1], [0], [0], [1], [0, 0, 1, 1], [], []>} : vector<2x64xbf16>, vector<64x256xbf16>, vector<2x256xf32> -> vector<2x256xf32>
    %168 = arith.addf %144, %167 : vector<2x256xf32>
    %c7 = arith.constant 7 : index
    %c0_112 = arith.constant 0 : index
    %c0_113 = arith.constant 0 : index
    %169 = vector.load %arg0[%c7, %c0_112, %c0_113] : memref<9x2x288xbf16, #tpu.memory_space<vmem>>, vector<1x2x288xbf16>
    %170 = vector.shape_cast %169 : vector<1x2x288xbf16> to vector<2x288xbf16>
    %c0_114 = arith.constant 0 : index
    %c0_115 = arith.constant 0 : index
    %171 = vector.load %arg1[%c0_114, %c0_115] : memref<288x64xbf16, #tpu.memory_space<vmem>>, vector<288x64xbf16>
    %cst_116 = arith.constant dense<0.000000e+00> : vector<2x64xf32>
    %172 = tpu.matmul %170, %171, %cst_116 {dimension_numbers = #tpu.dot_dimension_numbers<[1], [0], [0], [1], [0, 0, 1, 1], [], []>} : vector<2x288xbf16>, vector<288x64xbf16>, vector<2x64xf32> -> vector<2x64xf32>
    %c0_117 = arith.constant 0 : index
    %c0_118 = arith.constant 0 : index
    %173 = vector.load %arg2[%c0_117, %c0_118] : memref<1x64xf32, #tpu.memory_space<vmem>>, vector<1x64xf32>
    %174 = vector.broadcast %173 : vector<1x64xf32> to vector<2x64xf32>
    %175 = arith.addf %172, %174 : vector<2x64xf32>
    %cst_119 = arith.constant 0.000000e+00 : f32
    %176 = vector.broadcast %cst_119 : f32 to vector<2x64xf32>
    %177 = arith.cmpf ogt, %175, %176 : vector<2x64xf32>
    %cst_120 = arith.constant 0.000000e+00 : f32
    %178 = vector.broadcast %cst_120 : f32 to vector<2x64xf32>
    %179 = arith.minimumf %175, %178 : vector<2x64xf32>
    %180 = math.exp %179 : vector<2x64xf32>
    %cst_121 = arith.constant 1.000000e+00 : f32
    %181 = vector.broadcast %cst_121 : f32 to vector<2x64xf32>
    %182 = arith.subf %180, %181 : vector<2x64xf32>
    %cst_122 = arith.constant 1.67326319 : f32
    %183 = vector.broadcast %cst_122 : f32 to vector<2x64xf32>
    %184 = arith.mulf %183, %182 : vector<2x64xf32>
    %185 = arith.select %177, %175, %184 : vector<2x64xi1>, vector<2x64xf32>
    %cst_123 = arith.constant 1.05070102 : f32
    %186 = vector.broadcast %cst_123 : f32 to vector<2x64xf32>
    %187 = arith.mulf %186, %185 : vector<2x64xf32>
    %188 = arith.truncf %187 : vector<2x64xf32> to vector<2x64xbf16>
    %c7_124 = arith.constant 7 : index
    %c0_125 = arith.constant 0 : index
    %c0_126 = arith.constant 0 : index
    %189 = vector.load %arg3[%c7_124, %c0_125, %c0_126] : memref<9x64x256xbf16, #tpu.memory_space<vmem>>, vector<1x64x256xbf16>
    %190 = vector.shape_cast %189 : vector<1x64x256xbf16> to vector<64x256xbf16>
    %cst_127 = arith.constant dense<0.000000e+00> : vector<2x256xf32>
    %191 = tpu.matmul %188, %190, %cst_127 {dimension_numbers = #tpu.dot_dimension_numbers<[1], [0], [0], [1], [0, 0, 1, 1], [], []>} : vector<2x64xbf16>, vector<64x256xbf16>, vector<2x256xf32> -> vector<2x256xf32>
    %192 = arith.addf %168, %191 : vector<2x256xf32>
    %c8 = arith.constant 8 : index
    %c0_128 = arith.constant 0 : index
    %c0_129 = arith.constant 0 : index
    %193 = vector.load %arg0[%c8, %c0_128, %c0_129] : memref<9x2x288xbf16, #tpu.memory_space<vmem>>, vector<1x2x288xbf16>
    %194 = vector.shape_cast %193 : vector<1x2x288xbf16> to vector<2x288xbf16>
    %c0_130 = arith.constant 0 : index
    %c0_131 = arith.constant 0 : index
    %195 = vector.load %arg1[%c0_130, %c0_131] : memref<288x64xbf16, #tpu.memory_space<vmem>>, vector<288x64xbf16>
    %cst_132 = arith.constant dense<0.000000e+00> : vector<2x64xf32>
    %196 = tpu.matmul %194, %195, %cst_132 {dimension_numbers = #tpu.dot_dimension_numbers<[1], [0], [0], [1], [0, 0, 1, 1], [], []>} : vector<2x288xbf16>, vector<288x64xbf16>, vector<2x64xf32> -> vector<2x64xf32>
    %c0_133 = arith.constant 0 : index
    %c0_134 = arith.constant 0 : index
    %197 = vector.load %arg2[%c0_133, %c0_134] : memref<1x64xf32, #tpu.memory_space<vmem>>, vector<1x64xf32>
    %198 = vector.broadcast %197 : vector<1x64xf32> to vector<2x64xf32>
    %199 = arith.addf %196, %198 : vector<2x64xf32>
    %cst_135 = arith.constant 0.000000e+00 : f32
    %200 = vector.broadcast %cst_135 : f32 to vector<2x64xf32>
    %201 = arith.cmpf ogt, %199, %200 : vector<2x64xf32>
    %cst_136 = arith.constant 0.000000e+00 : f32
    %202 = vector.broadcast %cst_136 : f32 to vector<2x64xf32>
    %203 = arith.minimumf %199, %202 : vector<2x64xf32>
    %204 = math.exp %203 : vector<2x64xf32>
    %cst_137 = arith.constant 1.000000e+00 : f32
    %205 = vector.broadcast %cst_137 : f32 to vector<2x64xf32>
    %206 = arith.subf %204, %205 : vector<2x64xf32>
    %cst_138 = arith.constant 1.67326319 : f32
    %207 = vector.broadcast %cst_138 : f32 to vector<2x64xf32>
    %208 = arith.mulf %207, %206 : vector<2x64xf32>
    %209 = arith.select %201, %199, %208 : vector<2x64xi1>, vector<2x64xf32>
    %cst_139 = arith.constant 1.05070102 : f32
    %210 = vector.broadcast %cst_139 : f32 to vector<2x64xf32>
    %211 = arith.mulf %210, %209 : vector<2x64xf32>
    %212 = arith.truncf %211 : vector<2x64xf32> to vector<2x64xbf16>
    %c8_140 = arith.constant 8 : index
    %c0_141 = arith.constant 0 : index
    %c0_142 = arith.constant 0 : index
    %213 = vector.load %arg3[%c8_140, %c0_141, %c0_142] : memref<9x64x256xbf16, #tpu.memory_space<vmem>>, vector<1x64x256xbf16>
    %214 = vector.shape_cast %213 : vector<1x64x256xbf16> to vector<64x256xbf16>
    %cst_143 = arith.constant dense<0.000000e+00> : vector<2x256xf32>
    %215 = tpu.matmul %212, %214, %cst_143 {dimension_numbers = #tpu.dot_dimension_numbers<[1], [0], [0], [1], [0, 0, 1, 1], [], []>} : vector<2x64xbf16>, vector<64x256xbf16>, vector<2x256xf32> -> vector<2x256xf32>
    %216 = arith.addf %192, %215 : vector<2x256xf32>
    %c0_144 = arith.constant 0 : index
    %c0_145 = arith.constant 0 : index
    %217 = vector.load %arg4[%c0_144, %c0_145] : memref<1x256xf32, #tpu.memory_space<vmem>>, vector<1x256xf32>
    %218 = vector.broadcast %217 : vector<1x256xf32> to vector<2x256xf32>
    %219 = arith.addf %216, %218 : vector<2x256xf32>
    %cst_146 = arith.constant 0.000000e+00 : f32
    %220 = vector.broadcast %cst_146 : f32 to vector<2x256xf32>
    %221 = arith.cmpf ogt, %219, %220 : vector<2x256xf32>
    %cst_147 = arith.constant 0.000000e+00 : f32
    %222 = vector.broadcast %cst_147 : f32 to vector<2x256xf32>
    %223 = arith.minimumf %219, %222 : vector<2x256xf32>
    %224 = math.exp %223 : vector<2x256xf32>
    %cst_148 = arith.constant 1.000000e+00 : f32
    %225 = vector.broadcast %cst_148 : f32 to vector<2x256xf32>
    %226 = arith.subf %224, %225 : vector<2x256xf32>
    %cst_149 = arith.constant 1.67326319 : f32
    %227 = vector.broadcast %cst_149 : f32 to vector<2x256xf32>
    %228 = arith.mulf %227, %226 : vector<2x256xf32>
    %229 = arith.select %221, %219, %228 : vector<2x256xi1>, vector<2x256xf32>
    %cst_150 = arith.constant 1.05070102 : f32
    %230 = vector.broadcast %cst_150 : f32 to vector<2x256xf32>
    %231 = arith.mulf %230, %229 : vector<2x256xf32>
    %c0_151 = arith.constant 0 : index
    %c0_152 = arith.constant 0 : index
    %232 = vector.load %arg9[%c0_151, %c0_152] : memref<2x256xf32, #tpu.memory_space<vmem>>, vector<2x256xf32>
    tpu.vector_store %arg9[%c0_151, %c0_152], %231 {strides = array<i32>} : memref<2x256xf32, #tpu.memory_space<vmem>>, vector<2x256xf32>,
    %233 = arith.truncf %231 : vector<2x256xf32> to vector<2x256xbf16>
    %c0_153 = arith.constant 0 : index
    %c0_154 = arith.constant 0 : index
    %234 = vector.load %arg5[%c0_153, %c0_154] : memref<256x576xbf16, #tpu.memory_space<vmem>>, vector<256x576xbf16>
    %cst_155 = arith.constant dense<0.000000e+00> : vector<2x576xf32>
    %235 = tpu.matmul %233, %234, %cst_155 {dimension_numbers = #tpu.dot_dimension_numbers<[1], [0], [0], [1], [0, 0, 1, 1], [], []>} : vector<2x256xbf16>, vector<256x576xbf16>, vector<2x576xf32> -> vector<2x576xf32>
    %c0_156 = arith.constant 0 : index
    %c0_157 = arith.constant 0 : index
    %236 = vector.load %arg6[%c0_156, %c0_157] : memref<1x576xf32, #tpu.memory_space<vmem>>, vector<1x576xf32>
    %237 = vector.broadcast %236 : vector<1x576xf32> to vector<2x576xf32>
    %238 = arith.addf %235, %237 : vector<2x576xf32>
    %cst_158 = arith.constant 0.000000e+00 : f32
    %239 = vector.broadcast %cst_158 : f32 to vector<2x576xf32>
    %240 = arith.cmpf ogt, %238, %239 : vector<2x576xf32>
    %cst_159 = arith.constant 0.000000e+00 : f32
    %241 = vector.broadcast %cst_159 : f32 to vector<2x576xf32>
    %242 = arith.minimumf %238, %241 : vector<2x576xf32>
    %243 = math.exp %242 : vector<2x576xf32>
    %cst_160 = arith.constant 1.000000e+00 : f32
    %244 = vector.broadcast %cst_160 : f32 to vector<2x576xf32>
    %245 = arith.subf %243, %244 : vector<2x576xf32>
    %cst_161 = arith.constant 1.67326319 : f32
    %246 = vector.broadcast %cst_161 : f32 to vector<2x576xf32>
    %247 = arith.mulf %246, %245 : vector<2x576xf32>
    %248 = arith.select %240, %238, %247 : vector<2x576xi1>, vector<2x576xf32>
    %cst_162 = arith.constant 1.05070102 : f32
    %249 = vector.broadcast %cst_162 : f32 to vector<2x576xf32>
    %250 = arith.mulf %249, %248 : vector<2x576xf32>
    %251 = arith.truncf %250 : vector<2x576xf32> to vector<2x576xbf16>
    %c0_163 = arith.constant 0 : index
    %c0_164 = arith.constant 0 : index
    %252 = vector.load %arg7[%c0_163, %c0_164] : memref<576x512xbf16, #tpu.memory_space<vmem>>, vector<576x512xbf16>
    %cst_165 = arith.constant dense<0.000000e+00> : vector<2x512xf32>
    %253 = tpu.matmul %251, %252, %cst_165 {dimension_numbers = #tpu.dot_dimension_numbers<[1], [0], [0], [1], [0, 0, 1, 1], [], []>} : vector<2x576xbf16>, vector<576x512xbf16>, vector<2x512xf32> -> vector<2x512xf32>
    %c0_166 = arith.constant 0 : index
    %c0_167 = arith.constant 0 : index
    %254 = vector.load %arg8[%c0_166, %c0_167] : memref<1x512xf32, #tpu.memory_space<vmem>>, vector<1x512xf32>
    %255 = vector.broadcast %254 : vector<1x512xf32> to vector<2x512xf32>
    %256 = arith.addf %253, %255 : vector<2x512xf32>
    %cst_168 = arith.constant 0.000000e+00 : f32
    %257 = vector.broadcast %cst_168 : f32 to vector<2x512xf32>
    %258 = arith.cmpf ogt, %256, %257 : vector<2x512xf32>
    %cst_169 = arith.constant 0.000000e+00 : f32
    %259 = vector.broadcast %cst_169 : f32 to vector<2x512xf32>
    %260 = arith.minimumf %256, %259 : vector<2x512xf32>
    %261 = math.exp %260 : vector<2x512xf32>
    %cst_170 = arith.constant 1.000000e+00 : f32
    %262 = vector.broadcast %cst_170 : f32 to vector<2x512xf32>
    %263 = arith.subf %261, %262 : vector<2x512xf32>
    %cst_171 = arith.constant 1.67326319 : f32
    %264 = vector.broadcast %cst_171 : f32 to vector<2x512xf32>
    %265 = arith.mulf %264, %263 : vector<2x512xf32>
    %266 = arith.select %258, %256, %265 : vector<2x512xi1>, vector<2x512xf32>
    %cst_172 = arith.constant 1.05070102 : f32
    %267 = vector.broadcast %cst_172 : f32 to vector<2x512xf32>
    %268 = arith.mulf %267, %266 : vector<2x512xf32>
    %269 = arith.truncf %268 : vector<2x512xf32> to vector<2x512xbf16>
    %c0_173 = arith.constant 0 : index
    %c0_174 = arith.constant 0 : index
    %270 = vector.load %arg10[%c0_173, %c0_174] : memref<2x512xbf16, #tpu.memory_space<vmem>>, vector<2x512xbf16>
    tpu.vector_store %arg10[%c0_173, %c0_174], %269 {strides = array<i32>} : memref<2x512xbf16, #tpu.memory_space<vmem>>, vector<2x512xbf16>,
    return
  }
}

module attributes {stable_mosaic.version = 11 : i64} {
  func.func @_decoder_tail_kernel(%arg0: memref<32x32xbf16, #tpu.memory_space<vmem>>, %arg1: memref<32x64xbf16, #tpu.memory_space<vmem>>, %arg2: memref<1x64xf32, #tpu.memory_space<vmem>>, %arg3: memref<64x128xbf16, #tpu.memory_space<vmem>>, %arg4: memref<1x128xf32, #tpu.memory_space<vmem>>, %arg5: memref<128x192xbf16, #tpu.memory_space<vmem>>, %arg6: memref<1x192xf32, #tpu.memory_space<vmem>>, %arg7: memref<32x192xf32, #tpu.memory_space<vmem>>) attributes {dimension_semantics = [], scalar_prefetch = 0 : i64, scratch_operands = 0 : i64, tpu.core_type = #tpu.core_type<tc>} {
    %c0 = arith.constant 0 : index
    %c0_0 = arith.constant 0 : index
    %0 = vector.load %arg0[%c0, %c0_0] : memref<32x32xbf16, #tpu.memory_space<vmem>>, vector<32x32xbf16>
    %c0_1 = arith.constant 0 : index
    %c0_2 = arith.constant 0 : index
    %1 = vector.load %arg1[%c0_1, %c0_2] : memref<32x64xbf16, #tpu.memory_space<vmem>>, vector<32x64xbf16>
    %cst = arith.constant dense<0.000000e+00> : vector<32x64xf32>
    %2 = tpu.matmul %0, %1, %cst {dimension_numbers = #tpu.dot_dimension_numbers<[1], [0], [0], [1], [0, 0, 1, 1], [], []>} : vector<32x32xbf16>, vector<32x64xbf16>, vector<32x64xf32> -> vector<32x64xf32>
    %c0_3 = arith.constant 0 : index
    %c0_4 = arith.constant 0 : index
    %3 = vector.load %arg2[%c0_3, %c0_4] : memref<1x64xf32, #tpu.memory_space<vmem>>, vector<1x64xf32>
    %4 = vector.broadcast %3 : vector<1x64xf32> to vector<32x64xf32>
    %5 = arith.addf %2, %4 : vector<32x64xf32>
    %cst_5 = arith.constant 0.000000e+00 : f32
    %6 = vector.broadcast %cst_5 : f32 to vector<32x64xf32>
    %7 = arith.cmpf ogt, %5, %6 : vector<32x64xf32>
    %cst_6 = arith.constant 0.000000e+00 : f32
    %8 = vector.broadcast %cst_6 : f32 to vector<32x64xf32>
    %9 = arith.minimumf %5, %8 : vector<32x64xf32>
    %10 = math.exp %9 : vector<32x64xf32>
    %cst_7 = arith.constant 1.000000e+00 : f32
    %11 = vector.broadcast %cst_7 : f32 to vector<32x64xf32>
    %12 = arith.subf %10, %11 : vector<32x64xf32>
    %cst_8 = arith.constant 1.67326319 : f32
    %13 = vector.broadcast %cst_8 : f32 to vector<32x64xf32>
    %14 = arith.mulf %13, %12 : vector<32x64xf32>
    %15 = arith.select %7, %5, %14 : vector<32x64xi1>, vector<32x64xf32>
    %cst_9 = arith.constant 1.05070102 : f32
    %16 = vector.broadcast %cst_9 : f32 to vector<32x64xf32>
    %17 = arith.mulf %16, %15 : vector<32x64xf32>
    %18 = arith.truncf %17 : vector<32x64xf32> to vector<32x64xbf16>
    %c0_10 = arith.constant 0 : index
    %c0_11 = arith.constant 0 : index
    %19 = vector.load %arg3[%c0_10, %c0_11] : memref<64x128xbf16, #tpu.memory_space<vmem>>, vector<64x128xbf16>
    %cst_12 = arith.constant dense<0.000000e+00> : vector<32x128xf32>
    %20 = tpu.matmul %18, %19, %cst_12 {dimension_numbers = #tpu.dot_dimension_numbers<[1], [0], [0], [1], [0, 0, 1, 1], [], []>} : vector<32x64xbf16>, vector<64x128xbf16>, vector<32x128xf32> -> vector<32x128xf32>
    %c0_13 = arith.constant 0 : index
    %c0_14 = arith.constant 0 : index
    %21 = vector.load %arg4[%c0_13, %c0_14] : memref<1x128xf32, #tpu.memory_space<vmem>>, vector<1x128xf32>
    %22 = vector.broadcast %21 : vector<1x128xf32> to vector<32x128xf32>
    %23 = arith.addf %20, %22 : vector<32x128xf32>
    %cst_15 = arith.constant 0.000000e+00 : f32
    %24 = vector.broadcast %cst_15 : f32 to vector<32x128xf32>
    %25 = arith.cmpf ogt, %23, %24 : vector<32x128xf32>
    %cst_16 = arith.constant 0.000000e+00 : f32
    %26 = vector.broadcast %cst_16 : f32 to vector<32x128xf32>
    %27 = arith.minimumf %23, %26 : vector<32x128xf32>
    %28 = math.exp %27 : vector<32x128xf32>
    %cst_17 = arith.constant 1.000000e+00 : f32
    %29 = vector.broadcast %cst_17 : f32 to vector<32x128xf32>
    %30 = arith.subf %28, %29 : vector<32x128xf32>
    %cst_18 = arith.constant 1.67326319 : f32
    %31 = vector.broadcast %cst_18 : f32 to vector<32x128xf32>
    %32 = arith.mulf %31, %30 : vector<32x128xf32>
    %33 = arith.select %25, %23, %32 : vector<32x128xi1>, vector<32x128xf32>
    %cst_19 = arith.constant 1.05070102 : f32
    %34 = vector.broadcast %cst_19 : f32 to vector<32x128xf32>
    %35 = arith.mulf %34, %33 : vector<32x128xf32>
    %36 = arith.truncf %35 : vector<32x128xf32> to vector<32x128xbf16>
    %c0_20 = arith.constant 0 : index
    %c0_21 = arith.constant 0 : index
    %37 = vector.load %arg5[%c0_20, %c0_21] : memref<128x192xbf16, #tpu.memory_space<vmem>>, vector<128x192xbf16>
    %cst_22 = arith.constant dense<0.000000e+00> : vector<32x192xf32>
    %38 = tpu.matmul %36, %37, %cst_22 {dimension_numbers = #tpu.dot_dimension_numbers<[1], [0], [0], [1], [0, 0, 1, 1], [], []>} : vector<32x128xbf16>, vector<128x192xbf16>, vector<32x192xf32> -> vector<32x192xf32>
    %c0_23 = arith.constant 0 : index
    %c0_24 = arith.constant 0 : index
    %39 = vector.load %arg6[%c0_23, %c0_24] : memref<1x192xf32, #tpu.memory_space<vmem>>, vector<1x192xf32>
    %40 = vector.broadcast %39 : vector<1x192xf32> to vector<32x192xf32>
    %41 = arith.addf %38, %40 : vector<32x192xf32>
    %cst_25 = arith.constant 0.000000e+00 : f32
    %42 = vector.broadcast %cst_25 : f32 to vector<32x192xf32>
    %43 = arith.cmpf ogt, %41, %42 : vector<32x192xf32>
    %cst_26 = arith.constant 0.000000e+00 : f32
    %44 = vector.broadcast %cst_26 : f32 to vector<32x192xf32>
    %45 = arith.minimumf %41, %44 : vector<32x192xf32>
    %46 = math.exp %45 : vector<32x192xf32>
    %cst_27 = arith.constant 1.000000e+00 : f32
    %47 = vector.broadcast %cst_27 : f32 to vector<32x192xf32>
    %48 = arith.subf %46, %47 : vector<32x192xf32>
    %cst_28 = arith.constant 1.67326319 : f32
    %49 = vector.broadcast %cst_28 : f32 to vector<32x192xf32>
    %50 = arith.mulf %49, %48 : vector<32x192xf32>
    %51 = arith.select %43, %41, %50 : vector<32x192xi1>, vector<32x192xf32>
    %cst_29 = arith.constant 1.05070102 : f32
    %52 = vector.broadcast %cst_29 : f32 to vector<32x192xf32>
    %53 = arith.mulf %52, %51 : vector<32x192xf32>
    %54 = math.tanh %53 : vector<32x192xf32>
    %c0_30 = arith.constant 0 : index
    %c0_31 = arith.constant 0 : index
    %55 = vector.load %arg7[%c0_30, %c0_31] : memref<32x192xf32, #tpu.memory_space<vmem>>, vector<32x192xf32>
    tpu.vector_store %arg7[%c0_30, %c0_31], %54 {strides = array<i32>} : memref<32x192xf32, #tpu.memory_space<vmem>>, vector<32x192xf32>,
    return
  }
}

</mosaic_0001>

<bundles_post_ra>
// kernel: autoencoder_forward.5
= control target key start
LH: loop header
LB: loop body
LE: loop exit
PB: predicated region body
PF: predicated region fallthrough
CT: control target
= control target key end

     0   :  { %vm405_vm0 = vcmask 1044480   ;;  %vm406_vm1 = vcmask 1045504   ;;  %v2376_v0 = vmov 0.0   ;;  %v2377_v2 = vmov 65535   ;;  %s3617_s1 = inlined_call_operand.vmem [shape: bf16[27,8], index: 1, kind: input, shape index: {}]   ;;  %s3618_s0 = inlined_call_operand.vmem [shape: bf16[578,27], index: 0, kind: input, shape index: {}]   ;;  %s3619_s2 = inlined_call_operand.vmem [shape: f32[1,8], index: 2, kind: input, shape index: {}]   ;;  %s3620_s3 = inlined_call_operand.vmem [shape: bf16[578,8], index: 3, kind: output, shape index: {}]  }
   0x1   :  { %2031 = vmatprep.subr.bf16.mxu0 %v2376_v0  ;;  %2183 = vmatprep.subr.bf16.mxu1 %v2376_v0  ;;  %v2190_v1 = vld [vmem:[%s3617_s1] sm:$0xff]   ;;  %v407_v3 = vsel %vm405_vm0, 4294967295, %v2377_v2  ;;  %v2191_v4 = vld [vmem:[%s3617_s1 + $0x8] sm:$0x3f]   ;;  %vm2378_vm2 = vmmov 0   ;;  %v2193_v8 = vld [vmem:[%s3618_s0 + $0x98] sm:$0xff]  }
   0x2   :  { %2032 = vmatpush3.bf16.msra.mxu0 %v2190_v1  ;;  %2185 = vmatpush3.bf16.msra.mxu1 %v2190_v1  ;;  %v408_v5 = vsel %vm406_vm1, %v407_v3, 0  ;;  %v2192_v7 = vld [vmem:[%s3618_s0] sm:$0xff]   ;;  %vm293_vm3 = vcmask 220160   ;;  %v2194_v9 = vld [vmem:[%s3618_s0 + $0x8] sm:$0xff]   ;;  %v2196_v11 = vld [vmem:[%s3618_s0 + $0x10] sm:$0xff]   ;;  %vm1617_vm4 = vcmask 60416  }
   0x3   :  { %2033 = vmatprep.subr.bf16.mxu0 %v2376_v0  ;;  %2184 = vmatprep.subr.bf16.mxu1 %v2376_v0  ;;  %v410_v6 = vand.u32 %v2191_v4, %v408_v5  ;;  %v2195_v10 = vld [vmem:[%s3618_s0 + $0xa0] sm:$0xff]   ;;  %v2197_v12 = vld [vmem:[%s3618_s0 + $0xa8] sm:$0xff]   ;;  %v2198_v13 = vld [vmem:[%s3618_s0 + $0x18] sm:$0xff]  }
   0x4   :  { %2035 = vmatprep.mubr.msk.bf16.mxu0 %vm2378_vm2, %v2376_v0  ;;  %2111 = vmatprep.mubr.msk.bf16.mxu1 %vm2378_vm2, %v2376_v0  ;;  %v2199_v14 = vld [vmem:[%s3618_s0 + $0xb0] sm:$0xff]   ;;  %v2200_v15 = vld [vmem:[%s3618_s0 + $0x20] sm:$0xff]   ;;  %v2201_v16 = vld [vmem:[%s3618_s0 + $0xb8] sm:$0xff]  }
   0x5   :  { %v2202_v17 = vld [vmem:[%s3618_s0 + $0x28] sm:$0xff]   ;;  %v2203_v18 = vld [vmem:[%s3618_s0 + $0xc0] sm:$0xff]   ;;  %v2204_v19 = vld [vmem:[%s3618_s0 + $0x30] sm:$0xff]  }
   0x6   :  { %2034 = vmatpush3.bf16.msra.mxu0 %v410_v6  ;;  %2186 = vmatpush3.bf16.msra.mxu1 %v410_v6  ;;  %v2205_v20 = vld [vmem:[%s3618_s0 + $0xc8] sm:$0xff]   ;;  %v2206_v21 = vld [vmem:[%s3618_s0 + $0x38] sm:$0xff]   ;;  %v2207_v22 = vld [vmem:[%s3618_s0 + $0xd0] sm:$0xff]  }
   0x7   :  { %v2208_v23 = vld [vmem:[%s3618_s0 + $0x40] sm:$0xff]   ;;  %v2209_v24 = vld [vmem:[%s3618_s0 + $0xd8] sm:$0xff]   ;;  %v2210_v25 = vld [vmem:[%s3618_s0 + $0x48] sm:$0xff]  }
   0x8   :  { %v2211_v26 = vld [vmem:[%s3618_s0 + $0xe0] sm:$0xff]   ;;  %v2212_v27 = vld [vmem:[%s3618_s0 + $0x50] sm:$0xff]   ;;  %v2213_v28 = vld [vmem:[%s3618_s0 + $0xe8] sm:$0xff]  }
   0x9   :  { %2036 = vmatmul.mubr.msk.bf16.vlgmr.msra.gmra.mrb[0].mxu0 %vm293_vm3, %v2192_v7  ;;  %2112 = vmatmul.mubr.msk.bf16.vlgmr.msra.gmra.mrb[0].mxu1 %vm293_vm3, %v2193_v8  ;;  %v2214_v29 = vld [vmem:[%s3618_s0 + $0x58] sm:$0xff]   ;;  %v2215_v30 = vld [vmem:[%s3618_s0 + $0xf0] sm:$0xff]   ;;  %v2216_v31 = vld [vmem:[%s3618_s0 + $0x60] sm:$0xff]  }
   0xa   :  { %2039 = vmatprep.mubr.msk.bf16.mxu0 %vm2378_vm2, %v2376_v0  ;;  %2115 = vmatprep.mubr.msk.bf16.mxu1 %vm2378_vm2, %v2376_v0  ;;  %v2217_v32 = vld [vmem:[%s3618_s0 + $0xf8] sm:$0xff]   ;;  %v2218_v33 = vld [vmem:[%s3618_s0 + $0x68] sm:$0xff]   ;;  %v2219_v34 = vld [vmem:[%s3618_s0 + $0x100] sm:$0xff]  }
   0xb   :  { %v2220_v35 = vld [vmem:[%s3618_s0 + $0x70] sm:$0xff]   ;;  %v2221_v36 = vld [vmem:[%s3618_s0 + $0x108] sm:$0xff]   ;;  %v2222_v37 = vld [vmem:[%s3618_s0 + $0x78] sm:$0xff]  }
   0xc   :  { %v2223_v38 = vld [vmem:[%s3618_s0 + $0x110] sm:$0xff]   ;;  %v2224_v39 = vld [vmem:[%s3618_s0 + $0x80] sm:$0xff]   ;;  %v2225_v40 = vld [vmem:[%s3618_s0 + $0x118] sm:$0xff]  }
   0xd   :  { %v2226_v41 = vld [vmem:[%s3618_s0 + $0x88] sm:$0xff]   ;;  %v2227_v42 = vld [vmem:[%s3618_s0 + $0x120] ss:$0 sps:$4 sm:$0x11]   ;;  %v2228_v43 = vld [vmem:[%s3618_s0 + $0x90] sm:$0xff]  }
   0xe   :  { %v2634_v44 = vld [vmem:[%s3619_s2] ss:$0 sm:$0xff] }
  0x11   :  { %2040 = vmatmul.mubr.msk.bf16.gmra.mrb[4].mxu0 %vm293_vm3, %v2194_v9  ;;  %2116 = vmatmul.mubr.msk.bf16.gmra.mrb[4].mxu1 %vm293_vm3, %v2195_v10 }
  0x12   :  { %2043 = vmatprep.mubr.msk.bf16.mxu0 %vm2378_vm2, %v2376_v0  ;;  %2119 = vmatprep.mubr.msk.bf16.mxu1 %vm2378_vm2, %v2376_v0 }
  0x19   :  { %2044 = vmatmul.mubr.msk.bf16.gmra.mrb[8].mxu0 %vm293_vm3, %v2196_v11  ;;  %2120 = vmatmul.mubr.msk.bf16.gmra.mrb[8].mxu1 %vm293_vm3, %v2197_v12 }
  0x1a   :  { %2047 = vmatprep.mubr.msk.bf16.mxu0 %vm2378_vm2, %v2376_v0  ;;  %2123 = vmatprep.mubr.msk.bf16.mxu1 %vm2378_vm2, %v2376_v0 }
  0x21   :  { %2048 = vmatmul.mubr.msk.bf16.gmra.mrb[12].mxu0 %vm293_vm3, %v2198_v13  ;;  %2124 = vmatmul.mubr.msk.bf16.gmra.mrb[12].mxu1 %vm293_vm3, %v2199_v14 }
  0x22   :  { %2051 = vmatprep.mubr.msk.bf16.mxu0 %vm2378_vm2, %v2376_v0  ;;  %2127 = vmatprep.mubr.msk.bf16.mxu1 %vm2378_vm2, %v2376_v0 }
  0x29   :  { %2052 = vmatmul.mubr.msk.bf16.gmra.mrb[16].mxu0 %vm293_vm3, %v2200_v15  ;;  %2128 = vmatmul.mubr.msk.bf16.gmra.mrb[16].mxu1 %vm293_vm3, %v2201_v16 }
  0x2a   :  { %2055 = vmatprep.mubr.msk.bf16.mxu0 %vm2378_vm2, %v2376_v0  ;;  %2131 = vmatprep.mubr.msk.bf16.mxu1 %vm2378_vm2, %v2376_v0 }
  0x31   :  { %2056 = vmatmul.mubr.msk.bf16.gmra.mrb[20].mxu0 %vm293_vm3, %v2202_v17  ;;  %2132 = vmatmul.mubr.msk.bf16.gmra.mrb[20].mxu1 %vm293_vm3, %v2203_v18 }
  0x32   :  { %2059 = vmatprep.mubr.msk.bf16.mxu0 %vm2378_vm2, %v2376_v0  ;;  %2135 = vmatprep.mubr.msk.bf16.mxu1 %vm2378_vm2, %v2376_v0 }
  0x39   :  { %2060 = vmatmul.mubr.msk.bf16.gmra.mrb[24].mxu0 %vm293_vm3, %v2204_v19  ;;  %2136 = vmatmul.mubr.msk.bf16.gmra.mrb[24].mxu1 %vm293_vm3, %v2205_v20 }
  0x3a   :  { %2063 = vmatprep.mubr.msk.bf16.mxu0 %vm2378_vm2, %v2376_v0  ;;  %2139 = vmatprep.mubr.msk.bf16.mxu1 %vm2378_vm2, %v2376_v0 }
  0x41   :  { %2064 = vmatmul.mubr.msk.bf16.gmra.mrb[28].mxu0 %vm293_vm3, %v2206_v21  ;;  %2140 = vmatmul.mubr.msk.bf16.gmra.mrb[28].mxu1 %vm293_vm3, %v2207_v22 }
  0x42   :  { %2067 = vmatprep.mubr.msk.bf16.mxu0 %vm2378_vm2, %v2376_v0  ;;  %2143 = vmatprep.mubr.msk.bf16.mxu1 %vm2378_vm2, %v2376_v0 }
  0x49   :  { %2068 = vmatmul.mubr.msk.bf16.gmra.mrb[32].mxu0 %vm293_vm3, %v2208_v23  ;;  %2144 = vmatmul.mubr.msk.bf16.gmra.mrb[32].mxu1 %vm293_vm3, %v2209_v24 }
  0x4a   :  { %2071 = vmatprep.mubr.msk.bf16.mxu0 %vm2378_vm2, %v2376_v0  ;;  %2147 = vmatprep.mubr.msk.bf16.mxu1 %vm2378_vm2, %v2376_v0 }
  0x51   :  { %2072 = vmatmul.mubr.msk.bf16.gmra.mrb[36].mxu0 %vm293_vm3, %v2210_v25  ;;  %2148 = vmatmul.mubr.msk.bf16.gmra.mrb[36].mxu1 %vm293_vm3, %v2211_v26 }
  0x52   :  { %2075 = vmatprep.mubr.msk.bf16.mxu0 %vm2378_vm2, %v2376_v0  ;;  %2151 = vmatprep.mubr.msk.bf16.mxu1 %vm2378_vm2, %v2376_v0 }
  0x59   :  { %2076 = vmatmul.mubr.msk.bf16.gmra.mrb[40].mxu0 %vm293_vm3, %v2212_v27  ;;  %2152 = vmatmul.mubr.msk.bf16.gmra.mrb[40].mxu1 %vm293_vm3, %v2213_v28 }
  0x5a   :  { %2079 = vmatprep.mubr.msk.bf16.mxu0 %vm2378_vm2, %v2376_v0  ;;  %2155 = vmatprep.mubr.msk.bf16.mxu1 %vm2378_vm2, %v2376_v0 }
  0x61   :  { %2080 = vmatmul.mubr.msk.bf16.gmra.mrb[44].mxu0 %vm293_vm3, %v2214_v29  ;;  %2156 = vmatmul.mubr.msk.bf16.gmra.mrb[44].mxu1 %vm293_vm3, %v2215_v30 }
  0x62   :  { %2083 = vmatprep.mubr.msk.bf16.mxu0 %vm2378_vm2, %v2376_v0  ;;  %2159 = vmatprep.mubr.msk.bf16.mxu1 %vm2378_vm2, %v2376_v0 }
  0x69   :  { %2084 = vmatmul.mubr.msk.bf16.gmra.mrb[48].mxu0 %vm293_vm3, %v2216_v31  ;;  %2160 = vmatmul.mubr.msk.bf16.gmra.mrb[48].mxu1 %vm293_vm3, %v2217_v32 }
  0x6a   :  { %2087 = vmatprep.mubr.msk.bf16.mxu0 %vm2378_vm2, %v2376_v0  ;;  %2163 = vmatprep.mubr.msk.bf16.mxu1 %vm2378_vm2, %v2376_v0 }
  0x71   :  { %2088 = vmatmul.mubr.msk.bf16.gmra.mrb[52].mxu0 %vm293_vm3, %v2218_v33  ;;  %2164 = vmatmul.mubr.msk.bf16.gmra.mrb[52].mxu1 %vm293_vm3, %v2219_v34 }
  0x72   :  { %2091 = vmatprep.mubr.msk.bf16.mxu0 %vm2378_vm2, %v2376_v0  ;;  %2167 = vmatprep.mubr.msk.bf16.mxu1 %vm2378_vm2, %v2376_v0 }
  0x79   :  { %2092 = vmatmul.mubr.msk.bf16.gmra.mrb[56].mxu0 %vm293_vm3, %v2220_v35  ;;  %2168 = vmatmul.mubr.msk.bf16.gmra.mrb[56].mxu1 %vm293_vm3, %v2221_v36 }
  0x7a   :  { %2095 = vmatprep.mubr.msk.bf16.mxu0 %vm2378_vm2, %v2376_v0  ;;  %2171 = vmatprep.mubr.msk.bf16.mxu1 %vm2378_vm2, %v2376_v0 }
  0x81   :  { %2096 = vmatmul.mubr.msk.bf16.gmra.mrb[60].mxu0 %vm293_vm3, %v2222_v37  ;;  %2172 = vmatmul.mubr.msk.bf16.gmra.mrb[60].mxu1 %vm293_vm3, %v2223_v38 }
  0x82   :  { %2099 = vmatprep.mubr.msk.bf16.mxu0 %vm2378_vm2, %v2376_v0  ;;  %2175 = vmatprep.mubr.msk.bf16.mxu1 %vm2378_vm2, %v2376_v0 }
  0x89   :  { %2100 = vmatmul.mubr.msk.bf16.gmra.mrb[64].mxu0 %vm293_vm3, %v2224_v39  ;;  %2176 = vmatmul.mubr.msk.bf16.gmra.mrb[64].mxu1 %vm293_vm3, %v2225_v40 }
  0x8a   :  { %2103 = vmatprep.mubr.msk.bf16.mxu0 %vm2378_vm2, %v2376_v0  ;;  %2179 = vmatprep.mubr.msk.bf16.mxu1 %vm2378_vm2, %v2376_v0 }
  0x91   :  { %2104 = vmatmul.mubr.msk.bf16.gmra.mrb[68].mxu0 %vm293_vm3, %v2226_v41  ;;  %2180 = vmatmul.mubr.msk.bf16.gmra.mrb[68].mxu1 %vm293_vm3, %v2227_v42 }
  0x92   :  { %2107 = vmatprep.mubr.msk.bf16.mxu0 %vm2378_vm2, %v2376_v0 }
  0x99   :  { %2108 = vmatmul.mubr.msk.bf16.gmra.mrb[72].mxu0 %vm293_vm3, %v2228_v43 }
  0xdc   :  { %v446_v45 = vpop.f32.mrb[0].mxu0  ;;  %v598_v46 = vpop.f32.mrb[0].mxu1 }
  0xdd   :  { %v2637_v47 = vadd.f32 %v2634_v44, %v446_v45  ;;  %v2640_v48 = vadd.f32 %v2634_v44, %v598_v46  ;;  %v2037_v49 = vpop.f32.mrb[1].mxu0  ;;  %v2113_v50 = vpop.f32.mrb[1].mxu1 }
  0xde   :  { %v449_v51 = vpop.f32.mrb[2].mxu0  ;;  %v601_v52 = vpop.f32.mrb[2].mxu1 }
  0xdf   :  { %v813_v53 = vmin.f32 %v2637_v47, 0.0  ;;  %v851_v54 = vmin.f32 %v2640_v48, 0.0  ;;  %v2038_v55 = vpop.f32.mrb[3].mxu0  ;;  %v2114_v56 = vpop.f32.mrb[3].mxu1  ;;  %v2645_v57 = vadd.f32 %v2634_v44, %v449_v51  ;;  %v2648_v58 = vadd.f32 %v2634_v44, %v601_v52 }
  0xe0   :  { %vm740_vm5 = vcmp.gt.f32.partialorder %v2637_v47, 0.0  ;;  %vm778_vm6 = vcmp.gt.f32.partialorder %v2640_v48, 0.0 }
  0xe1   :  { %v886_v59 = vmul.f32 1.442695, %v813_v53  ;;  %v962_v60 = vmul.f32 1.442695, %v851_v54  ;;  %v814_v61 = vmin.f32 %v2645_v57, 0.0  ;;  %v852_v62 = vmin.f32 %v2648_v58, 0.0 }
  0xe2   :  { %vm741_vm7 = vcmp.gt.f32.partialorder %v2645_v57, 0.0  ;;  %vm779_vm8 = vcmp.gt.f32.partialorder %v2648_v58, 0.0 }
  0xe3   :  { %2229 = vpow2.f32 %v886_v59  ;;  %v888_v63 = vmul.f32 1.442695, %v814_v61  ;;  %v964_v0 = vmul.f32 1.442695, %v852_v62 }
  0xe4   :  { %2231 = vpow2.f32 %v962_v60  ;;  %v454_v1 = vpop.f32.mrb[4].mxu0  ;;  %v606_v2 = vpop.f32.mrb[4].mxu1 }
  0xe5   :  { %v2653_v3 = vadd.f32 %v2634_v44, %v454_v1  ;;  %v2656_v4 = vadd.f32 %v2634_v44, %v606_v2  ;;  %v2041_v5 = vpop.f32.mrb[5].mxu0  ;;  %v2117_v6 = vpop.f32.mrb[5].mxu1  ;;  %2233 = vpow2.f32 %v888_v63 }
  0xe6   :  { %v457_v7 = vpop.f32.mrb[6].mxu0  ;;  %v609_v8 = vpop.f32.mrb[6].mxu1  ;;  %2235 = vpow2.f32 %v964_v0 }
  0xe7   :  { %v815_v9 = vmin.f32 %v2653_v3, 0.0  ;;  %v2042_v10 = vpop.f32.mrb[7].mxu0  ;;  %v2118_v11 = vpop.f32.mrb[7].mxu1  ;;  %v853_v12 = vmin.f32 %v2656_v4, 0.0  ;;  %v2661_v13 = vadd.f32 %v2634_v44, %v457_v7  ;;  %v2664_v14 = vadd.f32 %v2634_v44, %v609_v8 }
  0xe8   :  { %vm742_vm9 = vcmp.gt.f32.partialorder %v2653_v3, 0.0  ;;  %vm780_vm10 = vcmp.gt.f32.partialorder %v2656_v4, 0.0 }
  0xe9   :  { %v890_v15 = vmul.f32 1.442695, %v815_v9  ;;  %v966_v16 = vmul.f32 1.442695, %v853_v12  ;;  %v816_v17 = vmin.f32 %v2661_v13, 0.0  ;;  %v854_v18 = vmin.f32 %v2664_v14, 0.0 }
  0xea   :  { %vm743_vm11 = vcmp.gt.f32.partialorder %v2661_v13, 0.0  ;;  %vm781_vm12 = vcmp.gt.f32.partialorder %v2664_v14, 0.0 }
  0xeb   :  { %2237 = vpow2.f32 %v890_v15  ;;  %v892_v19 = vmul.f32 1.442695, %v816_v17  ;;  %v968_v23 = vmul.f32 1.442695, %v854_v18 }
  0xec   :  { %2239 = vpow2.f32 %v966_v16  ;;  %v462_v20 = vpop.f32.mrb[8].mxu0  ;;  %v614_v21 = vpop.f32.mrb[8].mxu1 }
  0xed   :  { %v2230_v22 = vpop.eup %2229  ;;  %v2669_v24 = vadd.f32 %v2634_v44, %v462_v20  ;;  %v2672_v25 = vadd.f32 %v2634_v44, %v614_v21  ;;  %v2045_v26 = vpop.f32.mrb[9].mxu0  ;;  %2241 = vpow2.f32 %v892_v19 }
  0xee   :  { %v2121_v27 = vpop.f32.mrb[9].mxu1  ;;  %v2232_v28 = vpop.eup %2231  ;;  %v1773_v29 = vadd.f32 -1.0, %v2230_v22  ;;  %2243 = vpow2.f32 %v968_v23 }
  0xef   :  { %v465_v30 = vpop.f32.mrb[10].mxu0  ;;  %v617_v31 = vpop.f32.mrb[10].mxu1  ;;  %v1811_v32 = vadd.f32 -1.0, %v2232_v28  ;;  %v817_v33 = vmin.f32 %v2669_v24, 0.0  ;;  %v855_v38 = vmin.f32 %v2672_v25, 0.0  ;;  %vm744_vm13 = vcmp.gt.f32.partialorder %v2669_v24, 0.0 }
  0xf0   :  { %v2046_v34 = vpop.f32.mrb[11].mxu0  ;;  %v2122_v35 = vpop.f32.mrb[11].mxu1  ;;  %v1105_v37 = vmul.f32 1.6732632, %v1773_v29  ;;  %v2681_v39 = vadd.f32 %v2634_v44, %v465_v30  ;;  %v2685_v45 = vadd.f32 %v2634_v44, %v617_v31  ;;  %vm782_vm14 = vcmp.gt.f32.partialorder %v2672_v25, 0.0 }
  0xf1   :  { %v2234_v36 = vpop.eup %2233  ;;  %v1143_v41 = vmul.f32 1.6732632, %v1811_v32  ;;  %v894_v43 = vmul.f32 1.442695, %v817_v33  ;;  %v970_v50 = vmul.f32 1.442695, %v855_v38 }
  0xf2   :  { %v2236_v40 = vpop.eup %2235  ;;  %v1774_v42 = vadd.f32 -1.0, %v2234_v36  ;;  %v1178_v46 = vsel %vm740_vm5, %v2637_v47, %v1105_v37  ;;  %v818_v56 = vmin.f32 %v2681_v39, 0.0  ;;  %v856_v62 = vmin.f32 %v2685_v45, 0.0 }
  0xf3   :  { %v1812_v49 = vadd.f32 -1.0, %v2236_v40  ;;  %v1251_v51 = vmul.f32 1.050701, %v1178_v46  ;;  %v1216_v52 = vsel %vm778_vm6, %v2640_v48, %v1143_v41  ;;  %2245 = vpow2.f32 %v894_v43 }
  0xf4   :  { %v1106_v53 = vmul.f32 1.6732632, %v1774_v42  ;;  %v1289_v54 = vmul.f32 1.050701, %v1216_v52  ;;  %2247 = vpow2.f32 %v970_v50  ;;  %v470_v59 = vpop.f32.mrb[12].mxu0  ;;  %v622_v63 = vpop.f32.mrb[12].mxu1 }
  0xf5   :  { %v1144_v55 = vmul.f32 1.6732632, %v1812_v49  ;;  %v2238_v60 = vpop.eup %2237  ;;  %v1919_v61 = vpack.c.bf16 %v1251_v51, %v1251_v51  ;;  %v2049_v48 = vpop.f32.mrb[13].mxu0  ;;  %v896_v10 = vmul.f32 1.442695, %v818_v56  ;;  %v2708_v11 = vadd.f32 %v2634_v44, %v470_v59 }
  0xf6   :  { %v1179_v47 = vsel %vm741_vm7, %v2645_v57, %v1106_v53  ;;  %v2240_v0 = vpop.eup %2239  ;;  %v1957_v1 = vpack.c.bf16 %v1289_v54, %v1289_v54  ;;  %v1775_v6 = vadd.f32 -1.0, %v2238_v60  ;;  %v2125_v7 = vpop.f32.mrb[13].mxu1  ;;  %v972_v17 = vmul.f32 1.442695, %v856_v62 }
  0xf7   :  { %v1252_v2 = vmul.f32 1.050701, %v1179_v47  ;;  %v1217_v5 = vsel %vm779_vm8, %v2648_v58, %v1144_v55  ;;  %v473_v8 = vpop.f32.mrb[14].mxu0  ;;  %1618 = vst.msk [vmem:[%s3620_s3] sm:$0xf] %vm1617_vm4, %v1919_v61  ;;  %v1813_v9 = vadd.f32 -1.0, %v2240_v0  ;;  %v2242_v15 = vpop.eup %2241  ;;  %v2715_v18 = vadd.f32 %v2634_v44, %v622_v63 }
  0xf8   :  { %v1290_v57 = vmul.f32 1.050701, %v1217_v5  ;;  %v625_v12 = vpop.f32.mrb[14].mxu1  ;;  %1656 = vst.msk [vmem:[%s3620_s3 + $0x98] sm:$0xf] %vm1617_vm4, %v1957_v1  ;;  %v2050_v19 = vpop.f32.mrb[15].mxu0  ;;  %2249 = vpow2.f32 %v896_v10  ;;  %v2739_v40 = vadd.f32 %v2634_v44, %v473_v8 }
  0xf9   :  { %v1920_v58 = vpack.c.bf16 %v1252_v2, %v1252_v2  ;;  %v1107_v16 = vmul.f32 1.6732632, %v1775_v6  ;;  %v2126_v20 = vpop.f32.mrb[15].mxu1  ;;  %v2244_v21 = vpop.eup %2243  ;;  %v1145_v23 = vmul.f32 1.6732632, %v1813_v9  ;;  %v1776_v26 = vadd.f32 -1.0, %v2242_v15 }
  0xfa   :  { %v1958_v22 = vpack.c.bf16 %v1290_v57, %v1290_v57  ;;  %v1814_v28 = vadd.f32 -1.0, %v2244_v21  ;;  %2251 = vpow2.f32 %v972_v17  ;;  %v819_v32 = vmin.f32 %v2708_v11, 0.0 }
  0xfb   :  { %1619 = vst.msk [vmem:[%s3620_s3 + $0x4] sm:$0xf] %vm1617_vm4, %v1920_v58  ;;  %v1180_v27 = vsel %vm742_vm9, %v2653_v3, %v1107_v16  ;;  %v1218_v30 = vsel %vm780_vm10, %v2656_v4, %v1145_v23  ;;  %v1108_v31 = vmul.f32 1.6732632, %v1776_v26  ;;  %v857_v3 = vmin.f32 %v2715_v18, 0.0 }
  0xfc   :  { %1657 = vst.msk [vmem:[%s3620_s3 + $0x9c] sm:$0xf] %vm1617_vm4, %v1958_v22  ;;  %v1253_v29 = vmul.f32 1.050701, %v1180_v27  ;;  %v1291_v33 = vmul.f32 1.050701, %v1218_v30  ;;  %v2755_v63 = vadd.f32 %v2634_v44, %v625_v12 }
  0xfd   :  { %v1146_v34 = vmul.f32 1.6732632, %v1814_v28  ;;  %v2246_v35 = vpop.eup %2245  ;;  %v1181_v37 = vsel %vm743_vm11, %v2661_v13, %v1108_v31  ;;  %v898_v38 = vmul.f32 1.442695, %v819_v32  ;;  %v478_v4 = vpop.f32.mrb[16].mxu0  ;;  %v820_v59 = vmin.f32 %v2739_v40, 0.0 }
  0xfe   :  { %v1921_v36 = vpack.c.bf16 %v1253_v29, %v1253_v29  ;;  %v630_v41 = vpop.f32.mrb[16].mxu1  ;;  %v2248_v42 = vpop.eup %2247  ;;  %v1959_v43 = vpack.c.bf16 %v1291_v33, %v1291_v33  ;;  %v1254_v46 = vmul.f32 1.050701, %v1181_v37  ;;  %v1777_v50 = vadd.f32 -1.0, %v2246_v35 }
  0xff   :  { %v1219_v49 = vsel %vm781_vm12, %v2664_v14, %v1146_v34  ;;  %v2053_v51 = vpop.f32.mrb[17].mxu0  ;;  %v2129_v52 = vpop.f32.mrb[17].mxu1  ;;  %v1815_v53 = vadd.f32 -1.0, %v2248_v42  ;;  %2253 = vpow2.f32 %v898_v38  ;;  %v974_v54 = vmul.f32 1.442695, %v857_v3 }
 0x100   :  { %1620 = vst.msk [vmem:[%s3620_s3 + $0x8] sm:$0xf] %vm1617_vm4, %v1921_v36  ;;  %v1292_v13 = vmul.f32 1.050701, %v1219_v49  ;;  %v481_v55 = vpop.f32.mrb[18].mxu0  ;;  %v1922_v56 = vpack.c.bf16 %v1254_v46, %v1254_v46  ;;  %v633_v60 = vpop.f32.mrb[18].mxu1  ;;  %v2765_v2 = vadd.f32 %v2634_v44, %v478_v4  ;;  %v2768_v5 = vadd.f32 %v2634_v44, %v630_v41 }
 0x101   :  { %1658 = vst.msk [vmem:[%s3620_s3 + $0xa0] sm:$0xf] %vm1617_vm4, %v1959_v43  ;;  %v1109_v14 = vmul.f32 1.6732632, %v1777_v50  ;;  %v2054_v61 = vpop.f32.mrb[19].mxu0  ;;  %2255 = vpow2.f32 %v974_v54  ;;  %v2130_v48 = vpop.f32.mrb[19].mxu1  ;;  %v2787_v30 = vadd.f32 %v2634_v44, %v481_v55  ;;  %v2798_v3 = vadd.f32 %v2634_v44, %v633_v60 }
 0x102   :  { %v1960_v47 = vpack.c.bf16 %v1292_v13, %v1292_v13  ;;  %v1147_v62 = vmul.f32 1.6732632, %v1815_v53  ;;  %1621 = vst.msk [vmem:[%s3620_s3 + $0xc] sm:$0xf] %vm1617_vm4, %v1922_v56  ;;  %v900_v1 = vmul.f32 1.442695, %v820_v59  ;;  %v2250_v6 = vpop.eup %2249 }
 0x103   :  { %v1182_v0 = vsel %vm744_vm13, %v2669_v24, %v1109_v14  ;;  %v858_v24 = vmin.f32 %v2755_v63, 0.0  ;;  %vm745_vm15 = vcmp.gt.f32.partialorder %v2681_v39, 0.0  ;;  %v1778_v10 = vadd.f32 -1.0, %v2250_v6 }
 0x104   :  { %1659 = vst.msk [vmem:[%s3620_s3 + $0xa4] sm:$0xf] %vm1617_vm4, %v1960_v47  ;;  %v1255_v7 = vmul.f32 1.050701, %v1182_v0  ;;  %v1220_v8 = vsel %vm782_vm14, %v2672_v25, %v1147_v62  ;;  %v2252_v57 = vpop.eup %2251  ;;  %2257 = vpow2.f32 %v900_v1  ;;  %v486_v12 = vpop.f32.mrb[20].mxu0  ;;  %v821_v19 = vmin.f32 %v2765_v2, 0.0 }
 0x105   :  { %v1293_v9 = vmul.f32 1.050701, %v1220_v8  ;;  %v638_v15 = vpop.f32.mrb[20].mxu1  ;;  %v1816_v16 = vadd.f32 -1.0, %v2252_v57  ;;  %v976_v17 = vmul.f32 1.442695, %v858_v24  ;;  %v2804_v38 = vadd.f32 %v2634_v44, %v486_v12 }
 0x106   :  { %v1923_v58 = vpack.c.bf16 %v1255_v7, %v1255_v7  ;;  %v2057_v20 = vpop.f32.mrb[21].mxu0  ;;  %v2133_v21 = vpop.f32.mrb[21].mxu1  ;;  %v1110_v23 = vmul.f32 1.6732632, %v1778_v10  ;;  %vm783_vm0 = vcmp.gt.f32.partialorder %v2685_v45, 0.0  ;;  %v859_v25 = vmin.f32 %v2768_v5, 0.0 }
 0x107   :  { %v1961_v22 = vpack.c.bf16 %v1293_v9, %v1293_v9  ;;  %v489_v26 = vpop.f32.mrb[22].mxu0  ;;  %v641_v27 = vpop.f32.mrb[22].mxu1  ;;  %v1148_v28 = vmul.f32 1.6732632, %v1816_v16  ;;  %2259 = vpow2.f32 %v976_v17  ;;  %v902_v29 = vmul.f32 1.442695, %v821_v19 }
 0x108   :  { %1622 = vst.msk [vmem:[%s3620_s3 + $0x10] sm:$0xf] %vm1617_vm4, %v1923_v58  ;;  %v2058_v31 = vpop.f32.mrb[23].mxu0  ;;  %v2134_v32 = vpop.f32.mrb[23].mxu1  ;;  %v1183_v33 = vsel %vm745_vm15, %v2681_v39, %v1110_v23  ;;  %vm746_vm1 = vcmp.gt.f32.partialorder %v2708_v11, 0.0  ;;  %v822_v39 = vmin.f32 %v2787_v30, 0.0  ;;  %v2816_v54 = vadd.f32 %v2634_v44, %v638_v15 }
 0x109   :  { %1660 = vst.msk [vmem:[%s3620_s3 + $0xa8] sm:$0xf] %vm1617_vm4, %v1961_v22  ;;  %v978_v34 = vmul.f32 1.442695, %v859_v25  ;;  %v2254_v35 = vpop.eup %2253  ;;  %v1256_v36 = vmul.f32 1.050701, %v1183_v33  ;;  %v1221_v37 = vsel %vm783_vm0, %v2685_v45, %v1148_v28  ;;  %2261 = vpow2.f32 %v902_v29 }
 0x10a   :  { %v1294_v4 = vmul.f32 1.050701, %v1221_v37  ;;  %v1779_v41 = vadd.f32 -1.0, %v2254_v35  ;;  %vm784_vm2 = vcmp.gt.f32.partialorder %v2715_v18, 0.0  ;;  %vm747_vm3 = vcmp.gt.f32.partialorder %v2739_v40, 0.0 }
 0x10b   :  { %2263 = vpow2.f32 %v978_v34  ;;  %v2256_v42 = vpop.eup %2255  ;;  %v1924_v43 = vpack.c.bf16 %v1256_v36, %v1256_v36  ;;  %v860_v46 = vmin.f32 %v2798_v3, 0.0  ;;  %v904_v51 = vmul.f32 1.442695, %v822_v39 }
 0x10c   :  { %v1962_v49 = vpack.c.bf16 %v1294_v4, %v1294_v4  ;;  %v1111_v50 = vmul.f32 1.6732632, %v1779_v41  ;;  %v1817_v45 = vadd.f32 -1.0, %v2256_v42  ;;  %v494_v52 = vpop.f32.mrb[24].mxu0  ;;  %v823_v53 = vmin.f32 %v2804_v38, 0.0  ;;  %v646_v56 = vpop.f32.mrb[24].mxu1 }
 0x10d   :  { %1623 = vst.msk [vmem:[%s3620_s3 + $0x14] sm:$0xf] %vm1617_vm4, %v1924_v43  ;;  %v980_v13 = vmul.f32 1.442695, %v860_v46  ;;  %v2819_v55 = vadd.f32 %v2634_v44, %v489_v26  ;;  %v2061_v14 = vpop.f32.mrb[25].mxu0  ;;  %2265 = vpow2.f32 %v904_v51  ;;  %v2829_v47 = vadd.f32 %v2634_v44, %v641_v27  ;;  %v2137_v62 = vpop.f32.mrb[25].mxu1 }
 0x10e   :  { %v2258_v59 = vpop.eup %2257  ;;  %1661 = vst.msk [vmem:[%s3620_s3 + $0xac] sm:$0xf] %vm1617_vm4, %v1962_v49  ;;  %v1184_v60 = vsel %vm746_vm1, %v2708_v11, %v1111_v50  ;;  %v1149_v61 = vmul.f32 1.6732632, %v1817_v45  ;;  %v497_v48 = vpop.f32.mrb[26].mxu0  ;;  %vm785_vm5 = vcmp.gt.f32.partialorder %v2755_v63, 0.0  ;;  %v2850_v22 = vadd.f32 %v2634_v44, %v494_v52 }
 0x10f   :  { %v1257_v0 = vmul.f32 1.050701, %v1184_v60  ;;  %v1780_v1 = vadd.f32 -1.0, %v2258_v59  ;;  %2267 = vpow2.f32 %v980_v13  ;;  %v906_v6 = vmul.f32 1.442695, %v823_v53  ;;  %v2831_v7 = vpop.f32.mrb[26].mxu1 }
 0x110   :  { %v1222_v8 = vsel %vm784_vm2, %v2715_v18, %v1149_v61  ;;  %vm748_vm6 = vcmp.gt.f32.partialorder %v2765_v2, 0.0  ;;  %v861_v11 = vmin.f32 %v2816_v54, 0.0  ;;  %v2062_v24 = vpop.f32.mrb[27].mxu0  ;;  %v2138_v57 = vpop.f32.mrb[27].mxu1  ;;  %vm786_vm7 = vcmp.gt.f32.partialorder %v2768_v5, 0.0 }
 0x111   :  { %v2260_v9 = vpop.eup %2259  ;;  %v1925_v10 = vpack.c.bf16 %v1257_v0, %v1257_v0  ;;  %v1295_v12 = vmul.f32 1.050701, %v1222_v8  ;;  %v1112_v15 = vmul.f32 1.6732632, %v1780_v1  ;;  %2269 = vpow2.f32 %v906_v6 }
 0x112   :  { %v1818_v58 = vadd.f32 -1.0, %v2260_v9  ;;  %v982_v16 = vmul.f32 1.442695, %v861_v11  ;;  %v824_v17 = vmin.f32 %v2819_v55, 0.0  ;;  %v862_v21 = vmin.f32 %v2829_v47, 0.0 }
 0x113   :  { %v2262_v18 = vpop.eup %2261  ;;  %1624 = vst.msk [vmem:[%s3620_s3 + $0x18] sm:$0xf] %vm1617_vm4, %v1925_v10  ;;  %v1963_v19 = vpack.c.bf16 %v1295_v12, %v1295_v12  ;;  %v1185_v20 = vsel %vm747_vm3, %v2739_v40, %v1112_v15  ;;  %vm749_vm8 = vcmp.gt.f32.partialorder %v2787_v30, 0.0  ;;  %v825_v35 = vmin.f32 %v2850_v22, 0.0 }
 0x114   :  { %v1258_v25 = vmul.f32 1.050701, %v1185_v20  ;;  %v1150_v26 = vmul.f32 1.6732632, %v1818_v58  ;;  %v1781_v27 = vadd.f32 -1.0, %v2262_v18  ;;  %2271 = vpow2.f32 %v982_v16  ;;  %v502_v28 = vpop.f32.mrb[28].mxu0 }
 0x115   :  { %v2264_v23 = vpop.eup %2263  ;;  %1662 = vst.msk [vmem:[%s3620_s3 + $0xb0] sm:$0xf] %vm1617_vm4, %v1963_v19  ;;  %v908_v40 = vmul.f32 1.442695, %v824_v17  ;;  %v984_v31 = vmul.f32 1.442695, %v862_v21  ;;  %v2864_v39 = vadd.f32 %v2634_v44, %v646_v56  ;;  %v2876_v50 = vadd.f32 %v2634_v44, %v497_v48 }
 0x116   :  { %v1819_v29 = vadd.f32 -1.0, %v2264_v23  ;;  %v1926_v32 = vpack.c.bf16 %v1258_v25, %v1258_v25  ;;  %v1223_v33 = vsel %vm785_vm5, %v2755_v63, %v1150_v26  ;;  %v1113_v34 = vmul.f32 1.6732632, %v1781_v27  ;;  %v2861_v36 = vpop.f32.mrb[28].mxu1  ;;  %v2065_v37 = vpop.f32.mrb[29].mxu0 }
 0x117   :  { %v1296_v4 = vmul.f32 1.050701, %v1223_v33  ;;  %2273 = vpow2.f32 %v908_v40  ;;  %v2141_v42 = vpop.f32.mrb[29].mxu1  ;;  %v2866_v43 = vpop.f32.mrb[30].mxu0  ;;  %v910_v49 = vmul.f32 1.442695, %v825_v35  ;;  %v2904_v10 = vadd.f32 %v2634_v44, %v2831_v7 }
 0x118   :  { %v1151_v41 = vmul.f32 1.6732632, %v1819_v29  ;;  %v2266_v46 = vpop.eup %2265  ;;  %1625 = vst.msk [vmem:[%s3620_s3 + $0x1c] sm:$0xf] %vm1617_vm4, %v1926_v32  ;;  %v1186_v63 = vsel %vm748_vm6, %v2765_v2, %v1113_v34  ;;  %2275 = vpow2.f32 %v984_v31  ;;  %v2878_v45 = vpop.f32.mrb[30].mxu1  ;;  %vm787_vm9 = vcmp.gt.f32.partialorder %v2798_v3, 0.0 }
 0x119   :  { %v2066_v51 = vpop.f32.mrb[31].mxu0  ;;  %v2268_v52 = vpop.eup %2267  ;;  %v1964_v13 = vpack.c.bf16 %v1296_v4, %v1296_v4  ;;  %v1259_v53 = vmul.f32 1.050701, %v1186_v63  ;;  %v1782_v14 = vadd.f32 -1.0, %v2266_v46  ;;  %2277 = vpow2.f32 %v910_v49 }
 0x11a   :  { %v1224_v56 = vsel %vm786_vm7, %v2768_v5, %v1151_v41  ;;  %v2142_v59 = vpop.f32.mrb[31].mxu1  ;;  %v1820_v2 = vadd.f32 -1.0, %v2268_v52  ;;  %vm750_vm10 = vcmp.gt.f32.partialorder %v2804_v38, 0.0  ;;  %v863_v0 = vmin.f32 %v2864_v39, 0.0 }
 0x11b   :  { %v1297_v60 = vmul.f32 1.050701, %v1224_v56  ;;  %v2270_v61 = vpop.eup %2269  ;;  %1663 = vst.msk [vmem:[%s3620_s3 + $0xb4] sm:$0xf] %vm1617_vm4, %v1964_v13  ;;  %v1927_v62 = vpack.c.bf16 %v1259_v53, %v1259_v53  ;;  %v1114_v48 = vmul.f32 1.6732632, %v1782_v14  ;;  %v2907_v12 = vadd.f32 %v2634_v44, %v502_v28 }
 0x11c   :  { %v1152_v1 = vmul.f32 1.6732632, %v1820_v2  ;;  %v1783_v6 = vadd.f32 -1.0, %v2270_v61  ;;  %v826_v8 = vmin.f32 %v2876_v50, 0.0  ;;  %v2891_v11 = vpop.f32.mrb[32].mxu0  ;;  %v2893_v24 = vpop.f32.mrb[32].mxu1  ;;  %v2933_v37 = vadd.f32 %v2634_v44, %v2861_v36 }
 0x11d   :  { %v1965_v5 = vpack.c.bf16 %v1297_v60, %v1297_v60  ;;  %1626 = vst.msk [vmem:[%s3620_s3 + $0x20] sm:$0xf] %vm1617_vm4, %v1927_v62  ;;  %v1187_v57 = vsel %vm749_vm8, %v2787_v30, %v1114_v48  ;;  %v986_v9 = vmul.f32 1.442695, %v863_v0  ;;  %v2069_v15 = vpop.f32.mrb[33].mxu0  ;;  %v2145_v58 = vpop.f32.mrb[33].mxu1  ;;  %v2944_v46 = vadd.f32 %v2634_v44, %v2866_v43 }
 0x11e   :  { %v2272_v16 = vpop.eup %2271  ;;  %v1260_v17 = vmul.f32 1.050701, %v1187_v57  ;;  %v1225_v30 = vsel %vm787_vm9, %v2798_v3, %v1152_v1  ;;  %v1115_v18 = vmul.f32 1.6732632, %v1783_v6  ;;  %v912_v19 = vmul.f32 1.442695, %v826_v8 }
 0x11f   :  { %1664 = vst.msk [vmem:[%s3620_s3 + $0xb8] sm:$0xf] %vm1617_vm4, %v1965_v5  ;;  %v1298_v7 = vmul.f32 1.050701, %v1225_v30  ;;  %vm788_vm11 = vcmp.gt.f32.partialorder %v2816_v54, 0.0  ;;  %v1821_v20 = vadd.f32 -1.0, %v2272_v16  ;;  %2279 = vpow2.f32 %v986_v9 }
 0x120   :  { %v2917_v21 = vpop.f32.mrb[34].mxu0  ;;  %v2919_v23 = vpop.f32.mrb[34].mxu1  ;;  %v1928_v25 = vpack.c.bf16 %v1260_v17, %v1260_v17  ;;  %v1188_v26 = vsel %vm750_vm10, %v2804_v38, %v1115_v18  ;;  %2281 = vpow2.f32 %v912_v19  ;;  %v864_v27 = vmin.f32 %v2904_v10, 0.0 }
 0x121   :  { %v2070_v3 = vpop.f32.mrb[35].mxu0  ;;  %v2146_v28 = vpop.f32.mrb[35].mxu1  ;;  %v1966_v40 = vpack.c.bf16 %v1298_v7, %v1298_v7  ;;  %v1261_v31 = vmul.f32 1.050701, %v1188_v26  ;;  %v1153_v32 = vmul.f32 1.6732632, %v1821_v20  ;;  %v2972_v5 = vadd.f32 %v2634_v44, %v2891_v11 }
 0x122   :  { %v2274_v29 = vpop.eup %2273  ;;  %vm751_vm12 = vcmp.gt.f32.partialorder %v2819_v55, 0.0  ;;  %1627 = vst.msk [vmem:[%s3620_s3 + $0x24] sm:$0xf] %vm1617_vm4, %v1928_v25  ;;  %v988_v35 = vmul.f32 1.442695, %v864_v27  ;;  %v827_v38 = vmin.f32 %v2907_v12, 0.0  ;;  %v2981_v9 = vadd.f32 %v2634_v44, %v2893_v24 }
 0x123   :  { %v2276_v33 = vpop.eup %2275  ;;  %v1784_v34 = vadd.f32 -1.0, %v2274_v29  ;;  %1665 = vst.msk [vmem:[%s3620_s3 + $0xbc] sm:$0xf] %vm1617_vm4, %v1966_v40  ;;  %v1929_v4 = vpack.c.bf16 %v1261_v31, %v1261_v31  ;;  %v1226_v41 = vsel %vm788_vm11, %v2816_v54, %v1153_v32  ;;  %vm789_vm13 = vcmp.gt.f32.partialorder %v2829_v47, 0.0 }
 0x124   :  { %v1822_v42 = vadd.f32 -1.0, %v2276_v33  ;;  %v2278_v63 = vpop.eup %2277  ;;  %v1299_v49 = vmul.f32 1.050701, %v1226_v41  ;;  %2283 = vpow2.f32 %v988_v35  ;;  %v914_v36 = vmul.f32 1.442695, %v827_v38  ;;  %v2952_v53 = vpop.f32.mrb[36].mxu0 }
 0x125   :  { %v1116_v51 = vmul.f32 1.6732632, %v1784_v34  ;;  %1628 = vst.msk [vmem:[%s3620_s3 + $0x28] sm:$0xf] %vm1617_vm4, %v1929_v4  ;;  %v1785_v13 = vadd.f32 -1.0, %v2278_v63  ;;  %v865_v54 = vmin.f32 %v2933_v37, 0.0  ;;  %v3012_v32 = vadd.f32 %v2634_v44, %v2917_v21 }
 0x126   :  { %v1154_v52 = vmul.f32 1.6732632, %v1822_v42  ;;  %v1967_v43 = vpack.c.bf16 %v1299_v49, %v1299_v49  ;;  %vm752_vm14 = vcmp.gt.f32.partialorder %v2850_v22, 0.0  ;;  %2285 = vpow2.f32 %v914_v36  ;;  %v2958_v14 = vpop.f32.mrb[36].mxu1  ;;  %v2073_v59 = vpop.f32.mrb[37].mxu0 }
 0x127   :  { %v1189_v56 = vsel %vm751_vm12, %v2819_v55, %v1116_v51  ;;  %v1117_v61 = vmul.f32 1.6732632, %v1785_v13  ;;  %v990_v62 = vmul.f32 1.442695, %v865_v54  ;;  %v828_v0 = vmin.f32 %v2944_v46, 0.0  ;;  %v2149_v1 = vpop.f32.mrb[37].mxu1 }
 0x128   :  { %v1262_v60 = vmul.f32 1.050701, %v1189_v56  ;;  %v1227_v2 = vsel %vm789_vm13, %v2829_v47, %v1154_v52  ;;  %1666 = vst.msk [vmem:[%s3620_s3 + $0xc0] sm:$0xf] %vm1617_vm4, %v1967_v43  ;;  %v2968_v55 = vadd.f32 %v2634_v44, %v2878_v45  ;;  %v2974_v47 = vpop.f32.mrb[38].mxu0  ;;  %v2983_v45 = vpop.f32.mrb[38].mxu1  ;;  %v3016_v33 = vadd.f32 %v2634_v44, %v2919_v23 }
 0x129   :  { %v1300_v48 = vmul.f32 1.050701, %v1227_v2  ;;  %v2280_v6 = vpop.eup %2279  ;;  %v1190_v57 = vsel %vm752_vm14, %v2850_v22, %v1117_v61  ;;  %2287 = vpow2.f32 %v990_v62  ;;  %v2074_v15 = vpop.f32.mrb[39].mxu0  ;;  %v916_v30 = vmul.f32 1.442695, %v828_v0 }
 0x12a   :  { %v1930_v8 = vpack.c.bf16 %v1262_v60, %v1262_v60  ;;  %v2282_v58 = vpop.eup %2281  ;;  %v1263_v16 = vmul.f32 1.050701, %v1190_v57  ;;  %v1823_v17 = vadd.f32 -1.0, %v2280_v6  ;;  %v2150_v18 = vpop.f32.mrb[39].mxu1  ;;  %vm790_vm15 = vcmp.gt.f32.partialorder %v2864_v39, 0.0 }
 0x12b   :  { %v1968_v11 = vpack.c.bf16 %v1300_v48, %v1300_v48  ;;  %vm753_vm0 = vcmp.gt.f32.partialorder %v2876_v50, 0.0  ;;  %v1786_v22 = vadd.f32 -1.0, %v2282_v58  ;;  %v866_v24 = vmin.f32 %v2968_v55, 0.0 }
 0x12c   :  { %1629 = vst.msk [vmem:[%s3620_s3 + $0x2c] sm:$0xf] %vm1617_vm4, %v1930_v8  ;;  %v1931_v19 = vpack.c.bf16 %v1263_v16, %v1263_v16  ;;  %v1155_v7 = vmul.f32 1.6732632, %v1823_v17  ;;  %2289 = vpow2.f32 %v916_v30  ;;  %v829_v20 = vmin.f32 %v2972_v5, 0.0  ;;  %v2997_v25 = vpop.f32.mrb[40].mxu0 }
 0x12d   :  { %1667 = vst.msk [vmem:[%s3620_s3 + $0xc4] sm:$0xf] %vm1617_vm4, %v1968_v11  ;;  %v2999_v26 = vpop.f32.mrb[40].mxu1  ;;  %v1118_v27 = vmul.f32 1.6732632, %v1786_v22  ;;  %vm791_vm1 = vcmp.gt.f32.partialorder %v2904_v10, 0.0  ;;  %v3038_v61 = vadd.f32 %v2634_v44, %v2952_v53  ;;  %v3046_v1 = vadd.f32 %v2634_v44, %v2958_v14 }
 0x12e   :  { %v992_v3 = vmul.f32 1.442695, %v866_v24  ;;  %v867_v28 = vmin.f32 %v2981_v9, 0.0  ;;  %v2284_v29 = vpop.eup %2283  ;;  %1630 = vst.msk [vmem:[%s3620_s3 + $0x30] sm:$0xf] %vm1617_vm4, %v1931_v19  ;;  %v1228_v40 = vsel %vm790_vm15, %v2864_v39, %v1155_v7  ;;  %v2077_v34 = vpop.f32.mrb[41].mxu0  ;;  %v3072_v7 = vadd.f32 %v2634_v44, %v2974_v47 }
 0x12f   :  { %v918_v31 = vmul.f32 1.442695, %v829_v20  ;;  %v2153_v35 = vpop.f32.mrb[41].mxu1  ;;  %v1301_v38 = vmul.f32 1.050701, %v1228_v40  ;;  %v1191_v4 = vsel %vm753_vm0, %v2876_v50, %v1118_v27  ;;  %v1824_v41 = vadd.f32 -1.0, %v2284_v29 }
 0x130   :  { %2291 = vpow2.f32 %v992_v3  ;;  %v3021_v42 = vpop.f32.mrb[42].mxu0  ;;  %v3023_v39 = vpop.f32.mrb[42].mxu1  ;;  %v1264_v21 = vmul.f32 1.050701, %v1191_v4  ;;  %vm754_vm2 = vcmp.gt.f32.partialorder %v2907_v12, 0.0  ;;  %v830_v13 = vmin.f32 %v3012_v32, 0.0 }
 0x131   :  { %v2286_v63 = vpop.eup %2285  ;;  %2293 = vpow2.f32 %v918_v31  ;;  %v994_v23 = vmul.f32 1.442695, %v867_v28  ;;  %v2078_v49 = vpop.f32.mrb[43].mxu0  ;;  %v1969_v51 = vpack.c.bf16 %v1301_v38, %v1301_v38  ;;  %v1156_v36 = vmul.f32 1.6732632, %v1824_v41 }
 0x132   :  { %v1787_v52 = vadd.f32 -1.0, %v2286_v63  ;;  %v2154_v54 = vpop.f32.mrb[43].mxu1  ;;  %v1932_v50 = vpack.c.bf16 %v1264_v21, %v1264_v21  ;;  %vm792_vm3 = vcmp.gt.f32.partialorder %v2933_v37, 0.0  ;;  %v868_v43 = vmin.f32 %v3016_v33, 0.0 }
 0x133   :  { %2295 = vpow2.f32 %v994_v23  ;;  %v2288_v56 = vpop.eup %2287  ;;  %1668 = vst.msk [vmem:[%s3620_s3 + $0xc8] sm:$0xf] %vm1617_vm4, %v1969_v51  ;;  %v1229_v59 = vsel %vm791_vm1, %v2904_v10, %v1156_v36  ;;  %v920_v2 = vmul.f32 1.442695, %v830_v13  ;;  %vm755_vm5 = vcmp.gt.f32.partialorder %v2944_v46, 0.0 }
 0x134   :  { %v1119_v60 = vmul.f32 1.6732632, %v1787_v52  ;;  %1631 = vst.msk [vmem:[%s3620_s3 + $0x34] sm:$0xf] %vm1617_vm4, %v1932_v50  ;;  %v1302_v62 = vmul.f32 1.050701, %v1229_v59  ;;  %v3076_v20 = vadd.f32 %v2634_v44, %v2983_v45  ;;  %v3091_v23 = vadd.f32 %v2634_v44, %v2997_v25 }
 0x135   :  { %v1825_v48 = vadd.f32 -1.0, %v2288_v56  ;;  %v996_v0 = vmul.f32 1.442695, %v868_v43  ;;  %v3048_v6 = vpop.f32.mrb[44].mxu0  ;;  %2297 = vpow2.f32 %v920_v2  ;;  %v831_v53 = vmin.f32 %v3038_v61, 0.0  ;;  %v3055_v8 = vpop.f32.mrb[44].mxu1 }
 0x136   :  { %v1192_v10 = vsel %vm754_vm2, %v2907_v12, %v1119_v60  ;;  %v2081_v57 = vpop.f32.mrb[45].mxu0  ;;  %v2290_v15 = vpop.eup %2289  ;;  %v1970_v58 = vpack.c.bf16 %v1302_v62, %v1302_v62  ;;  %vm793_vm6 = vcmp.gt.f32.partialorder %v2968_v55, 0.0  ;;  %v869_v18 = vmin.f32 %v3046_v1, 0.0  ;;  %v3108_v44 = vld [vmem:[%s3619_s2] ss:$0 sm:$0xff] }
 0x137   :  { %v1265_v11 = vmul.f32 1.050701, %v1192_v10  ;;  %v1157_v16 = vmul.f32 1.6732632, %v1825_v48  ;;  %2299 = vpow2.f32 %v996_v0  ;;  %v2157_v14 = vpop.f32.mrb[45].mxu1  ;;  %v3057_v17 = vpop.f32.mrb[46].mxu0  ;;  %v3112_v25 = vadd.f32 %v3108_v44, %v2999_v26 }
 0x138   :  { %v1788_v30 = vadd.f32 -1.0, %v2290_v15  ;;  %v922_v12 = vmul.f32 1.442695, %v831_v53  ;;  %v3061_v22 = vpop.f32.mrb[46].mxu1  ;;  %1669 = vst.msk [vmem:[%s3620_s3 + $0xcc] sm:$0xf] %vm1617_vm4, %v1970_v58 }
 0x139   :  { %v1933_v24 = vpack.c.bf16 %v1265_v11, %v1265_v11  ;;  %v1230_v19 = vsel %vm792_vm3, %v2933_v37, %v1157_v16  ;;  %v2082_v27 = vpop.f32.mrb[47].mxu0  ;;  %v2158_v3 = vpop.f32.mrb[47].mxu1  ;;  %v998_v31 = vmul.f32 1.442695, %v869_v18  ;;  %vm756_vm7 = vcmp.gt.f32.partialorder %v2972_v5, 0.0 }
 0x13a   :  { %v2292_v28 = vpop.eup %2291  ;;  %v1303_v29 = vmul.f32 1.050701, %v1230_v19  ;;  %v1120_v40 = vmul.f32 1.6732632, %v1788_v30  ;;  %2301 = vpow2.f32 %v922_v12  ;;  %vm794_vm8 = vcmp.gt.f32.partialorder %v2981_v9, 0.0 }
 0x13b   :  { %v2294_v34 = vpop.eup %2293  ;;  %1632 = vst.msk [vmem:[%s3620_s3 + $0x38] sm:$0xf] %vm1617_vm4, %v1933_v24  ;;  %v1826_v37 = vadd.f32 -1.0, %v2292_v28  ;;  %v832_v47 = vmin.f32 %v3072_v7, 0.0  ;;  %vm757_vm9 = vcmp.gt.f32.partialorder %v3012_v32, 0.0  ;;  %2303 = vpow2.f32 %v998_v31 }
 0x13c   :  { %v1971_v45 = vpack.c.bf16 %v1303_v29, %v1303_v29  ;;  %v1193_v35 = vsel %vm755_vm5, %v2944_v46, %v1120_v40  ;;  %v1789_v38 = vadd.f32 -1.0, %v2294_v34  ;;  %v870_v46 = vmin.f32 %v3076_v20, 0.0  ;;  %v3098_v36 = vpop.f32.mrb[48].mxu0  ;;  %v3100_v52 = vpop.f32.mrb[48].mxu1 }
 0x13d   :  { %v2296_v4 = vpop.eup %2295  ;;  %v1266_v41 = vmul.f32 1.050701, %v1193_v35  ;;  %v1158_v63 = vmul.f32 1.6732632, %v1826_v37  ;;  %v924_v21 = vmul.f32 1.442695, %v832_v47  ;;  %v3141_v19 = vadd.f32 %v3108_v44, %v3023_v39 }
 0x13e   :  { %1670 = vst.msk [vmem:[%s3620_s3 + $0xd0] sm:$0xf] %vm1617_vm4, %v1971_v45  ;;  %v1121_v49 = vmul.f32 1.6732632, %v1789_v38  ;;  %v1827_v51 = vadd.f32 -1.0, %v2296_v4  ;;  %v2085_v50 = vpop.f32.mrb[49].mxu0 }
 0x13f   :  { %v1934_v13 = vpack.c.bf16 %v1266_v41, %v1266_v41  ;;  %v1231_v54 = vsel %vm793_vm6, %v2968_v55, %v1158_v63  ;;  %2305 = vpow2.f32 %v924_v21  ;;  %v2161_v43 = vpop.f32.mrb[49].mxu1  ;;  %v2298_v56 = vpop.eup %2297  ;;  %v1000_v55 = vmul.f32 1.442695, %v870_v46 }
 0x140   :  { %v1304_v59 = vmul.f32 1.050701, %v1231_v54  ;;  %v1194_v60 = vsel %vm756_vm7, %v2972_v5, %v1121_v49  ;;  %v1159_v2 = vmul.f32 1.6732632, %v1827_v51  ;;  %v1790_v0 = vadd.f32 -1.0, %v2298_v56  ;;  %v3123_v10 = vpop.f32.mrb[50].mxu0 }
 0x141   :  { %v2300_v62 = vpop.eup %2299  ;;  %1633 = vst.msk [vmem:[%s3620_s3 + $0x3c] sm:$0xf] %vm1617_vm4, %v1934_v13  ;;  %v1267_v48 = vmul.f32 1.050701, %v1194_v60  ;;  %vm795_vm10 = vcmp.gt.f32.partialorder %v3016_v33, 0.0  ;;  %v833_v26 = vmin.f32 %v3091_v23, 0.0  ;;  %2307 = vpow2.f32 %v1000_v55 }
 0x142   :  { %v1972_v53 = vpack.c.bf16 %v1304_v59, %v1304_v59  ;;  %v1232_v5 = vsel %vm794_vm8, %v2981_v9, %v1159_v2  ;;  %v1828_v57 = vadd.f32 -1.0, %v2300_v62  ;;  %v3128_v15 = vpop.f32.mrb[50].mxu1  ;;  %v2086_v58 = vpop.f32.mrb[51].mxu0  ;;  %v1122_v14 = vmul.f32 1.6732632, %v1790_v0 }
 0x143   :  { %v1935_v11 = vpack.c.bf16 %v1267_v48, %v1267_v48  ;;  %v1305_v16 = vmul.f32 1.050701, %v1232_v5  ;;  %v926_v30 = vmul.f32 1.442695, %v833_v26  ;;  %v871_v24 = vmin.f32 %v3112_v25, 0.0  ;;  %v2162_v27 = vpop.f32.mrb[51].mxu1 }
 0x144   :  { %v2302_v12 = vpop.eup %2301  ;;  %1671 = vst.msk [vmem:[%s3620_s3 + $0xd4] sm:$0xf] %vm1617_vm4, %v1972_v53  ;;  %v1160_v18 = vmul.f32 1.6732632, %v1828_v57  ;;  %v3137_v9 = vadd.f32 %v3108_v44, %v3021_v42  ;;  %v1195_v28 = vsel %vm757_vm9, %v3012_v32, %v1122_v14  ;;  %v3150_v40 = vpop.f32.mrb[52].mxu0  ;;  %vm758_vm11 = vcmp.gt.f32.partialorder %v3038_v61, 0.0 }
 0x145   :  { %1634 = vst.msk [vmem:[%s3620_s3 + $0x40] sm:$0xf] %vm1617_vm4, %v1935_v11  ;;  %v1973_v3 = vpack.c.bf16 %v1305_v16, %v1305_v16  ;;  %v1791_v29 = vadd.f32 -1.0, %v2302_v12  ;;  %2309 = vpow2.f32 %v926_v30  ;;  %v3152_v42 = vpop.f32.mrb[52].mxu1  ;;  %v2304_v31 = vpop.eup %2303  ;;  %v1268_v39 = vmul.f32 1.050701, %v1195_v28 }
 0x146   :  { %v1233_v34 = vsel %vm795_vm10, %v3016_v33, %v1160_v18  ;;  %v1002_v37 = vmul.f32 1.442695, %v871_v24  ;;  %v2089_v47 = vpop.f32.mrb[53].mxu0  ;;  %v1829_v35 = vadd.f32 -1.0, %v2304_v31  ;;  %v834_v38 = vmin.f32 %v3137_v9, 0.0  ;;  %v2165_v41 = vpop.f32.mrb[53].mxu1 }
 0x147   :  { %1672 = vst.msk [vmem:[%s3620_s3 + $0xd8] sm:$0xf] %vm1617_vm4, %v1973_v3  ;;  %v1306_v32 = vmul.f32 1.050701, %v1233_v34  ;;  %v1123_v45 = vmul.f32 1.6732632, %v1791_v29  ;;  %v1936_v4 = vpack.c.bf16 %v1268_v39, %v1268_v39  ;;  %v3178_v60 = vadd.f32 %v3108_v44, %v3048_v6 }
 0x148   :  { %vm796_vm12 = vcmp.gt.f32.partialorder %v3046_v1, 0.0  ;;  %2311 = vpow2.f32 %v1002_v37  ;;  %v872_v33 = vmin.f32 %v3141_v19, 0.0  ;;  %v3165_v63 = vpop.f32.mrb[54].mxu0  ;;  %v1161_v46 = vmul.f32 1.6732632, %v1829_v35  ;;  %v3170_v54 = vpop.f32.mrb[54].mxu1 }
 0x149   :  { %v2306_v21 = vpop.eup %2305  ;;  %v1974_v49 = vpack.c.bf16 %v1306_v32, %v1306_v32  ;;  %v1196_v51 = vsel %vm758_vm11, %v3038_v61, %v1123_v45  ;;  %v928_v13 = vmul.f32 1.442695, %v834_v38  ;;  %v2090_v50 = vpop.f32.mrb[55].mxu0  ;;  %1635 = vst.msk [vmem:[%s3620_s3 + $0x44] sm:$0xf] %vm1617_vm4, %v1936_v4  ;;  %v3189_v55 = vadd.f32 %v3108_v44, %v3055_v8 }
 0x14a   :  { %v1269_v43 = vmul.f32 1.050701, %v1196_v51  ;;  %v1792_v56 = vadd.f32 -1.0, %v2306_v21  ;;  %v1004_v59 = vmul.f32 1.442695, %v872_v33  ;;  %v2166_v2 = vpop.f32.mrb[55].mxu1  ;;  %v1234_v61 = vsel %vm796_vm12, %v3046_v1, %v1161_v46 }
 0x14b   :  { %1673 = vst.msk [vmem:[%s3620_s3 + $0xdc] sm:$0xf] %vm1617_vm4, %v1974_v49  ;;  %2313 = vpow2.f32 %v928_v13  ;;  %v3193_v62 = vadd.f32 %v3108_v44, %v3057_v17  ;;  %v2308_v6 = vpop.eup %2307  ;;  %v1307_v0 = vmul.f32 1.050701, %v1234_v61  ;;  %vm759_vm13 = vcmp.gt.f32.partialorder %v3072_v7, 0.0 }
 0x14c   :  { %v1937_v48 = vpack.c.bf16 %v1269_v43, %v1269_v43  ;;  %v1124_v26 = vmul.f32 1.6732632, %v1792_v56  ;;  %2315 = vpow2.f32 %v1004_v59  ;;  %vm797_vm14 = vcmp.gt.f32.partialorder %v3076_v20, 0.0  ;;  %v3198_v5 = vpop.f32.mrb[56].mxu0  ;;  %v3200_v8 = vpop.f32.mrb[56].mxu1 }
 0x14d   :  { %v1830_v53 = vadd.f32 -1.0, %v2308_v6  ;;  %v835_v1 = vmin.f32 %v3178_v60, 0.0  ;;  %v1975_v17 = vpack.c.bf16 %v1307_v0, %v1307_v0  ;;  %vm760_vm15 = vcmp.gt.f32.partialorder %v3091_v23, 0.0  ;;  %v2093_v11 = vpop.f32.mrb[57].mxu0  ;;  %v2169_v16 = vpop.f32.mrb[57].mxu1 }
 0x14e   :  { %1636 = vst.msk [vmem:[%s3620_s3 + $0x48] sm:$0xf] %vm1617_vm4, %v1937_v48  ;;  %v1197_v57 = vsel %vm759_vm13, %v3072_v7, %v1124_v26  ;;  %v873_v58 = vmin.f32 %v3189_v55, 0.0  ;;  %v3211_v24 = vadd.f32 %v3108_v44, %v3061_v22  ;;  %v836_v3 = vmin.f32 %v3193_v62, 0.0  ;;  %v3222_v29 = vpop.f32.mrb[58].mxu0  ;;  %v3224_v31 = vpop.f32.mrb[58].mxu1 }
 0x14f   :  { %v2310_v14 = vpop.eup %2309  ;;  %v1270_v30 = vmul.f32 1.050701, %v1197_v57  ;;  %v1162_v12 = vmul.f32 1.6732632, %v1830_v53  ;;  %v930_v18 = vmul.f32 1.442695, %v835_v1  ;;  %v3220_v28 = vadd.f32 %v3108_v44, %v3098_v36 }
 0x150   :  { %1674 = vst.msk [vmem:[%s3620_s3 + $0xe0] sm:$0xf] %vm1617_vm4, %v1975_v17  ;;  %v1793_v7 = vadd.f32 -1.0, %v2310_v14  ;;  %v1006_v27 = vmul.f32 1.442695, %v873_v58  ;;  %vm798_vm0 = vcmp.gt.f32.partialorder %v3112_v25, 0.0  ;;  %v3242_v41 = vadd.f32 %v3108_v44, %v3100_v52 }
 0x151   :  { %v1938_v39 = vpack.c.bf16 %v1270_v30, %v1270_v30  ;;  %v1235_v22 = vsel %vm797_vm14, %v3076_v20, %v1162_v12  ;;  %2317 = vpow2.f32 %v930_v18  ;;  %v2094_v34 = vpop.f32.mrb[59].mxu0  ;;  %v2170_v37 = vpop.f32.mrb[59].mxu1  ;;  %v932_v36 = vmul.f32 1.442695, %v836_v3 }
 0x152   :  { %v2312_v47 = vpop.eup %2311  ;;  %v1308_v32 = vmul.f32 1.050701, %v1235_v22  ;;  %v1125_v45 = vmul.f32 1.6732632, %v1793_v7  ;;  %2319 = vpow2.f32 %v1006_v27  ;;  %vm761_vm1 = vcmp.gt.f32.partialorder %v3137_v9, 0.0 }
 0x153   :  { %1637 = vst.msk [vmem:[%s3620_s3 + $0x4c] sm:$0xf] %vm1617_vm4, %v1938_v39  ;;  %v1831_v35 = vadd.f32 -1.0, %v2312_v47  ;;  %v874_v20 = vmin.f32 %v3211_v24, 0.0  ;;  %v837_v38 = vmin.f32 %v3220_v28, 0.0  ;;  %2321 = vpow2.f32 %v932_v36 }
 0x154   :  { %v1976_v4 = vpack.c.bf16 %v1308_v32, %v1308_v32  ;;  %v1198_v33 = vsel %vm760_vm15, %v3091_v23, %v1125_v45  ;;  %v3246_v13 = vadd.f32 %v3108_v44, %v3123_v10  ;;  %vm799_vm2 = vcmp.gt.f32.partialorder %v3141_v19, 0.0  ;;  %v3254_v56 = vpop.f32.mrb[60].mxu0  ;;  %v3259_v61 = vpop.f32.mrb[60].mxu1 }
 0x155   :  { %v2314_v21 = vpop.eup %2313  ;;  %v1271_v49 = vmul.f32 1.050701, %v1198_v33  ;;  %v1163_v51 = vmul.f32 1.6732632, %v1831_v35  ;;  %v1008_v46 = vmul.f32 1.442695, %v874_v20  ;;  %v3278_v16 = vadd.f32 %v3108_v44, %v3150_v40 }
 0x156   :  { %v2316_v50 = vpop.eup %2315  ;;  %1675 = vst.msk [vmem:[%s3620_s3 + $0xe4] sm:$0xf] %vm1617_vm4, %v1976_v4  ;;  %v1794_v23 = vadd.f32 -1.0, %v2314_v21  ;;  %v934_v43 = vmul.f32 1.442695, %v837_v38  ;;  %v875_v52 = vmin.f32 %v3242_v41, 0.0  ;;  %v3300_v20 = vadd.f32 %v3108_v44, %v3152_v42 }
 0x157   :  { %v1939_v59 = vpack.c.bf16 %v1271_v49, %v1271_v49  ;;  %v1236_v10 = vsel %vm798_vm0, %v3112_v25, %v1163_v51  ;;  %v1832_v2 = vadd.f32 -1.0, %v2316_v50  ;;  %2323 = vpow2.f32 %v1008_v46  ;;  %v2097_v6 = vpop.f32.mrb[61].mxu0  ;;  %v2173_v17 = vpop.f32.mrb[61].mxu1 }
 0x158   :  { %v1309_v48 = vmul.f32 1.050701, %v1236_v10  ;;  %v1126_v0 = vmul.f32 1.6732632, %v1794_v23  ;;  %2325 = vpow2.f32 %v934_v43  ;;  %v1010_v26 = vmul.f32 1.442695, %v875_v52 }
 0x159   :  { %1638 = vst.msk [vmem:[%s3620_s3 + $0x50] sm:$0xf] %vm1617_vm4, %v1939_v59  ;;  %v1164_v53 = vmul.f32 1.6732632, %v1832_v2  ;;  %vm762_vm3 = vcmp.gt.f32.partialorder %v3178_v60, 0.0  ;;  %v838_v1 = vmin.f32 %v3246_v13, 0.0  ;;  %v3269_v25 = vadd.f32 %v3108_v44, %v3128_v15 }
 0x15a   :  { %v3271_v57 = vpop.f32.mrb[62].mxu0  ;;  %v1977_v58 = vpack.c.bf16 %v1309_v48, %v1309_v48  ;;  %v1199_v11 = vsel %vm761_vm1, %v3137_v9, %v1126_v0  ;;  %2327 = vpow2.f32 %v1010_v26  ;;  %v3280_v14 = vpop.f32.mrb[62].mxu1  ;;  %vm800_vm5 = vcmp.gt.f32.partialorder %v3189_v55, 0.0 }
 0x15b   :  { %v2098_v30 = vpop.f32.mrb[63].mxu0  ;;  %v2318_v12 = vpop.eup %2317  ;;  %v1272_v18 = vmul.f32 1.050701, %v1199_v11  ;;  %v1237_v15 = vsel %vm799_vm2, %v3141_v19, %v1164_v53  ;;  %v936_v7 = vmul.f32 1.442695, %v838_v1  ;;  %vm763_vm6 = vcmp.gt.f32.partialorder %v3193_v62, 0.0 }
 0x15c   :  { %v2174_v27 = vpop.f32.mrb[63].mxu1  ;;  %v2320_v3 = vpop.eup %2319  ;;  %1676 = vst.msk [vmem:[%s3620_s3 + $0xe8] sm:$0xf] %vm1617_vm4, %v1977_v58  ;;  %v1310_v9 = vmul.f32 1.050701, %v1237_v15  ;;  %v1795_v40 = vadd.f32 -1.0, %v2318_v12  ;;  %v3308_v51 = vadd.f32 %v3108_v44, %v3165_v63 }
 0x15d   :  { %v876_v39 = vmin.f32 %v3269_v25, 0.0  ;;  %v1940_v22 = vpack.c.bf16 %v1272_v18, %v1272_v18  ;;  %v1833_v34 = vadd.f32 -1.0, %v2320_v3  ;;  %vm801_vm7 = vcmp.gt.f32.partialorder %v3211_v24, 0.0  ;;  %v3294_v37 = vpop.f32.mrb[64].mxu0  ;;  %v3296_v47 = vpop.f32.mrb[64].mxu1 }
 0x15e   :  { %2329 = vpow2.f32 %v936_v7  ;;  %v839_v19 = vmin.f32 %v3278_v16, 0.0  ;;  %v2322_v32 = vpop.eup %2321  ;;  %v1978_v45 = vpack.c.bf16 %v1310_v9, %v1310_v9  ;;  %v1127_v36 = vmul.f32 1.6732632, %v1795_v40  ;;  %v2101_v38 = vpop.f32.mrb[65].mxu0 }
 0x15f   :  { %v1012_v35 = vmul.f32 1.442695, %v876_v39  ;;  %v2177_v4 = vpop.f32.mrb[65].mxu1  ;;  %1639 = vst.msk [vmem:[%s3620_s3 + $0x54] sm:$0xf] %vm1617_vm4, %v1940_v22  ;;  %v1796_v21 = vadd.f32 -1.0, %v2322_v32  ;;  %v3337_v7 = vadd.f32 %v3108_v44, %v3170_v54  ;;  %v3350_v9 = vadd.f32 %v3108_v44, %v3198_v5 }
 0x160   :  { %v1165_v33 = vmul.f32 1.6732632, %v1833_v34  ;;  %v938_v49 = vmul.f32 1.442695, %v839_v19  ;;  %v3310_v46 = vpop.f32.mrb[66].mxu0  ;;  %v1200_v42 = vsel %vm762_vm3, %v3178_v60, %v1127_v36  ;;  %vm764_vm8 = vcmp.gt.f32.partialorder %v3220_v28, 0.0 }
 0x161   :  { %1677 = vst.msk [vmem:[%s3620_s3 + $0xec] sm:$0xf] %vm1617_vm4, %v1978_v45  ;;  %2331 = vpow2.f32 %v1012_v35  ;;  %v877_v50 = vmin.f32 %v3300_v20, 0.0  ;;  %v3321_v23 = vpop.f32.mrb[66].mxu1  ;;  %v2102_v63 = vpop.f32.mrb[67].mxu0  ;;  %vm802_vm9 = vcmp.gt.f32.partialorder %v3242_v41, 0.0  ;;  %v3354_v54 = vadd.f32 %v3108_v44, %v3200_v8 }
 0x162   :  { %v2324_v43 = vpop.eup %2323  ;;  %v1273_v52 = vmul.f32 1.050701, %v1200_v42  ;;  %v1238_v59 = vsel %vm800_vm5, %v3189_v55, %v1165_v33  ;;  %v1128_v10 = vmul.f32 1.6732632, %v1796_v21  ;;  %2333 = vpow2.f32 %v938_v49  ;;  %v2178_v2 = vpop.f32.mrb[67].mxu1 }
 0x163   :  { %v2326_v6 = vpop.eup %2325  ;;  %v1311_v48 = vmul.f32 1.050701, %v1238_v59  ;;  %v1834_v60 = vadd.f32 -1.0, %v2324_v43  ;;  %v1014_v0 = vmul.f32 1.442695, %v877_v50  ;;  %v840_v17 = vmin.f32 %v3308_v51, 0.0 }
 0x164   :  { %v1941_v26 = vpack.c.bf16 %v1273_v52, %v1273_v52  ;;  %v1201_v53 = vsel %vm763_vm6, %v3193_v62, %v1128_v10  ;;  %v1797_v1 = vadd.f32 -1.0, %v2326_v6  ;;  %v2328_v58 = vpop.eup %2327  ;;  %v3339_v62 = vpop.f32.mrb[68].mxu0  ;;  %vm765_vm10 = vcmp.gt.f32.partialorder %v3246_v13, 0.0 }
 0x165   :  { %v1979_v11 = vpack.c.bf16 %v1311_v48, %v1311_v48  ;;  %v1274_v55 = vmul.f32 1.050701, %v1201_v53  ;;  %v1166_v30 = vmul.f32 1.6732632, %v1834_v60  ;;  %2335 = vpow2.f32 %v1014_v0  ;;  %v3356_v40 = vpop.f32.mrb[68].mxu1  ;;  %v2105_v39 = vpop.f32.mrb[69].mxu0 }
 0x166   :  { %1640 = vst.msk [vmem:[%s3620_s3 + $0x58] sm:$0xf] %vm1617_vm4, %v1941_v26  ;;  %v1129_v12 = vmul.f32 1.6732632, %v1797_v1  ;;  %v1835_v18 = vadd.f32 -1.0, %v2328_v58  ;;  %v2181_v45 = vpop.f32.mrb[69].mxu1  ;;  %v3401_v58 = vadd.f32 %v3108_v44, %v3254_v56 }
 0x167   :  { %v940_v15 = vmul.f32 1.442695, %v840_v17  ;;  %1678 = vst.msk [vmem:[%s3620_s3 + $0xf0] sm:$0xf] %vm1617_vm4, %v1979_v11  ;;  %v1942_v27 = vpack.c.bf16 %v1274_v55, %v1274_v55  ;;  %v1239_v3 = vsel %vm801_vm7, %v3211_v24, %v1166_v30  ;;  %v3361_v24 = vpop.f32.mrb[70].mxu0  ;;  %v878_v36 = vmin.f32 %v3337_v7, 0.0 }
 0x168   :  { %v2330_v22 = vpop.eup %2329  ;;  %v1312_v34 = vmul.f32 1.050701, %v1239_v3  ;;  %v1202_v19 = vsel %vm764_vm8, %v3220_v28, %v1129_v12  ;;  %v1167_v32 = vmul.f32 1.6732632, %v1835_v18  ;;  %v2106_v35 = vpop.f32.mrb[71].mxu0  ;;  %vm803_vm11 = vcmp.gt.f32.partialorder %v3269_v25, 0.0 }
 0x169   :  { %2337 = vpow2.f32 %v940_v15  ;;  %1641 = vst.msk [vmem:[%s3620_s3 + $0x5c] sm:$0xf] %vm1617_vm4, %v1942_v27  ;;  %v1275_v5 = vmul.f32 1.050701, %v1202_v19  ;;  %v1798_v8 = vadd.f32 -1.0, %v2330_v22  ;;  %v841_v4 = vmin.f32 %v3350_v9, 0.0 }
 0x16a   :  { %v1980_v38 = vpack.c.bf16 %v1312_v34, %v1312_v34  ;;  %v1240_v28 = vsel %vm802_vm9, %v3242_v41, %v1167_v32  ;;  %v737_v33 = vpop.f32.mrb[70].mxu1  ;;  %v1016_v63 = vmul.f32 1.442695, %v878_v36  ;;  %vm766_vm12 = vcmp.gt.f32.partialorder %v3278_v16, 0.0 }
 0x16b   :  { %v2332_v21 = vpop.eup %2331  ;;  %v1943_v49 = vpack.c.bf16 %v1275_v5, %v1275_v5  ;;  %v1313_v42 = vmul.f32 1.050701, %v1240_v28  ;;  %v1130_v50 = vmul.f32 1.6732632, %v1798_v8  ;;  %v942_v41 = vmul.f32 1.442695, %v841_v4 }
 0x16c   :  { %v2334_v43 = vpop.eup %2333  ;;  %1679 = vst.msk [vmem:[%s3620_s3 + $0xf4] sm:$0xf] %vm1617_vm4, %v1980_v38  ;;  %v1836_v52 = vadd.f32 -1.0, %v2332_v21  ;;  %v879_v59 = vmin.f32 %v3354_v54, 0.0  ;;  %v2182_v10 = vpop.f32.mrb[71].mxu1  ;;  %2339 = vpow2.f32 %v1016_v63  ;;  %v3393_v17 = vadd.f32 %v3108_v44, %v3222_v29 }
 0x16d   :  { %1642 = vst.msk [vmem:[%s3620_s3 + $0x60] sm:$0xf] %vm1617_vm4, %v1943_v49  ;;  %v1981_v2 = vpack.c.bf16 %v1313_v42, %v1313_v42  ;;  %v1203_v6 = vsel %vm765_vm10, %v3246_v13, %v1130_v50  ;;  %v1799_v48 = vadd.f32 -1.0, %v2334_v43  ;;  %2341 = vpow2.f32 %v942_v41  ;;  %v3403_v11 = vpop.f32.mrb[72].mxu0 }
 0x16e   :  { %v1276_v60 = vmul.f32 1.050701, %v1203_v6  ;;  %v1168_v0 = vmul.f32 1.6732632, %v1836_v52  ;;  %v1018_v26 = vmul.f32 1.442695, %v879_v59  ;;  %v3397_v13 = vadd.f32 %v3108_v44, %v3224_v31 }
 0x16f   :  { %v2336_v53 = vpop.eup %2335  ;;  %1680 = vst.msk [vmem:[%s3620_s3 + $0xf8] sm:$0xf] %vm1617_vm4, %v1981_v2  ;;  %v1131_v1 = vmul.f32 1.6732632, %v1799_v48  ;;  %v2109_v18 = vpop.f32.mrb[73].mxu0  ;;  %v842_v15 = vmin.f32 %v3393_v17, 0.0  ;;  %v3429_v38 = vadd.f32 %v3108_v44, %v3259_v61  ;;  %v3437_v28 = vadd.f32 %v3108_v44, %v3271_v57 }
 0x170   :  { %v1944_v55 = vpack.c.bf16 %v1276_v60, %v1276_v60  ;;  %v1241_v30 = vsel %vm803_vm11, %v3269_v25, %v1168_v0  ;;  %v1837_v12 = vadd.f32 -1.0, %v2336_v53  ;;  %2343 = vpow2.f32 %v1018_v26  ;;  %v3412_v27 = vpop.f32.mrb[74].mxu0 }
 0x171   :  { %v1314_v29 = vmul.f32 1.050701, %v1241_v30  ;;  %v1204_v31 = vsel %vm766_vm12, %v3278_v16, %v1131_v1  ;;  %vm804_vm13 = vcmp.gt.f32.partialorder %v3300_v20, 0.0  ;;  %v880_v39 = vmin.f32 %v3397_v13, 0.0  ;;  %v2110_v19 = vpop.f32.mrb[75].mxu0 }
 0x172   :  { %1643 = vst.msk [vmem:[%s3620_s3 + $0x64] sm:$0xf] %vm1617_vm4, %v1944_v55  ;;  %v1277_v3 = vmul.f32 1.050701, %v1204_v31  ;;  %v1169_v25 = vmul.f32 1.6732632, %v1837_v12  ;;  %v3441_v4 = vadd.f32 %v3108_v44, %v3280_v14  ;;  %v3457_v10 = vadd.f32 %v3108_v44, %v3294_v37 }
 0x173   :  { %v2338_v56 = vpop.eup %2337  ;;  %v1982_v22 = vpack.c.bf16 %v1314_v29, %v1314_v29  ;;  %vm767_vm14 = vcmp.gt.f32.partialorder %v3308_v51, 0.0  ;;  %v944_v34 = vmul.f32 1.442695, %v842_v15  ;;  %v1020_v5 = vmul.f32 1.442695, %v880_v39 }
 0x174   :  { %v1800_v16 = vadd.f32 -1.0, %v2338_v56  ;;  %v1945_v32 = vpack.c.bf16 %v1277_v3, %v1277_v3  ;;  %v1242_v45 = vsel %vm804_vm13, %v3300_v20, %v1169_v25  ;;  %v843_v8 = vmin.f32 %v3401_v58, 0.0 }
 0x175   :  { %1681 = vst.msk [vmem:[%s3620_s3 + $0xfc] sm:$0xf] %vm1617_vm4, %v1982_v22  ;;  %v1315_v36 = vmul.f32 1.050701, %v1242_v45  ;;  %2345 = vpow2.f32 %v944_v34  ;;  %v881_v49 = vmin.f32 %v3429_v38, 0.0  ;;  %vm805_vm15 = vcmp.gt.f32.partialorder %v3337_v7, 0.0 }
 0x176   :  { %v1132_v35 = vmul.f32 1.6732632, %v1800_v16  ;;  %1644 = vst.msk [vmem:[%s3620_s3 + $0x68] sm:$0xf] %vm1617_vm4, %v1945_v32  ;;  %2347 = vpow2.f32 %v1020_v5  ;;  %v946_v20 = vmul.f32 1.442695, %v843_v8  ;;  %v2340_v33 = vpop.eup %2339  ;;  %v3473_v12 = vadd.f32 %v3108_v44, %v3296_v47 }
 0x177   :  { %v1983_v21 = vpack.c.bf16 %v1315_v36, %v1315_v36  ;;  %v2342_v42 = vpop.eup %2341  ;;  %v1838_v63 = vadd.f32 -1.0, %v2340_v33  ;;  %vm768_vm0 = vcmp.gt.f32.partialorder %v3350_v9, 0.0  ;;  %v1022_v14 = vmul.f32 1.442695, %v881_v49 }
 0x178   :  { %v1205_v61 = vsel %vm767_vm14, %v3308_v51, %v1132_v35  ;;  %2349 = vpow2.f32 %v946_v20  ;;  %v1801_v57 = vadd.f32 -1.0, %v2342_v42  ;;  %v844_v43 = vmin.f32 %v3437_v28, 0.0 }
 0x179   :  { %v1278_v50 = vmul.f32 1.050701, %v1205_v61  ;;  %1682 = vst.msk [vmem:[%s3620_s3 + $0x100] sm:$0xf] %vm1617_vm4, %v1983_v21  ;;  %v1170_v41 = vmul.f32 1.6732632, %v1838_v63  ;;  %2351 = vpow2.f32 %v1022_v14  ;;  %v3478_v31 = vadd.f32 %v3108_v44, %v3310_v46 }
 0x17a   :  { %v2344_v51 = vpop.eup %2343  ;;  %v882_v59 = vmin.f32 %v3441_v4, 0.0  ;;  %v1133_v2 = vmul.f32 1.6732632, %v1801_v57  ;;  %v948_v48 = vmul.f32 1.442695, %v844_v43  ;;  %vm806_vm1 = vcmp.gt.f32.partialorder %v3354_v54, 0.0 }
 0x17b   :  { %v1946_v52 = vpack.c.bf16 %v1278_v50, %v1278_v50  ;;  %v1839_v6 = vadd.f32 -1.0, %v2344_v51  ;;  %v1243_v60 = vsel %vm805_vm15, %v3337_v7, %v1170_v41  ;;  %v845_v26 = vmin.f32 %v3457_v10, 0.0 }
 0x17c   :  { %v1024_v0 = vmul.f32 1.442695, %v882_v59  ;;  %v1316_v37 = vmul.f32 1.050701, %v1243_v60  ;;  %v1206_v53 = vsel %vm768_vm0, %v3350_v9, %v1133_v2  ;;  %2353 = vpow2.f32 %v948_v48 }
 0x17d   :  { %1645 = vst.msk [vmem:[%s3620_s3 + $0x6c] sm:$0xf] %vm1617_vm4, %v1946_v52  ;;  %v1171_v1 = vmul.f32 1.6732632, %v1839_v6  ;;  %v1279_v55 = vmul.f32 1.050701, %v1206_v53  ;;  %v3482_v9 = vadd.f32 %v3108_v44, %v3321_v23  ;;  %v3505_v8 = vadd.f32 %v3108_v44, %v3339_v62 }
 0x17e   :  { %2355 = vpow2.f32 %v1024_v0  ;;  %v950_v30 = vmul.f32 1.442695, %v845_v26  ;;  %v1984_v18 = vpack.c.bf16 %v1316_v37, %v1316_v37  ;;  %vm769_vm2 = vcmp.gt.f32.partialorder %v3393_v17, 0.0 }
 0x17f   :  { %v2346_v7 = vpop.eup %2345  ;;  %v1244_v29 = vsel %vm806_vm1, %v3354_v54, %v1171_v1  ;;  %v1947_v56 = vpack.c.bf16 %v1279_v55, %v1279_v55  ;;  %vm807_vm3 = vcmp.gt.f32.partialorder %v3397_v13, 0.0  ;;  %v883_v46 = vmin.f32 %v3473_v12, 0.0 }
 0x180   :  { %v2348_v15 = vpop.eup %2347  ;;  %v1317_v3 = vmul.f32 1.050701, %v1244_v29  ;;  %v1802_v25 = vadd.f32 -1.0, %v2346_v7  ;;  %2357 = vpow2.f32 %v950_v30  ;;  %1683 = vst.msk [vmem:[%s3620_s3 + $0x104] sm:$0xf] %vm1617_vm4, %v1984_v18  ;;  %vm770_vm5 = vcmp.gt.f32.partialorder %v3401_v58, 0.0 }
 0x181   :  { %v1840_v47 = vadd.f32 -1.0, %v2348_v15  ;;  %1646 = vst.msk [vmem:[%s3620_s3 + $0x70] sm:$0xf] %vm1617_vm4, %v1947_v56  ;;  %v846_v22 = vmin.f32 %v3478_v31, 0.0  ;;  %v1026_v19 = vmul.f32 1.442695, %v883_v46  ;;  %v3509_v36 = vadd.f32 %v3108_v44, %v3356_v40 }
 0x182   :  { %v2350_v54 = vpop.eup %2349  ;;  %v1985_v23 = vpack.c.bf16 %v1317_v3, %v1317_v3  ;;  %v1134_v39 = vmul.f32 1.6732632, %v1802_v25  ;;  %v884_v32 = vmin.f32 %v3482_v9, 0.0  ;;  %vm808_vm6 = vcmp.gt.f32.partialorder %v3429_v38, 0.0 }
 0x183   :  { %v1172_v16 = vmul.f32 1.6732632, %v1840_v47  ;;  %v1803_v34 = vadd.f32 -1.0, %v2350_v54  ;;  %v952_v5 = vmul.f32 1.442695, %v846_v22  ;;  %v2352_v35 = vpop.eup %2351  ;;  %2359 = vpow2.f32 %v1026_v19 }
 0x184   :  { %1684 = vst.msk [vmem:[%s3620_s3 + $0x108] sm:$0xf] %vm1617_vm4, %v1985_v23  ;;  %v1207_v45 = vsel %vm769_vm2, %v3393_v17, %v1134_v39  ;;  %v1841_v49 = vadd.f32 -1.0, %v2352_v35  ;;  %v1028_v17 = vmul.f32 1.442695, %v884_v32  ;;  %v847_v40 = vmin.f32 %v3505_v8, 0.0 }
 0x185   :  { %v1280_v20 = vmul.f32 1.050701, %v1207_v45  ;;  %v1245_v33 = vsel %vm807_vm3, %v3397_v13, %v1172_v16  ;;  %v1135_v21 = vmul.f32 1.6732632, %v1803_v34  ;;  %2361 = vpow2.f32 %v952_v5 }
 0x186   :  { %v1318_v61 = vmul.f32 1.050701, %v1245_v33  ;;  %v2354_v42 = vpop.eup %2353  ;;  %v1173_v13 = vmul.f32 1.6732632, %v1841_v49  ;;  %vm771_vm7 = vcmp.gt.f32.partialorder %v3437_v28, 0.0  ;;  %2363 = vpow2.f32 %v1028_v17 }
 0x187   :  { %v1948_v50 = vpack.c.bf16 %v1280_v20, %v1280_v20  ;;  %v1208_v62 = vsel %vm770_vm5, %v3401_v58, %v1135_v21  ;;  %v1804_v43 = vadd.f32 -1.0, %v2354_v42  ;;  %v954_v52 = vmul.f32 1.442695, %v847_v40 }
 0x188   :  { %v2356_v63 = vpop.eup %2355  ;;  %v1986_v57 = vpack.c.bf16 %v1318_v61, %v1318_v61  ;;  %v1281_v14 = vmul.f32 1.050701, %v1208_v62  ;;  %v1246_v59 = vsel %vm808_vm6, %v3429_v38, %v1173_v13  ;;  %v885_v6 = vmin.f32 %v3509_v36, 0.0 }
 0x189   :  { %1647 = vst.msk [vmem:[%s3620_s3 + $0x74] sm:$0xf] %vm1617_vm4, %v1948_v50  ;;  %v1842_v51 = vadd.f32 -1.0, %v2356_v63  ;;  %v1136_v2 = vmul.f32 1.6732632, %v1804_v43  ;;  %2365 = vpow2.f32 %v954_v52  ;;  %vm809_vm8 = vcmp.gt.f32.partialorder %v3441_v4, 0.0 }
 0x18a   :  { %v2358_v58 = vpop.eup %2357  ;;  %1685 = vst.msk [vmem:[%s3620_s3 + $0x10c] sm:$0xf] %vm1617_vm4, %v1986_v57  ;;  %v1949_v41 = vpack.c.bf16 %v1281_v14, %v1281_v14  ;;  %v1319_v48 = vmul.f32 1.050701, %v1246_v59  ;;  %v1030_v37 = vmul.f32 1.442695, %v885_v6  ;;  %v3538_v38 = vadd.f32 %v3108_v44, %v3361_v24 }
 0x18b   :  { %v1174_v60 = vmul.f32 1.6732632, %v1842_v51  ;;  %v1805_v0 = vadd.f32 -1.0, %v2358_v58  ;;  %v1209_v26 = vsel %vm771_vm7, %v3437_v28, %v1136_v2  ;;  %vm772_vm9 = vcmp.gt.f32.partialorder %v3457_v10, 0.0 }
 0x18c   :  { %1648 = vst.msk [vmem:[%s3620_s3 + $0x78] sm:$0xf] %vm1617_vm4, %v1949_v41  ;;  %v1987_v53 = vpack.c.bf16 %v1319_v48, %v1319_v48  ;;  %v1282_v1 = vmul.f32 1.050701, %v1209_v26  ;;  %2367 = vpow2.f32 %v1030_v37  ;;  %v848_v18 = vmin.f32 %v3538_v38, 0.0 }
 0x18d   :  { %v1247_v55 = vsel %vm809_vm8, %v3441_v4, %v1174_v60  ;;  %v1137_v30 = vmul.f32 1.6732632, %v1805_v0  ;;  %v2360_v29 = vpop.eup %2359  ;;  %v3550_v15 = vadd.f32 %v3108_v44, %v3403_v11  ;;  %v3554_v4 = vadd.f32 %v3108_v44, %v3412_v27 }
 0x18e   :  { %v1320_v7 = vmul.f32 1.050701, %v1247_v55  ;;  %1686 = vst.msk [vmem:[%s3620_s3 + $0x110] sm:$0xf] %vm1617_vm4, %v1987_v53  ;;  %v1950_v28 = vpack.c.bf16 %v1282_v1, %v1282_v1  ;;  %v1843_v47 = vadd.f32 -1.0, %v2360_v29  ;;  %vm810_vm10 = vcmp.gt.f32.partialorder %v3473_v12, 0.0 }
 0x18f   :  { %v1210_v24 = vsel %vm772_vm9, %v3457_v10, %v1137_v30  ;;  %v2362_v56 = vpop.eup %2361  ;;  %v956_v46 = vmul.f32 1.442695, %v848_v18  ;;  %v849_v10 = vmin.f32 %v3550_v15, 0.0  ;;  %v850_v27 = vmin.f32 %v3554_v4, 0.0 }
 0x190   :  { %v1988_v3 = vpack.c.bf16 %v1320_v7, %v1320_v7  ;;  %v1283_v25 = vmul.f32 1.050701, %v1210_v24  ;;  %1649 = vst.msk [vmem:[%s3620_s3 + $0x7c] sm:$0xf] %vm1617_vm4, %v1950_v28  ;;  %v1806_v54 = vadd.f32 -1.0, %v2362_v56  ;;  %v2364_v23 = vpop.eup %2363  ;;  %vm773_vm11 = vcmp.gt.f32.partialorder %v3478_v31, 0.0 }
 0x191   :  { %v1175_v11 = vmul.f32 1.6732632, %v1843_v47  ;;  %2369 = vpow2.f32 %v956_v46  ;;  %v958_v22 = vmul.f32 1.442695, %v849_v10  ;;  %v1844_v34 = vadd.f32 -1.0, %v2364_v23 }
 0x192   :  { %1687 = vst.msk [vmem:[%s3620_s3 + $0x114] sm:$0xf] %vm1617_vm4, %v1988_v3  ;;  %v1951_v44 = vpack.c.bf16 %v1283_v25, %v1283_v25  ;;  %v1138_v39 = vmul.f32 1.6732632, %v1806_v54  ;;  %v960_v19 = vmul.f32 1.442695, %v850_v27 }
 0x193   :  { %v1248_v16 = vsel %vm810_vm10, %v3473_v12, %v1175_v11  ;;  %v2366_v32 = vpop.eup %2365  ;;  %2371 = vpow2.f32 %v958_v22  ;;  %v1176_v20 = vmul.f32 1.6732632, %v1844_v34  ;;  %vm811_vm12 = vcmp.gt.f32.partialorder %v3482_v9, 0.0 }
 0x194   :  { %1650 = vst.msk [vmem:[%s3620_s3 + $0x80] sm:$0xf] %vm1617_vm4, %v1951_v44  ;;  %v1321_v45 = vmul.f32 1.050701, %v1248_v16  ;;  %v1211_v5 = vsel %vm773_vm11, %v3478_v31, %v1138_v39  ;;  %v1807_v33 = vadd.f32 -1.0, %v2366_v32  ;;  %2373 = vpow2.f32 %v960_v19 }
 0x195   :  { %v1284_v35 = vmul.f32 1.050701, %v1211_v5  ;;  %v1249_v12 = vsel %vm811_vm12, %v3482_v9, %v1176_v20  ;;  %vm774_vm13 = vcmp.gt.f32.partialorder %v3505_v8, 0.0  ;;  %vm812_vm14 = vcmp.gt.f32.partialorder %v3509_v36, 0.0 }
 0x196   :  { %v1989_v21 = vpack.c.bf16 %v1321_v45, %v1321_v45  ;;  %v2368_v61 = vpop.eup %2367  ;;  %v1139_v17 = vmul.f32 1.6732632, %v1807_v33  ;;  %v1322_v42 = vmul.f32 1.050701, %v1249_v12  ;;  %vm1690_vm15 = vcmask 57344  }
 0x197   :  { %v1952_v49 = vpack.c.bf16 %v1284_v35, %v1284_v35  ;;  %v1845_v31 = vadd.f32 -1.0, %v2368_v61  ;;  %vm775_vm0 = vcmp.gt.f32.partialorder %v3538_v38, 0.0  ;;  %vm776_vm1 = vcmp.gt.f32.partialorder %v3550_v15, 0.0 }
 0x198   :  { %1688 = vst.msk [vmem:[%s3620_s3 + $0x118] sm:$0xf] %vm1617_vm4, %v1989_v21  ;;  %v1212_v50 = vsel %vm774_vm13, %v3505_v8, %v1139_v17  ;;  %v1990_v62 = vpack.c.bf16 %v1322_v42, %v1322_v42  ;;  %vm777_vm2 = vcmp.gt.f32.partialorder %v3554_v4, 0.0 }
 0x199   :  { %1651 = vst.msk [vmem:[%s3620_s3 + $0x84] sm:$0xf] %vm1617_vm4, %v1952_v49  ;;  %v1285_v40 = vmul.f32 1.050701, %v1212_v50  ;;  %v1177_v9 = vmul.f32 1.6732632, %v1845_v31 }
 0x19a   :  { %1689 = vst.msk [vmem:[%s3620_s3 + $0x11c] sm:$0xf] %vm1617_vm4, %v1990_v62 }
 0x19b   :  { %v2370_v63 = vpop.eup %2369  ;;  %v1953_v57 = vpack.c.bf16 %v1285_v40, %v1285_v40  ;;  %v1250_v14 = vsel %vm812_vm14, %v3509_v36, %v1177_v9 }
 0x19c   :  { %v1808_v13 = vadd.f32 -1.0, %v2370_v63  ;;  %v1323_v43 = vmul.f32 1.050701, %v1250_v14 }
 0x19d   :  { %v2372_v51 = vpop.eup %2371  ;;  %1652 = vst.msk [vmem:[%s3620_s3 + $0x88] sm:$0xf] %vm1617_vm4, %v1953_v57 }
 0x19e   :  { %v1140_v8 = vmul.f32 1.6732632, %v1808_v13  ;;  %v2374_v52 = vpop.eup %2373  ;;  %v1991_v58 = vpack.c.bf16 %v1323_v43, %v1323_v43  ;;  %v1809_v41 = vadd.f32 -1.0, %v2372_v51 }
 0x19f   :  { %v1810_v2 = vadd.f32 -1.0, %v2374_v52 }
 0x1a0   :  { %v1213_v59 = vsel %vm775_vm0, %v3538_v38, %v1140_v8  ;;  %1691 = vst.msk [vmem:[%s3620_s3 + $0x120] sm:$0x1] %vm1690_vm15, %v1991_v58  ;;  %v1141_v6 = vmul.f32 1.6732632, %v1809_v41 }
 0x1a1   :  { %v1286_v36 = vmul.f32 1.050701, %v1213_v59  ;;  %v1142_v48 = vmul.f32 1.6732632, %v1810_v2 }
 0x1a2   :  { %v1214_v0 = vsel %vm776_vm1, %v3550_v15, %v1141_v6 }
 0x1a3   :  { %v1954_v60 = vpack.c.bf16 %v1286_v36, %v1286_v36  ;;  %v1287_v26 = vmul.f32 1.050701, %v1214_v0  ;;  %v1215_v37 = vsel %vm777_vm2, %v3554_v4, %v1142_v48 }
 0x1a4   :  { %v1288_v38 = vmul.f32 1.050701, %v1215_v37 }
 0x1a5   :  { %1653 = vst.msk [vmem:[%s3620_s3 + $0x8c] sm:$0xf] %vm1617_vm4, %v1954_v60  ;;  %v1955_v53 = vpack.c.bf16 %v1287_v26, %v1287_v26 }
 0x1a6   :  { %v1956_v1 = vpack.c.bf16 %v1288_v38, %v1288_v38 }
 0x1a7   :  { %1654 = vst.msk [vmem:[%s3620_s3 + $0x90] sm:$0xf] %vm1617_vm4, %v1955_v53 }
 0x1a8   :  { %1655 = vst.msk [vmem:[%s3620_s3 + $0x94] sm:$0xf] %vm1617_vm4, %v1956_v1 }

// kernel: autoencoder_forward.6
= control target key start
LH: loop header
LB: loop body
LE: loop exit
PB: predicated region body
PF: predicated region fallthrough
CT: control target
= control target key end

     0   :  { %vm76_vm0 = vcmask 588800   ;;  %vm89_vm1 = vcmask 1043456   ;;  %vm583_vm5 = vcmask 125952   ;;  %vm590_vm9 = vcmask 122880   ;;  %s962_s1 = inlined_call_operand.vmem [shape: bf16[72,16], index: 1, kind: input, shape index: {}]   ;;  %s963_s0 = inlined_call_operand.vmem [shape: bf16[4,50,72], index: 0, kind: input, shape index: {}]   ;;  %s964_s2 = inlined_call_operand.vmem [shape: f32[1,16], index: 2, kind: input, shape index: {}]   ;;  %s965_s3 = inlined_call_operand.vmem [shape: bf16[50,16], index: 3, kind: output, shape index: {}]  }
   0x1   :  { %v788_v0 = vld [vmem:[%s962_s1] sm:$0xff]   ;;  %v789_v1 = vld [vmem:[%s962_s1 + $0x8] sm:$0xff]   ;;  %v790_v2 = vld [vmem:[%s962_s1 + $0x10] sm:$0xff]  }
   0x2   :  { %712 = vmatprep.subr.bf16.mxu0 %v788_v0  ;;  %730 = vmatprep.subr.bf16.mxu1 %v788_v0  ;;  %v793_v3 = vld [vmem:[%s963_s0] sm:$0xff]   ;;  %v791_v5 = vld [vmem:[%s962_s1 + $0x18] sm:$0xff]   ;;  %v795_v8 = vld [vmem:[%s963_s0 + $0x8] sm:$0xff]  }
   0x3   :  { %713 = vmatpush3.bf16.msra.mxu0 %v788_v0  ;;  %731 = vmatpush3.bf16.msra.mxu1 %v788_v0  ;;  %v794_v4 = vld [vmem:[%s963_s0 + $0x1c] sm:$0xff]   ;;  %v796_v9 = vld [vmem:[%s963_s0 + $0x24] sm:$0xff]   ;;  %v797_v10 = vld [vmem:[%s963_s0 + $0x10] sm:$0xff]  }
   0x4   :  { %714 = vmatprep.subr.bf16.mxu0 %v789_v1  ;;  %732 = vmatprep.subr.bf16.mxu1 %v789_v1  ;;  %v792_v6 = vld [vmem:[%s962_s1 + $0x20] ss:$0 sps:$4 sm:$0xff]   ;;  %v798_v11 = vld [vmem:[%s963_s0 + $0x2c] sm:$0xff]   ;;  %v799_v12 = vld [vmem:[%s963_s0 + $0x18] ss:$0 sps:$4 sm:$0x11]  }
   0x5   :  { %722 = vmatprep.mubr.msk.bf16.mxu0 %vm76_vm0, %v793_v3  ;;  %740 = vmatprep.mubr.msk.bf16.mxu1 %vm76_vm0, %v794_v4  ;;  %v91_v7 = vsel %vm89_vm1, %v792_v6, 0  ;;  %v800_v13 = vld [vmem:[%s963_s0 + $0x34] ss:$0 sps:$4 sm:$0x11]   ;;  %v801_v14 = vld [vmem:[%s963_s0 + $0x38] sm:$0xff]   ;;  %v803_v16 = vld [vmem:[%s963_s0 + $0x40] sm:$0xff]  }
   0x6   :  { %v802_v15 = vld [vmem:[%s963_s0 + $0x54] sm:$0xff]   ;;  %v804_v17 = vld [vmem:[%s963_s0 + $0x5c] sm:$0xff]   ;;  %v805_v18 = vld [vmem:[%s963_s0 + $0x48] sm:$0xff]  }
   0x7   :  { %715 = vmatpush3.bf16.msra.mxu0 %v789_v1  ;;  %733 = vmatpush3.bf16.msra.mxu1 %v789_v1  ;;  %v806_v19 = vld [vmem:[%s963_s0 + $0x64] sm:$0xff]   ;;  %v807_v20 = vld [vmem:[%s963_s0 + $0x50] ss:$0 sps:$4 sm:$0x11]   ;;  %v654_v50 = vld [vmem:[%s964_s2] ss:$0 sm:$0xff] }
   0x8   :  { %716 = vmatprep.subr.bf16.mxu0 %v790_v2  ;;  %734 = vmatprep.subr.bf16.mxu1 %v790_v2  ;;  %v808_v21 = vld [vmem:[%s963_s0 + $0x6c] ss:$0 sps:$4 sm:$0x11]  }
   0xb   :  { %717 = vmatpush3.bf16.msra.mxu0 %v790_v2  ;;  %735 = vmatpush3.bf16.msra.mxu1 %v790_v2 }
   0xc   :  { %718 = vmatprep.subr.bf16.mxu0 %v791_v5  ;;  %736 = vmatprep.subr.bf16.mxu1 %v791_v5 }
   0xf   :  { %719 = vmatpush3.bf16.msra.mxu0 %v791_v5  ;;  %737 = vmatpush3.bf16.msra.mxu1 %v791_v5 }
  0x10   :  { %784 = vmatprep.subr.msk.bf16.mxu0 %vm89_vm1, %v792_v6  ;;  %785 = vmatprep.subr.msk.bf16.mxu1 %vm89_vm1, %v792_v6 }
  0x13   :  { %721 = vmatpush3.bf16.msra.mxu0 %v91_v7  ;;  %739 = vmatpush3.bf16.msra.mxu1 %v91_v7 }
  0x14   :  { %748 = vmatprep.subr.bf16.mxu0 %v788_v0  ;;  %766 = vmatprep.subr.bf16.mxu1 %v788_v0 }
  0x16   :  { %723 = vmatmul.mubr.msk.bf16.vlgmr.msra.gmra.mrb[0].mxu0 %vm76_vm0, %v795_v8  ;;  %741 = vmatmul.mubr.msk.bf16.vlgmr.msra.gmra.mrb[0].mxu1 %vm76_vm0, %v796_v9 }
  0x17   :  { %749 = vmatpush3.bf16.msra.mxu0 %v788_v0  ;;  %767 = vmatpush3.bf16.msra.mxu1 %v788_v0 }
  0x18   :  { %750 = vmatprep.subr.bf16.mxu0 %v789_v1  ;;  %768 = vmatprep.subr.bf16.mxu1 %v789_v1 }
  0x19   :  { %726 = vmatprep.mubr.msk.bf16.mxu0 %vm76_vm0, %v797_v10  ;;  %744 = vmatprep.mubr.msk.bf16.mxu1 %vm76_vm0, %v798_v11 }
  0x1b   :  { %751 = vmatpush3.bf16.msra.mxu0 %v789_v1  ;;  %769 = vmatpush3.bf16.msra.mxu1 %v789_v1 }
  0x1c   :  { %752 = vmatprep.subr.bf16.mxu0 %v790_v2  ;;  %770 = vmatprep.subr.bf16.mxu1 %v790_v2 }
  0x1e   :  { %727 = vmatmul.mubr.msk.bf16.gmra.mrb[4].mxu0 %vm76_vm0, %v799_v12  ;;  %745 = vmatmul.mubr.msk.bf16.gmra.mrb[4].mxu1 %vm76_vm0, %v800_v13 }
  0x1f   :  { %753 = vmatpush3.bf16.msra.mxu0 %v790_v2  ;;  %771 = vmatpush3.bf16.msra.mxu1 %v790_v2 }
  0x20   :  { %754 = vmatprep.subr.bf16.mxu0 %v791_v5  ;;  %772 = vmatprep.subr.bf16.mxu1 %v791_v5 }
  0x21   :  { %758 = vmatprep.mubr.msk.bf16.mxu0 %vm76_vm0, %v801_v14  ;;  %776 = vmatprep.mubr.msk.bf16.mxu1 %vm76_vm0, %v802_v15 }
  0x23   :  { %755 = vmatpush3.bf16.msra.mxu0 %v791_v5  ;;  %773 = vmatpush3.bf16.msra.mxu1 %v791_v5 }
  0x24   :  { %786 = vmatprep.subr.msk.bf16.mxu0 %vm89_vm1, %v792_v6  ;;  %787 = vmatprep.subr.msk.bf16.mxu1 %vm89_vm1, %v792_v6 }
  0x27   :  { %757 = vmatpush3.bf16.msra.mxu0 %v91_v7  ;;  %775 = vmatpush3.bf16.msra.mxu1 %v91_v7 }
  0x2a   :  { %759 = vmatmul.mubr.msk.bf16.vlgmr.msra.gmra.mrb[8].mxu0 %vm76_vm0, %v803_v16  ;;  %777 = vmatmul.mubr.msk.bf16.vlgmr.msra.gmra.mrb[8].mxu1 %vm76_vm0, %v804_v17 }
  0x2b   :  { %762 = vmatprep.mubr.msk.bf16.mxu0 %vm76_vm0, %v805_v18  ;;  %780 = vmatprep.mubr.msk.bf16.mxu1 %vm76_vm0, %v806_v19 }
  0x32   :  { %763 = vmatmul.mubr.msk.bf16.gmra.mrb[12].mxu0 %vm76_vm0, %v807_v20  ;;  %781 = vmatmul.mubr.msk.bf16.gmra.mrb[12].mxu1 %vm76_vm0, %v808_v21 }
  0xe9   :  { %v724_v22 = vpop.f32.mrb[0].mxu0  ;;  %v742_v23 = vpop.f32.mrb[0].mxu1 }
  0xea   :  { %v261_v24 = vmax.f32 %v724_v22, %v742_v23  ;;  %v127_v25 = vpop.f32.mrb[1].mxu0  ;;  %v229_v26 = vpop.f32.mrb[1].mxu1 }
  0xeb   :  { %v259_v27 = vmax.f32 %v127_v25, %v229_v26  ;;  %v725_v28 = vpop.f32.mrb[2].mxu0  ;;  %v743_v29 = vpop.f32.mrb[2].mxu1 }
  0xec   :  { %v262_v30 = vmax.f32 %v725_v28, %v743_v29  ;;  %v130_v31 = vpop.f32.mrb[3].mxu0  ;;  %v232_v32 = vpop.f32.mrb[3].mxu1 }
  0xed   :  { %v260_v33 = vmax.f32 %v130_v31, %v232_v32 }
  0xf1   :  { %v728_v34 = vpop.f32.mrb[4].mxu0  ;;  %v746_v35 = vpop.f32.mrb[4].mxu1 }
  0xf2   :  { %v265_v36 = vmax.f32 %v728_v34, %v746_v35  ;;  %v143_v37 = vpop.f32.mrb[5].mxu0  ;;  %v245_v38 = vpop.f32.mrb[5].mxu1 }
  0xf3   :  { %v263_v39 = vmax.f32 %v143_v37, %v245_v38  ;;  %v729_v40 = vpop.f32.mrb[6].mxu0  ;;  %v747_v41 = vpop.f32.mrb[6].mxu1 }
  0xf4   :  { %v146_v42 = vpop.f32.mrb[7].mxu0  ;;  %v248_v43 = vpop.f32.mrb[7].mxu1 }
  0xf5   :  { %v264_v44 = vmax.f32 %v146_v42, %v248_v43 }
  0xfd   :  { %v760_v45 = vpop.f32.mrb[8].mxu0  ;;  %v778_v46 = vpop.f32.mrb[8].mxu1 }
  0xfe   :  { %v370_v47 = vmax.f32 %v261_v24, %v760_v45  ;;  %v338_v48 = vpop.f32.mrb[9].mxu0  ;;  %v447_v49 = vpop.f32.mrb[9].mxu1 }
  0xff   :  { %v368_v51 = vmax.f32 %v259_v27, %v338_v48  ;;  %v761_v52 = vpop.f32.mrb[10].mxu0  ;;  %v779_v53 = vpop.f32.mrb[10].mxu1 }
 0x100   :  { %v479_v54 = vmax.f32 %v370_v47, %v778_v46  ;;  %v371_v55 = vmax.f32 %v262_v30, %v761_v52  ;;  %v341_v56 = vpop.f32.mrb[11].mxu0  ;;  %v450_v57 = vpop.f32.mrb[11].mxu1 }
 0x101   :  { %v477_v58 = vmax.f32 %v368_v51, %v447_v49  ;;  %v369_v59 = vmax.f32 %v260_v33, %v341_v56 }
 0x102   :  { %v493_v60 = vadd.f32 %v654_v50, %v479_v54  ;;  %v480_v61 = vmax.f32 %v371_v55, %v779_v53 }
 0x103   :  { %v491_v62 = vadd.f32 %v654_v50, %v477_v58  ;;  %v478_v63 = vmax.f32 %v369_v59, %v450_v57 }
 0x104   :  { %v507_v0 = vmin.f32 %v493_v60, 0.0  ;;  %v494_v1 = vadd.f32 %v654_v50, %v480_v61  ;;  %vm500_vm2 = vcmp.gt.f32.partialorder %v493_v60, 0.0 }
 0x105   :  { %v505_v2 = vmin.f32 %v491_v62, 0.0  ;;  %v930_v3 = vadd.f32 %v654_v50, %v478_v63  ;;  %v764_v4 = vpop.f32.mrb[12].mxu0  ;;  %v782_v5 = vpop.f32.mrb[12].mxu1  ;;  %vm498_vm3 = vcmp.gt.f32.partialorder %v491_v62, 0.0 }
 0x106   :  { %v516_v6 = vmul.f32 1.442695, %v507_v0  ;;  %v508_v7 = vmin.f32 %v494_v1, 0.0  ;;  %v374_v8 = vmax.f32 %v265_v36, %v764_v4  ;;  %v354_v9 = vpop.f32.mrb[13].mxu0  ;;  %v463_v10 = vpop.f32.mrb[13].mxu1  ;;  %vm501_vm4 = vcmp.gt.f32.partialorder %v494_v1, 0.0 }
 0x107   :  { %v512_v11 = vmul.f32 1.442695, %v505_v2  ;;  %v506_v12 = vmin.f32 %v930_v3, 0.0  ;;  %v372_v13 = vmax.f32 %v263_v39, %v354_v9  ;;  %v765_v14 = vpop.f32.mrb[14].mxu0  ;;  %v783_v15 = vpop.f32.mrb[14].mxu1  ;;  %vm499_vm6 = vcmp.gt.f32.partialorder %v930_v3, 0.0 }
 0x108   :  { %809 = vpow2.f32 %v516_v6  ;;  %v518_v16 = vmul.f32 1.442695, %v508_v7  ;;  %v483_v17 = vmax.f32 %v374_v8, %v782_v5  ;;  %v357_v18 = vpop.f32.mrb[15].mxu0  ;;  %v466_v19 = vpop.f32.mrb[15].mxu1 }
 0x109   :  { %811 = vpow2.f32 %v512_v11  ;;  %v514_v20 = vmul.f32 1.442695, %v506_v12  ;;  %v481_v21 = vmax.f32 %v372_v13, %v463_v10  ;;  %v373_v22 = vmax.f32 %v264_v44, %v357_v18 }
 0x10a   :  { %813 = vpow2.f32 %v518_v16  ;;  %v497_v23 = vadd.f32 %v654_v50, %v483_v17 }
 0x10b   :  { %815 = vpow2.f32 %v514_v20  ;;  %v495_v24 = vadd.f32 %v654_v50, %v481_v21  ;;  %v482_v25 = vmax.f32 %v373_v22, %v466_v19 }
 0x10c   :  { %v511_v26 = vmin.f32 %v497_v23, 0.0  ;;  %vm504_vm7 = vcmp.gt.f32.partialorder %v497_v23, 0.0 }
 0x10d   :  { %v509_v27 = vmin.f32 %v495_v24, 0.0  ;;  %v496_v28 = vadd.f32 %v654_v50, %v482_v25  ;;  %vm502_vm8 = vcmp.gt.f32.partialorder %v495_v24, 0.0 }
 0x10e   :  { %v524_v29 = vmul.f32 1.442695, %v511_v26 }
 0x10f   :  { %v520_v30 = vmul.f32 1.442695, %v509_v27  ;;  %v510_v31 = vmin.f32 %v496_v28, 0.0  ;;  %vm503_vm10 = vcmp.gt.f32.partialorder %v496_v28, 0.0 }
 0x110   :  { %817 = vpow2.f32 %v524_v29 }
 0x111   :  { %819 = vpow2.f32 %v520_v30  ;;  %v522_v32 = vmul.f32 1.442695, %v510_v31 }
 0x112   :  { %v810_v33 = vpop.eup %809 }
 0x113   :  { %v812_v34 = vpop.eup %811  ;;  %v657_v35 = vadd.f32 -1.0, %v810_v33  ;;  %821 = vpow2.f32 %v522_v32 }
 0x114   :  { %v814_v36 = vpop.eup %813  ;;  %v655_v37 = vadd.f32 -1.0, %v812_v34 }
 0x115   :  { %v816_v38 = vpop.eup %815  ;;  %v535_v39 = vmul.f32 1.6732632, %v657_v35  ;;  %v658_v40 = vadd.f32 -1.0, %v814_v36 }
 0x116   :  { %v533_v41 = vmul.f32 1.6732632, %v655_v37  ;;  %v656_v42 = vadd.f32 -1.0, %v816_v38 }
 0x117   :  { %v542_v43 = vsel %vm500_vm2, %v493_v60, %v535_v39  ;;  %v536_v44 = vmul.f32 1.6732632, %v658_v40 }
 0x118   :  { %v549_v45 = vmul.f32 1.050701, %v542_v43  ;;  %v540_v46 = vsel %vm498_vm3, %v491_v62, %v533_v41  ;;  %v534_v47 = vmul.f32 1.6732632, %v656_v42 }
 0x119   :  { %v547_v48 = vmul.f32 1.050701, %v540_v46  ;;  %v543_v49 = vsel %vm501_vm4, %v494_v1, %v536_v44 }
 0x11a   :  { %v818_v50 = vpop.eup %817  ;;  %v671_v51 = vpack.c.bf16 %v549_v45, %v549_v45  ;;  %v550_v52 = vmul.f32 1.050701, %v543_v49  ;;  %v541_v53 = vsel %vm499_vm6, %v930_v3, %v534_v47 }
 0x11b   :  { %v820_v54 = vpop.eup %819  ;;  %v669_v55 = vpack.c.bf16 %v547_v48, %v547_v48  ;;  %v548_v56 = vmul.f32 1.050701, %v541_v53  ;;  %v661_v57 = vadd.f32 -1.0, %v818_v50 }
 0x11c   :  { %586 = vst.msk [vmem:[%s965_s3 + $0x8] sm:$0xf] %vm583_vm5, %v671_v51  ;;  %v672_v58 = vpack.c.bf16 %v550_v52, %v550_v52  ;;  %v659_v59 = vadd.f32 -1.0, %v820_v54 }
 0x11d   :  { %v822_v60 = vpop.eup %821  ;;  %584 = vst.msk [vmem:[%s965_s3] sm:$0xf] %vm583_vm5, %v669_v55  ;;  %v670_v61 = vpack.c.bf16 %v548_v56, %v548_v56  ;;  %v539_v62 = vmul.f32 1.6732632, %v661_v57 }
 0x11e   :  { %587 = vst.msk [vmem:[%s965_s3 + $0xc] sm:$0xf] %vm583_vm5, %v672_v58  ;;  %v537_v63 = vmul.f32 1.6732632, %v659_v59  ;;  %v660_v0 = vadd.f32 -1.0, %v822_v60 }
 0x11f   :  { %585 = vst.msk [vmem:[%s965_s3 + $0x4] sm:$0xf] %vm583_vm5, %v670_v61  ;;  %v546_v1 = vsel %vm504_vm7, %v497_v23, %v539_v62 }
 0x120   :  { %v553_v2 = vmul.f32 1.050701, %v546_v1  ;;  %v544_v3 = vsel %vm502_vm8, %v495_v24, %v537_v63  ;;  %v538_v4 = vmul.f32 1.6732632, %v660_v0 }
 0x121   :  { %v551_v5 = vmul.f32 1.050701, %v544_v3 }
 0x122   :  { %v675_v6 = vpack.c.bf16 %v553_v2, %v553_v2  ;;  %v545_v7 = vsel %vm503_vm10, %v496_v28, %v538_v4 }
 0x123   :  { %v673_v8 = vpack.c.bf16 %v551_v5, %v551_v5  ;;  %v552_v9 = vmul.f32 1.050701, %v545_v7 }
 0x124   :  { %591 = vst.msk [vmem:[%s965_s3 + $0x18] sm:$0x1] %vm590_vm9, %v675_v6 }
 0x125   :  { %588 = vst.msk [vmem:[%s965_s3 + $0x10] sm:$0xf] %vm583_vm5, %v673_v8  ;;  %v674_v10 = vpack.c.bf16 %v552_v9, %v552_v9 }
 0x127   :  { %589 = vst.msk [vmem:[%s965_s3 + $0x14] sm:$0xf] %vm583_vm5, %v674_v10 }

// kernel: autoencoder_forward.7
= control target key start
LH: loop header
LB: loop body
LE: loop exit
PB: predicated region body
PF: predicated region fallthrough
CT: control target
= control target key end

     0   :  { %v299_v0 = vmov 0   ;;  %vm116_vm0 = vcmask 130048   ;;  %vm220_vm3 = vcmask 257024   ;;  %s378_s1 = inlined_call_operand.vmem [shape: bf16[144,32], index: 1, kind: input, shape index: {}]   ;;  %s379_s0 = inlined_call_operand.vmem [shape: bf16[32,144], index: 0, kind: input, shape index: {}]   ;;  %s380_s2 = inlined_call_operand.vmem [shape: f32[1,32], index: 2, kind: input, shape index: {}]   ;;  %s381_s3 = inlined_call_operand.vmem [shape: bf16[32,32], index: 3, kind: output, shape index: {}]  }
   0x1   :  { %123 = vmatprep.subr.bf16.mxu0 %v299_v0  ;;  %257 = vmatprep.subr.bf16.mxu1 %v299_v0  ;;  %v276_v1 = vld [vmem:[%s378_s1] sm:$0xff]   ;;  %v277_v2 = vld [vmem:[%s378_s1 + $0x8] sm:$0xff]   ;;  %v278_v3 = vld [vmem:[%s378_s1 + $0x10] sm:$0xff]  }
   0x2   :  { %124 = vmatpush1.bf16.msra.mxu0 %v276_v1  ;;  %266 = vmatpush1.bf16.msra.mxu1 %v276_v1  ;;  %v279_v4 = vld [vmem:[%s378_s1 + $0x18] sm:$0xff]   ;;  %v287_v5 = vld [vmem:[%s379_s0 + $0x4] ss:$8 sps:$4 sm:$0xff]   ;;  %v282_v9 = vld [vmem:[%s378_s1 + $0x30] sm:$0xff]  }
   0x3   :  { %125 = vmatprep.subr.bf16.mxu0 %v299_v0  ;;  %258 = vmatprep.subr.bf16.mxu1 %v299_v0  ;;  %v290_v6 = vld [vmem:[%s379_s0 + $0x14] ss:$8 sps:$4 sm:$0xff]   ;;  %v280_v7 = vld [vmem:[%s378_s1 + $0x20] sm:$0xff]   ;;  %v281_v8 = vld [vmem:[%s378_s1 + $0x28] sm:$0xff]  }
   0x4   :  { %243 = vmatprep.mubr.msk.bf16.mxu0 %vm116_vm0, %v287_v5  ;;  %244 = vmatprep.mubr.msk.bf16.mxu1 %vm116_vm0, %v290_v6  ;;  %v283_v10 = vld [vmem:[%s378_s1 + $0x38] sm:$0xff]   ;;  %v284_v11 = vld [vmem:[%s378_s1 + $0x40] sm:$0xff]  }
   0x5   :  { %v285_v12 = vld [vmem:[%s379_s0] ss:$8 sps:$4 sm:$0xff]   ;;  %v288_v13 = vld [vmem:[%s379_s0 + $0x10] ss:$8 sps:$4 sm:$0xff]  }
   0x6   :  { %126 = vmatpush1.bf16.msra.mxu0 %v277_v2  ;;  %267 = vmatpush1.bf16.msra.mxu1 %v277_v2  ;;  %v229_v14 = vld [vmem:[%s380_s2] ss:$0 sm:$0xff] }
   0x7   :  { %127 = vmatprep.subr.bf16.mxu0 %v299_v0  ;;  %259 = vmatprep.subr.bf16.mxu1 %v299_v0 }
   0xa   :  { %128 = vmatpush1.bf16.msra.mxu0 %v278_v3  ;;  %268 = vmatpush1.bf16.msra.mxu1 %v278_v3 }
   0xb   :  { %129 = vmatprep.subr.bf16.mxu0 %v299_v0  ;;  %260 = vmatprep.subr.bf16.mxu1 %v299_v0 }
   0xe   :  { %130 = vmatpush1.bf16.msra.mxu0 %v279_v4  ;;  %269 = vmatpush1.bf16.msra.mxu1 %v279_v4 }
   0xf   :  { %131 = vmatprep.subr.bf16.mxu0 %v299_v0  ;;  %261 = vmatprep.subr.bf16.mxu1 %v299_v0 }
  0x12   :  { %132 = vmatpush1.bf16.msra.mxu0 %v280_v7  ;;  %270 = vmatpush1.bf16.msra.mxu1 %v280_v7 }
  0x13   :  { %133 = vmatprep.subr.bf16.mxu0 %v299_v0  ;;  %262 = vmatprep.subr.bf16.mxu1 %v299_v0 }
  0x16   :  { %134 = vmatpush1.bf16.msra.mxu0 %v281_v8  ;;  %271 = vmatpush1.bf16.msra.mxu1 %v281_v8 }
  0x17   :  { %135 = vmatprep.subr.bf16.mxu0 %v299_v0  ;;  %263 = vmatprep.subr.bf16.mxu1 %v299_v0 }
  0x1a   :  { %136 = vmatpush1.bf16.msra.mxu0 %v282_v9  ;;  %272 = vmatpush1.bf16.msra.mxu1 %v282_v9 }
  0x1b   :  { %137 = vmatprep.subr.bf16.mxu0 %v299_v0  ;;  %264 = vmatprep.subr.bf16.mxu1 %v299_v0 }
  0x1e   :  { %138 = vmatpush1.bf16.msra.mxu0 %v283_v10  ;;  %273 = vmatpush1.bf16.msra.mxu1 %v283_v10 }
  0x1f   :  { %139 = vmatprep.subr.bf16.mxu0 %v299_v0  ;;  %265 = vmatprep.subr.bf16.mxu1 %v299_v0 }
  0x22   :  { %140 = vmatpush1.bf16.msra.mxu0 %v284_v11  ;;  %274 = vmatpush1.bf16.msra.mxu1 %v284_v11 }
  0x25   :  { %156 = vmatmul.mubr.bf16.vlgmr.msra.gmra.mrb[0].mxu0 %v285_v12  ;;  %164 = vmatmul.mubr.bf16.vlgmr.msra.gmra.mrb[0].mxu1 %v288_v13 }
  0xf8   :  { %v157_v15 = vpop.f32.mrb[0].mxu0  ;;  %v165_v16 = vpop.f32.mrb[0].mxu1 }
  0xf9   :  { %v158_v17 = vadd.f32 %v229_v14, %v157_v15  ;;  %v166_v18 = vadd.f32 %v229_v14, %v165_v16  ;;  %v159_v19 = vpop.f32.mrb[1].mxu0  ;;  %v167_v20 = vpop.f32.mrb[1].mxu1 }
  0xfa   :  { %v160_v21 = vpop.f32.mrb[2].mxu0  ;;  %v168_v22 = vpop.f32.mrb[2].mxu1 }
  0xfb   :  { %v176_v23 = vmin.f32 %v158_v17, 0.0  ;;  %v178_v24 = vmin.f32 %v166_v18, 0.0  ;;  %v162_v25 = vpop.f32.mrb[3].mxu0  ;;  %v170_v26 = vpop.f32.mrb[3].mxu1  ;;  %v161_v27 = vadd.f32 %v229_v14, %v160_v21  ;;  %v169_v28 = vadd.f32 %v229_v14, %v168_v22 }
  0xfc   :  { %vm172_vm1 = vcmp.gt.f32.partialorder %v158_v17, 0.0  ;;  %vm174_vm2 = vcmp.gt.f32.partialorder %v166_v18, 0.0 }
  0xfd   :  { %v180_v29 = vmul.f32 1.442695, %v176_v23  ;;  %v184_v30 = vmul.f32 1.442695, %v178_v24  ;;  %v177_v31 = vmin.f32 %v161_v27, 0.0  ;;  %v179_v32 = vmin.f32 %v169_v28, 0.0 }
  0xfe   :  { %vm173_vm4 = vcmp.gt.f32.partialorder %v161_v27, 0.0  ;;  %vm175_vm5 = vcmp.gt.f32.partialorder %v169_v28, 0.0 }
  0xff   :  { %291 = vpow2.f32 %v180_v29  ;;  %v182_v33 = vmul.f32 1.442695, %v177_v31  ;;  %v186_v34 = vmul.f32 1.442695, %v179_v32 }
 0x100   :  { %293 = vpow2.f32 %v184_v30 }
 0x101   :  { %295 = vpow2.f32 %v182_v33 }
 0x102   :  { %297 = vpow2.f32 %v186_v34 }
 0x109   :  { %v292_v35 = vpop.eup %291 }
 0x10a   :  { %v294_v36 = vpop.eup %293  ;;  %v245_v37 = vadd.f32 -1.0, %v292_v35 }
 0x10b   :  { %v247_v38 = vadd.f32 -1.0, %v294_v36  ;;  %v296_v39 = vpop.eup %295 }
 0x10c   :  { %v192_v40 = vmul.f32 1.6732632, %v245_v37  ;;  %v298_v41 = vpop.eup %297  ;;  %v246_v43 = vadd.f32 -1.0, %v296_v39 }
 0x10d   :  { %v194_v42 = vmul.f32 1.6732632, %v247_v38  ;;  %v248_v45 = vadd.f32 -1.0, %v298_v41 }
 0x10e   :  { %v196_v44 = vsel %vm172_vm1, %v158_v17, %v192_v40  ;;  %v193_v48 = vmul.f32 1.6732632, %v246_v43 }
 0x10f   :  { %v200_v46 = vmul.f32 1.050701, %v196_v44  ;;  %v198_v47 = vsel %vm174_vm2, %v166_v18, %v194_v42  ;;  %v195_v50 = vmul.f32 1.6732632, %v248_v45 }
 0x110   :  { %v202_v49 = vmul.f32 1.050701, %v198_v47  ;;  %v197_v52 = vsel %vm173_vm4, %v161_v27, %v193_v48 }
 0x111   :  { %v253_v51 = vpack.c.bf16 %v200_v46, %v200_v46  ;;  %v201_v54 = vmul.f32 1.050701, %v197_v52  ;;  %v199_v55 = vsel %vm175_vm5, %v169_v28, %v195_v50 }
 0x112   :  { %v255_v53 = vpack.c.bf16 %v202_v49, %v202_v49  ;;  %v203_v56 = vmul.f32 1.050701, %v199_v55 }
 0x113   :  { %221 = vst.msk [vmem:[%s381_s3] sm:$0xf] %vm220_vm3, %v253_v51  ;;  %v254_v57 = vpack.c.bf16 %v201_v54, %v201_v54 }
 0x114   :  { %223 = vst.msk [vmem:[%s381_s3 + $0x8] sm:$0xf] %vm220_vm3, %v255_v53  ;;  %v256_v58 = vpack.c.bf16 %v203_v56, %v203_v56 }
 0x115   :  { %222 = vst.msk [vmem:[%s381_s3 + $0x4] sm:$0xf] %vm220_vm3, %v254_v57 }
 0x116   :  { %224 = vst.msk [vmem:[%s381_s3 + $0xc] sm:$0xf] %vm220_vm3, %v256_v58 }

// kernel: autoencoder_forward.9
= control target key start
LH: loop header
LB: loop body
LE: loop exit
PB: predicated region body
PF: predicated region fallthrough
CT: control target
= control target key end

     0   :  { %vm64_vm0 = vcmask 261120   ;;  %vm193_vm5 = vcmask 523264   ;;  %v685_v63 = vmov 0   ;;  %s842_s1 = inlined_call_operand.vmem [shape: bf16[32,64], index: 1, kind: input, shape index: {}]   ;;  %s843_s0 = inlined_call_operand.vmem [shape: bf16[32,32], index: 0, kind: input, shape index: {}]   ;;  %s844_s3 = inlined_call_operand.vmem [shape: bf16[64,128], index: 3, kind: input, shape index: {}]   ;;  %s845_s5 = inlined_call_operand.vmem [shape: bf16[128,192], index: 5, kind: input, shape index: {}]   ;;  %s846_s2 = inlined_call_operand.vmem [shape: f32[1,64], index: 2, kind: input, shape index: {}]   ;;  %s847_s4 = inlined_call_operand.vmem [shape: f32[1,128], index: 4, kind: input, shape index: {}]   ;;  %s848_s6 = inlined_call_operand.vmem [shape: f32[1,192], index: 6, kind: input, shape index: {}]   ;;  %s849_s7 = inlined_call_operand.vmem [shape: f32[32,192], index: 7, kind: output, shape index: {}]  }
   0x1   :  { %v605_v0 = vld [vmem:[%s842_s1] sm:$0xff]   ;;  %v606_v1 = vld [vmem:[%s842_s1 + $0x8] sm:$0xff]   ;;  %v611_v6 = vld [vmem:[%s844_s3 + $0x10] sm:$0xff]   ;;  %423 = vmatprep.mubr.bf16.mxu0 %v685_v63 }
   0x2   :  { %584 = vmatprep.subr.bf16.mxu1 %v605_v0  ;;  %v607_v2 = vld [vmem:[%s843_s0] sm:$0xff]   ;;  %v608_v3 = vld [vmem:[%s843_s0 + $0x8] sm:$0xff]   ;;  %v612_v7 = vld [vmem:[%s844_s3 + $0x18] sm:$0xff]  }
   0x3   :  { %585 = vmatpush3.bf16.msra.mxu1 %v605_v0  ;;  %588 = vmatprep.mubr.msk.bf16.mxu1 %vm64_vm0, %v607_v2  ;;  %v609_v4 = vld [vmem:[%s844_s3] sm:$0xff]   ;;  %v610_v5 = vld [vmem:[%s844_s3 + $0x8] sm:$0xff]   ;;  %v616_v49 = vld [vmem:[%s845_s5 + $0x14] ss:$8 sps:$4 sm:$0xff]  }
   0x4   :  { %586 = vmatprep.subr.bf16.mxu1 %v606_v1  ;;  %v613_v8 = vld [vmem:[%s845_s5 + $0x4] ss:$8 sps:$4 sm:$0xff]   ;;  %v615_v9 = vld [vmem:[%s845_s5] ss:$8 sps:$4 sm:$0xff]   ;;  %v618_v50 = vld [vmem:[%s845_s5 + $0x10] ss:$8 sps:$4 sm:$0xff]  }
   0x5   :  { %391 = vmatprep.subr.bf16.mxu0 %v613_v8  ;;  %v528_v10 = vld [vmem:[%s846_s2] ss:$0 sm:$0xff]  ;;  %v619_v51 = vld [vmem:[%s845_s5 + $0x24] ss:$8 sps:$4 sm:$0xff]   ;;  %v622_v53 = vld [vmem:[%s845_s5 + $0x34] ss:$8 sps:$4 sm:$0xff]  }
   0x6   :  { %392 = vmatpush1.bf16.msra.mxu0 %v615_v9  ;;  %v621_v52 = vld [vmem:[%s845_s5 + $0x20] ss:$8 sps:$4 sm:$0xff]   ;;  %v624_v54 = vld [vmem:[%s845_s5 + $0x30] ss:$8 sps:$4 sm:$0xff]   ;;  %v625_v55 = vld [vmem:[%s845_s5 + $0x44] ss:$8 sps:$4 sm:$0xff]  }
   0x7   :  { %587 = vmatpush3.bf16.msra.mxu1 %v606_v1  ;;  %393 = vmatprep.subr.bf16.mxu0 %v616_v49  ;;  %v627_v56 = vld [vmem:[%s845_s5 + $0x40] ss:$8 sps:$4 sm:$0xff]   ;;  %v628_v57 = vld [vmem:[%s845_s5 + $0x54] ss:$8 sps:$4 sm:$0xff]   ;;  %v630_v58 = vld [vmem:[%s845_s5 + $0x50] ss:$8 sps:$4 sm:$0xff]  }
   0x8   :  { %592 = vmatprep.subr.bf16.mxu1 %v609_v4  ;;  %v631_v59 = vld [vmem:[%s845_s5 + $0x64] ss:$8 sps:$4 sm:$0xff]   ;;  %v633_v60 = vld [vmem:[%s845_s5 + $0x60] ss:$8 sps:$4 sm:$0xff]   ;;  %v634_v61 = vld [vmem:[%s845_s5 + $0x74] ss:$8 sps:$4 sm:$0xff]  }
   0x9   :  { %v636_v62 = vld [vmem:[%s845_s5 + $0x70] ss:$8 sps:$4 sm:$0xff]   ;;  %v539_v0 = vld [vmem:[%s847_s4] ss:$0 sm:$0xff] }
   0xa   :  { %589 = vmatmul.mubr.msk.bf16.vlgmr.msra.gmra.mrb[0].mxu1 %vm64_vm0, %v608_v3  ;;  %394 = vmatpush1.bf16.msra.mxu0 %v618_v50 }
   0xb   :  { %593 = vmatpush3.bf16.msra.mxu1 %v609_v4  ;;  %395 = vmatprep.subr.bf16.mxu0 %v619_v51 }
   0xc   :  { %594 = vmatprep.subr.bf16.mxu1 %v610_v5 }
   0xe   :  { %396 = vmatpush1.bf16.msra.mxu0 %v621_v52 }
   0xf   :  { %595 = vmatpush3.bf16.msra.mxu1 %v610_v5  ;;  %397 = vmatprep.subr.bf16.mxu0 %v622_v53 }
  0x10   :  { %596 = vmatprep.subr.bf16.mxu1 %v611_v6 }
  0x12   :  { %398 = vmatpush1.bf16.msra.mxu0 %v624_v54 }
  0x13   :  { %597 = vmatpush3.bf16.msra.mxu1 %v611_v6  ;;  %399 = vmatprep.subr.bf16.mxu0 %v625_v55 }
  0x14   :  { %598 = vmatprep.subr.bf16.mxu1 %v612_v7 }
  0x16   :  { %400 = vmatpush1.bf16.msra.mxu0 %v627_v56 }
  0x17   :  { %599 = vmatpush3.bf16.msra.mxu1 %v612_v7  ;;  %401 = vmatprep.subr.bf16.mxu0 %v628_v57 }
  0x1a   :  { %402 = vmatpush1.bf16.msra.mxu0 %v630_v58 }
  0x1b   :  { %403 = vmatprep.subr.bf16.mxu0 %v631_v59 }
  0x1e   :  { %404 = vmatpush1.bf16.msra.mxu0 %v633_v60 }
  0x1f   :  { %405 = vmatprep.subr.bf16.mxu0 %v634_v61 }
  0x22   :  { %406 = vmatpush1.bf16.msra.mxu0 %v636_v62 }
  0xdd   :  { %v590_v11 = vpop.f32.mrb[0].mxu1 }
  0xde   :  { %v114_v12 = vadd.f32 %v590_v11, %v528_v10  ;;  %v105_v13 = vpop.f32.mrb[1].mxu1 }
  0xdf   :  { %v106_v14 = vadd.f32 %v528_v10, %v105_v13  ;;  %v591_v15 = vpop.f32.mrb[2].mxu1 }
  0xe0   :  { %v126_v16 = vmin.f32 %v114_v12, 0.0  ;;  %v117_v17 = vadd.f32 %v591_v15, %v528_v10  ;;  %v108_v18 = vpop.f32.mrb[3].mxu1  ;;  %vm122_vm1 = vcmp.gt.f32.partialorder %v114_v12, 0.0 }
  0xe1   :  { %v124_v19 = vmin.f32 %v106_v14, 0.0  ;;  %v109_v20 = vadd.f32 %v528_v10, %v108_v18  ;;  %vm120_vm2 = vcmp.gt.f32.partialorder %v106_v14, 0.0 }
  0xe2   :  { %v132_v21 = vmul.f32 1.442695, %v126_v16  ;;  %v127_v22 = vmin.f32 %v117_v17, 0.0  ;;  %vm123_vm3 = vcmp.gt.f32.partialorder %v117_v17, 0.0 }
  0xe3   :  { %v128_v23 = vmul.f32 1.442695, %v124_v19  ;;  %v125_v24 = vmin.f32 %v109_v20, 0.0  ;;  %vm121_vm4 = vcmp.gt.f32.partialorder %v109_v20, 0.0 }
  0xe4   :  { %637 = vpow2.f32 %v132_v21  ;;  %v134_v25 = vmul.f32 1.442695, %v127_v22 }
  0xe5   :  { %639 = vpow2.f32 %v128_v23  ;;  %v130_v26 = vmul.f32 1.442695, %v125_v24 }
  0xe6   :  { %641 = vpow2.f32 %v134_v25 }
  0xe7   :  { %643 = vpow2.f32 %v130_v26 }
  0xee   :  { %v638_v27 = vpop.eup %637 }
  0xef   :  { %v640_v28 = vpop.eup %639  ;;  %v537_v29 = vadd.f32 -1.0, %v638_v27 }
  0xf0   :  { %v642_v30 = vpop.eup %641  ;;  %v535_v31 = vadd.f32 -1.0, %v640_v28 }
  0xf1   :  { %v644_v32 = vpop.eup %643  ;;  %v142_v33 = vmul.f32 1.6732632, %v537_v29  ;;  %v538_v34 = vadd.f32 -1.0, %v642_v30 }
  0xf2   :  { %v140_v35 = vmul.f32 1.6732632, %v535_v31  ;;  %v536_v36 = vadd.f32 -1.0, %v644_v32 }
  0xf3   :  { %v146_v37 = vsel %vm122_vm1, %v114_v12, %v142_v33  ;;  %v143_v38 = vmul.f32 1.6732632, %v538_v34 }
  0xf4   :  { %v144_v39 = vsel %vm120_vm2, %v106_v14, %v140_v35  ;;  %v141_v40 = vmul.f32 1.6732632, %v536_v36  ;;  %v150_v42 = vmul.f32 1.050701, %v146_v37 }
  0xf5   :  { %v147_v41 = vsel %vm123_vm3, %v117_v17, %v143_v38  ;;  %v148_v45 = vmul.f32 1.050701, %v144_v39  ;;  %v301_v39 = vlaneseq }
  0xf6   :  { %v151_v43 = vmul.f32 1.050701, %v147_v41  ;;  %v145_v44 = vsel %vm121_vm4, %v109_v20, %v141_v40 }
  0xf7   :  { %v149_v46 = vmul.f32 1.050701, %v145_v44  ;;  %v302_v40 = vshrl.u32 %v301_v39, 7 }
  0xf8   :  { %v153_v47 = vpack.c.bf16 %v151_v43, %v150_v42  ;;  %v299_v42 = vld [vmem:[%s848_s6] sm:$0x3] }
  0xf9   :  { %v152_v48 = vpack.c.bf16 %v149_v46, %v148_v45  ;;  %v303_v41 = vsub.s32 0, %v302_v40  ;;  %v307_v43 = vsub.s32 1, %v302_v40 }
  0xfb   :  { %600 = vmatprep.mubr.msk.bf16.mxu1 %vm193_vm5, %v152_v48  ;;  %v304_v44 = vrot.slane %v299_v42, %v303_v41  ;;  %v308_v45 = vrot.slane %v299_v42, %v307_v43 }
  0xfc   :  { %601 = vmatmul.mubr.msk.bf16.vlgmr.msra.gmra.mrb[4].mxu1 %vm193_vm5, %v153_v47 }
 0x1cf   :  { %v602_v1 = vpop.f32.mrb[4].mxu1 }
 0x1d0   :  { %v243_v2 = vadd.f32 %v602_v1, %v539_v0  ;;  %v234_v3 = vpop.f32.mrb[5].mxu1 }
 0x1d1   :  { %v235_v4 = vadd.f32 %v539_v0, %v234_v3  ;;  %v603_v5 = vpop.f32.mrb[6].mxu1 }
 0x1d2   :  { %v255_v6 = vmin.f32 %v243_v2, 0.0  ;;  %v246_v7 = vadd.f32 %v603_v5, %v539_v0  ;;  %v237_v8 = vpop.f32.mrb[7].mxu1  ;;  %vm251_vm6 = vcmp.gt.f32.partialorder %v243_v2, 0.0 }
 0x1d3   :  { %v253_v9 = vmin.f32 %v235_v4, 0.0  ;;  %v238_v10 = vadd.f32 %v539_v0, %v237_v8  ;;  %vm249_vm7 = vcmp.gt.f32.partialorder %v235_v4, 0.0 }
 0x1d4   :  { %v261_v11 = vmul.f32 1.442695, %v255_v6  ;;  %v256_v12 = vmin.f32 %v246_v7, 0.0  ;;  %vm252_vm8 = vcmp.gt.f32.partialorder %v246_v7, 0.0 }
 0x1d5   :  { %v257_v13 = vmul.f32 1.442695, %v253_v9  ;;  %v254_v14 = vmin.f32 %v238_v10, 0.0  ;;  %vm250_vm9 = vcmp.gt.f32.partialorder %v238_v10, 0.0 }
 0x1d6   :  { %645 = vpow2.f32 %v261_v11  ;;  %v263_v15 = vmul.f32 1.442695, %v256_v12 }
 0x1d7   :  { %647 = vpow2.f32 %v257_v13  ;;  %v259_v16 = vmul.f32 1.442695, %v254_v14 }
 0x1d8   :  { %649 = vpow2.f32 %v263_v15 }
 0x1d9   :  { %651 = vpow2.f32 %v259_v16 }
 0x1e0   :  { %v646_v17 = vpop.eup %645 }
 0x1e1   :  { %v648_v18 = vpop.eup %647  ;;  %v548_v19 = vadd.f32 -1.0, %v646_v17 }
 0x1e2   :  { %v650_v20 = vpop.eup %649  ;;  %v546_v21 = vadd.f32 -1.0, %v648_v18 }
 0x1e3   :  { %v652_v22 = vpop.eup %651  ;;  %v271_v23 = vmul.f32 1.6732632, %v548_v19  ;;  %v549_v24 = vadd.f32 -1.0, %v650_v20 }
 0x1e4   :  { %v269_v25 = vmul.f32 1.6732632, %v546_v21  ;;  %v547_v26 = vadd.f32 -1.0, %v652_v22 }
 0x1e5   :  { %v275_v27 = vsel %vm251_vm6, %v243_v2, %v271_v23  ;;  %v272_v28 = vmul.f32 1.6732632, %v549_v24 }
 0x1e6   :  { %v273_v29 = vsel %vm249_vm7, %v235_v4, %v269_v25  ;;  %v270_v30 = vmul.f32 1.6732632, %v547_v26  ;;  %v279_v32 = vmul.f32 1.050701, %v275_v27 }
 0x1e7   :  { %v276_v31 = vsel %vm252_vm8, %v246_v7, %v272_v28  ;;  %v277_v35 = vmul.f32 1.050701, %v273_v29 }
 0x1e8   :  { %v280_v33 = vmul.f32 1.050701, %v276_v31  ;;  %v274_v34 = vsel %vm250_vm9, %v238_v10, %v270_v30 }
 0x1e9   :  { %v278_v36 = vmul.f32 1.050701, %v274_v34 }
 0x1ea   :  { %v282_v37 = vpack.c.bf16 %v280_v33, %v279_v32 }
 0x1eb   :  { %v281_v38 = vpack.c.bf16 %v278_v36, %v277_v35 }
 0x1ed   :  { %424 = vmatmul.mubr.bf16.vlgmr.msra.gmra.mrb[0].mxu0 %v281_v38 }
 0x1ee   :  { %433 = vmatprep.mubr.bf16.mxu0 %v685_v63 }
 0x1f5   :  { %434 = vmatmul.mubr.bf16.gmra.mrb[4].mxu0 %v282_v37 }
 0x2c0   :  { %v425_v46 = vpop.f32.mrb[0].mxu0 }
 0x2c1   :  { %v426_v47 = vadd.f32 %v425_v46, %v304_v44  ;;  %v427_v48 = vpop.f32.mrb[1].mxu0 }
 0x2c2   :  { %v428_v49 = vadd.f32 %v427_v48, %v308_v45  ;;  %v429_v50 = vpop.f32.mrb[2].mxu0 }
 0x2c3   :  { %v452_v51 = vmin.f32 %v426_v47, 0.0  ;;  %v430_v52 = vadd.f32 %v429_v50, %v304_v44  ;;  %v431_v53 = vpop.f32.mrb[3].mxu0  ;;  %vm444_vm10 = vcmp.gt.f32.partialorder %v426_v47, 0.0 }
 0x2c4   :  { %v453_v54 = vmin.f32 %v428_v49, 0.0  ;;  %v432_v55 = vadd.f32 %v431_v53, %v308_v45  ;;  %vm445_vm11 = vcmp.gt.f32.partialorder %v428_v49, 0.0 }
 0x2c5   :  { %v460_v56 = vmul.f32 1.442695, %v452_v51  ;;  %v454_v57 = vmin.f32 %v430_v52, 0.0  ;;  %vm446_vm12 = vcmp.gt.f32.partialorder %v430_v52, 0.0 }
 0x2c6   :  { %v462_v58 = vmul.f32 1.442695, %v453_v54  ;;  %v455_v59 = vmin.f32 %v432_v55, 0.0  ;;  %vm447_vm13 = vcmp.gt.f32.partialorder %v432_v55, 0.0 }
 0x2c7   :  { %653 = vpow2.f32 %v460_v56  ;;  %v464_v60 = vmul.f32 1.442695, %v454_v57 }
 0x2c8   :  { %655 = vpow2.f32 %v462_v58  ;;  %v466_v61 = vmul.f32 1.442695, %v455_v59  ;;  %v435_v62 = vpop.f32.mrb[4].mxu0 }
 0x2c9   :  { %657 = vpow2.f32 %v464_v60  ;;  %v436_v63 = vadd.f32 %v435_v62, %v304_v44  ;;  %v437_v0 = vpop.f32.mrb[5].mxu0 }
 0x2ca   :  { %659 = vpow2.f32 %v466_v61  ;;  %v438_v1 = vadd.f32 %v437_v0, %v308_v45  ;;  %v439_v2 = vpop.f32.mrb[6].mxu0 }
 0x2cb   :  { %v456_v3 = vmin.f32 %v436_v63, 0.0  ;;  %v440_v4 = vadd.f32 %v439_v2, %v304_v44  ;;  %v441_v5 = vpop.f32.mrb[7].mxu0  ;;  %vm448_vm14 = vcmp.gt.f32.partialorder %v436_v63, 0.0 }
 0x2cc   :  { %v457_v6 = vmin.f32 %v438_v1, 0.0  ;;  %v809_v7 = vadd.f32 %v441_v5, %v308_v45  ;;  %vm449_vm15 = vcmp.gt.f32.partialorder %v438_v1, 0.0 }
 0x2cd   :  { %v468_v8 = vmul.f32 1.442695, %v456_v3  ;;  %v458_v9 = vmin.f32 %v440_v4, 0.0  ;;  %vm450_vm0 = vcmp.gt.f32.partialorder %v440_v4, 0.0 }
 0x2ce   :  { %v470_v10 = vmul.f32 1.442695, %v457_v6  ;;  %v459_v11 = vmin.f32 %v809_v7, 0.0  ;;  %vm451_vm1 = vcmp.gt.f32.partialorder %v809_v7, 0.0 }
 0x2cf   :  { %661 = vpow2.f32 %v468_v8  ;;  %v472_v12 = vmul.f32 1.442695, %v458_v9 }
 0x2d0   :  { %663 = vpow2.f32 %v470_v10  ;;  %v474_v13 = vmul.f32 1.442695, %v459_v11 }
 0x2d1   :  { %v654_v14 = vpop.eup %653  ;;  %665 = vpow2.f32 %v472_v12 }
 0x2d2   :  { %v656_v15 = vpop.eup %655  ;;  %v566_v16 = vadd.f32 -1.0, %v654_v14  ;;  %667 = vpow2.f32 %v474_v13 }
 0x2d3   :  { %v658_v17 = vpop.eup %657  ;;  %v567_v18 = vadd.f32 -1.0, %v656_v15 }
 0x2d4   :  { %v660_v19 = vpop.eup %659  ;;  %v484_v20 = vmul.f32 1.6732632, %v566_v16  ;;  %v568_v21 = vadd.f32 -1.0, %v658_v17 }
 0x2d5   :  { %v485_v22 = vmul.f32 1.6732632, %v567_v18  ;;  %v569_v23 = vadd.f32 -1.0, %v660_v19 }
 0x2d6   :  { %v492_v24 = vsel %vm444_vm10, %v426_v47, %v484_v20  ;;  %v486_v25 = vmul.f32 1.6732632, %v568_v21 }
 0x2d7   :  { %v500_v26 = vmul.f32 1.050701, %v492_v24  ;;  %v493_v27 = vsel %vm445_vm11, %v428_v49, %v485_v22  ;;  %v487_v28 = vmul.f32 1.6732632, %v569_v23 }
 0x2d8   :  { %v501_v29 = vmul.f32 1.050701, %v493_v27  ;;  %v494_v30 = vsel %vm446_vm12, %v430_v52, %v486_v25 }
 0x2d9   :  { %v662_v31 = vpop.eup %661  ;;  %669 = vtanh.f32 %v500_v26  ;;  %v502_v32 = vmul.f32 1.050701, %v494_v30  ;;  %v495_v33 = vsel %vm447_vm13, %v432_v55, %v487_v28 }
 0x2da   :  { %v664_v34 = vpop.eup %663  ;;  %671 = vtanh.f32 %v501_v29  ;;  %v503_v35 = vmul.f32 1.050701, %v495_v33  ;;  %v570_v36 = vadd.f32 -1.0, %v662_v31 }
 0x2db   :  { %v666_v37 = vpop.eup %665  ;;  %673 = vtanh.f32 %v502_v32  ;;  %v571_v38 = vadd.f32 -1.0, %v664_v34 }
 0x2dc   :  { %v668_v39 = vpop.eup %667  ;;  %675 = vtanh.f32 %v503_v35  ;;  %v488_v40 = vmul.f32 1.6732632, %v570_v36  ;;  %v572_v41 = vadd.f32 -1.0, %v666_v37 }
 0x2dd   :  { %v489_v42 = vmul.f32 1.6732632, %v571_v38  ;;  %v573_v43 = vadd.f32 -1.0, %v668_v39 }
 0x2de   :  { %v496_v44 = vsel %vm448_vm14, %v436_v63, %v488_v40  ;;  %v490_v45 = vmul.f32 1.6732632, %v572_v41 }
 0x2df   :  { %v504_v46 = vmul.f32 1.050701, %v496_v44  ;;  %v497_v47 = vsel %vm449_vm15, %v438_v1, %v489_v42  ;;  %v491_v48 = vmul.f32 1.6732632, %v573_v43 }
 0x2e0   :  { %v505_v49 = vmul.f32 1.050701, %v497_v47  ;;  %v498_v50 = vsel %vm450_vm0, %v440_v4, %v490_v45 }
 0x2e1   :  { %677 = vtanh.f32 %v504_v46  ;;  %v506_v51 = vmul.f32 1.050701, %v498_v50  ;;  %v499_v52 = vsel %vm451_vm1, %v809_v7, %v491_v48 }
 0x2e2   :  { %679 = vtanh.f32 %v505_v49  ;;  %v507_v53 = vmul.f32 1.050701, %v499_v52 }
 0x2e3   :  { %v670_v54 = vpop.eup %669  ;;  %681 = vtanh.f32 %v506_v51 }
 0x2e4   :  { %v672_v55 = vpop.eup %671  ;;  %516 = vst [vmem:[%s849_s7] sm:$0xff] %v670_v54  ;;  %683 = vtanh.f32 %v507_v53 }
 0x2e5   :  { %v674_v56 = vpop.eup %673  ;;  %517 = vst.msk [vmem:[%s849_s7 + $0x8] sm:$0xff] %vm193_vm5, %v672_v55 }
 0x2e6   :  { %v676_v57 = vpop.eup %675  ;;  %518 = vst [vmem:[%s849_s7 + $0x10] sm:$0xff] %v674_v56 }
 0x2e7   :  { %519 = vst.msk [vmem:[%s849_s7 + $0x18] sm:$0xff] %vm193_vm5, %v676_v57 }
 0x2eb   :  { %v678_v58 = vpop.eup %677 }
 0x2ec   :  { %v680_v59 = vpop.eup %679  ;;  %520 = vst [vmem:[%s849_s7 + $0x20] sm:$0xff] %v678_v58 }
 0x2ed   :  { %v682_v60 = vpop.eup %681  ;;  %521 = vst.msk [vmem:[%s849_s7 + $0x28] sm:$0xff] %vm193_vm5, %v680_v59 }
 0x2ee   :  { %v684_v61 = vpop.eup %683  ;;  %522 = vst [vmem:[%s849_s7 + $0x30] sm:$0xff] %v682_v60 }
 0x2ef   :  { %523 = vst.msk [vmem:[%s849_s7 + $0x38] sm:$0xff] %vm193_vm5, %v684_v61 }

// kernel: autoencoder_forward.8
= control target key start
LH: loop header
LB: loop body
LE: loop exit
PB: predicated region body
PF: predicated region fallthrough
CT: control target
= control target key end

     0   :  { %v92_v9 = vlaneseq  ;;  %v5408_v14 = vmov 1966171168   ;;  %v5409_v31 = vmov 0.0   ;;  %vm5410_vm0 = vmmov 0   ;;  %s6942_s0 = inlined_call_operand.vmem [shape: bf16[9,2,288], index: 0, kind: input, shape index: {}]   ;;  %s6943_s1 = inlined_call_operand.vmem [shape: bf16[288,64], index: 1, kind: input, shape index: {}]   ;;  %s6944_s2 = inlined_call_operand.vmem [shape: f32[1,64], index: 2, kind: input, shape index: {}]   ;;  %s6945_s3 = inlined_call_operand.vmem [shape: bf16[9,64,256], index: 3, kind: input, shape index: {}]   ;;  %s6946_s4 = inlined_call_operand.vmem [shape: f32[1,256], index: 4, kind: input, shape index: {}]   ;;  %s6947_s5 = inlined_call_operand.vmem [shape: bf16[256,576], index: 5, kind: input, shape index: {}]   ;;  %s6948_s6 = inlined_call_operand.vmem [shape: f32[1,576], index: 6, kind: input, shape index: {}]   ;;  %s6949_s7 = inlined_call_operand.vmem [shape: bf16[576,512], index: 7, kind: input, shape index: {}]   ;;  %s6950_s8 = inlined_call_operand.vmem [shape: f32[1,512], index: 8, kind: input, shape index: {}]   ;;  %s6951_s9 = inlined_call_operand.hbm [shape: f32[2,256], index: 9, kind: output, shape index: {0}]   ;;  %s6952_s10 = inlined_call_operand.vmem [shape: bf16[2,512], index: 10, kind: output, shape index: {1}]  }
   0x1   :  { %v5471_v0 = vld [vmem:[%s6943_s1 + $0x40] sm:$0xff]   ;;  %v4873_v2 = vld [vmem:[%s6943_s1 + $0x48] sm:$0xff]   ;;  %v4875_v4 = vld [vmem:[%s6943_s1 + $0x50] sm:$0xff]   ;;  %v90_v15 = vunpack.c.l.s4 %v5408_v14  ;;  %vm214_vm1 = vcmask 261120  }
   0x2   :  { %v4872_v1 = vld [vmem:[%s6943_s1] sm:$0xff]   ;;  %4527 = vmatprep.subr.bf16.mxu0 %v5471_v0  ;;  %4552 = vmatprep.subr.bf16.mxu1 %v5471_v0  ;;  %v4874_v3 = vld [vmem:[%s6943_s1 + $0x8] sm:$0xff]   ;;  %v5490_v5 = vld [vmem:[%s6943_s1 + $0x10] sm:$0xff]   ;;  %v5533_v16 = vshrl.u32 %v92_v9, 7 }
   0x3   :  { %4528 = vmatpush3.bf16.msra.mxu0 %v4872_v1  ;;  %4553 = vmatpush3.bf16.msra.mxu1 %v4872_v1  ;;  %v5495_v6 = vld [vmem:[%s6943_s1 + $0x58] sm:$0xff]   ;;  %v5508_v8 = vld [vmem:[%s6943_s1 + $0x60] sm:$0xff]   ;;  %v5520_v11 = vld [vmem:[%s6943_s1 + $0x68] sm:$0xff]   ;;  %v91_v19 = vunpack.c.0.s8 %v90_v15 }
   0x4   :  { %4529 = vmatprep.subr.bf16.mxu0 %v4873_v2  ;;  %4554 = vmatprep.subr.bf16.mxu1 %v4873_v2  ;;  %v5501_v7 = vld [vmem:[%s6943_s1 + $0x18] sm:$0xff]   ;;  %v5514_v10 = vld [vmem:[%s6943_s1 + $0x20] sm:$0xff]   ;;  %v5531_v13 = vld [vmem:[%s6943_s1 + $0x28] sm:$0xff]  }
   0x5   :  { %v4088_v12 = vld.sshfl [vmem:[%s6942_s0] sm:$0x13 pattern:$0x75316420]  ;;  %v5538_v17 = vld [vmem:[%s6943_s1 + $0x70] sm:$0xff]   ;;  %v5553_v23 = vsub.s32 %v91_v19, %v5533_v16  ;;  %v5558_v24 = vld [vmem:[%s6943_s1 + $0x78] sm:$0xff]  }
   0x6   :  { %v88_v18 = vcombine.high %v4088_v12, %v4088_v12  ;;  %v4110_v20 = vld.sshfl [vmem:[%s6942_s0 + $0x3] sm:$0x13 pattern:$0x75316420]  ;;  %v5550_v22 = vld [vmem:[%s6943_s1 + $0x30] sm:$0xff]   ;;  %v5569_v27 = vld [vmem:[%s6943_s1 + $0x38] sm:$0xff]  }
   0x7   :  { %4530 = vmatpush3.bf16.msra.mxu0 %v4874_v3  ;;  %4555 = vmatpush3.bf16.msra.mxu1 %v4874_v3  ;;  %v325_v21 = vcombine.high %v4110_v20, %v4110_v20  ;;  %v5578_v28 = vld [vmem:[%s6943_s1 + $0x80] sm:$0xff]   ;;  %v95_v29 = vrot.slane %v4088_v12, %v5553_v23  ;;  %v332_v30 = vrot.slane %v4110_v20, %v5553_v23  ;;  %v5588_v32 = vld [vmem:[%s6943_s1 + $0x88] sm:$0xff]  }
   0x8   :  { %4531 = vmatprep.subr.bf16.mxu0 %v4875_v4  ;;  %4556 = vmatprep.subr.bf16.mxu1 %v4875_v4  ;;  %v102_v25 = vrot.slane %v88_v18, %v5553_v23 }
   0x9   :  { %v339_v26 = vrot.slane %v325_v21, %v5553_v23  ;;  %v103_v33 = vcombine.high %v95_v29, %v95_v29  ;;  %v340_v34 = vcombine.high %v332_v30, %v332_v30 }
   0xa   :  { %250 = vmatprep.mubr.bf16.mxu0 %v102_v25 }
   0xb   :  { %4532 = vmatpush3.bf16.msra.mxu0 %v5490_v5  ;;  %4557 = vmatpush3.bf16.msra.mxu1 %v5490_v5 }
   0xc   :  { %4533 = vmatprep.subr.bf16.mxu0 %v5495_v6  ;;  %4558 = vmatprep.subr.bf16.mxu1 %v5495_v6 }
   0xd   :  { %378 = vmatprep.mubr.bf16.mxu1 %v339_v26 }
   0xf   :  { %4534 = vmatpush3.bf16.msra.mxu0 %v5501_v7  ;;  %4559 = vmatpush3.bf16.msra.mxu1 %v5501_v7 }
  0x10   :  { %4535 = vmatprep.subr.bf16.mxu0 %v5508_v8  ;;  %4560 = vmatprep.subr.bf16.mxu1 %v5508_v8 }
  0x13   :  { %4536 = vmatpush3.bf16.msra.mxu0 %v5514_v10  ;;  %4561 = vmatpush3.bf16.msra.mxu1 %v5514_v10 }
  0x14   :  { %4537 = vmatprep.subr.bf16.mxu0 %v5520_v11  ;;  %4562 = vmatprep.subr.bf16.mxu1 %v5520_v11 }
  0x17   :  { %4538 = vmatpush3.bf16.msra.mxu0 %v5531_v13  ;;  %4563 = vmatpush3.bf16.msra.mxu1 %v5531_v13 }
  0x18   :  { %4539 = vmatprep.subr.bf16.mxu0 %v5538_v17  ;;  %4564 = vmatprep.subr.bf16.mxu1 %v5538_v17 }
  0x1b   :  { %4540 = vmatpush3.bf16.msra.mxu0 %v5550_v22  ;;  %4565 = vmatpush3.bf16.msra.mxu1 %v5550_v22 }
  0x1c   :  { %4541 = vmatprep.subr.bf16.mxu0 %v5558_v24  ;;  %4566 = vmatprep.subr.bf16.mxu1 %v5558_v24 }
  0x1f   :  { %4542 = vmatpush3.bf16.msra.mxu0 %v5569_v27  ;;  %4567 = vmatpush3.bf16.msra.mxu1 %v5569_v27 }
  0x20   :  { %4774 = vmatprep.subr.bf16.mxu0 %v5409_v31 }
  0x22   :  { %251 = vmatmul.mubr.bf16.vlgmr.msra.gmra.mrb[0].mxu0 %v95_v29  ;;  %379 = vmatmul.mubr.bf16.vlgmr.msra.gmra.mrb[0].mxu1 %v332_v30 }
  0x23   :  { %4775 = vmatpush3.bf16.msra.mxu0 %v5578_v28  ;;  %4778 = vmatprep.mubr.msk.bf16.mxu0 %vm5410_vm0, %v5409_v31 }
  0x24   :  { %4776 = vmatprep.subr.bf16.mxu0 %v5409_v31 }
  0x27   :  { %4777 = vmatpush3.bf16.msra.mxu0 %v5588_v32 }
  0x28   :  { %4782 = vmatprep.subr.bf16.mxu0 %v5409_v31 }
  0x2a   :  { %4779 = vmatmul.mubr.msk.bf16.vlgmr.msra.gmra.mrb[4].mxu0 %vm214_vm1, %v103_v33 }
  0x2b   :  { %4783 = vmatpush3.bf16.msra.mxu0 %v5578_v28  ;;  %4786 = vmatprep.mubr.msk.bf16.mxu0 %vm5410_vm0, %v5409_v31 }
  0x2c   :  { %4784 = vmatprep.subr.bf16.mxu0 %v5409_v31 }
  0x2f   :  { %4785 = vmatpush3.bf16.msra.mxu0 %v5588_v32 }
  0x32   :  { %4787 = vmatmul.mubr.msk.bf16.vlgmr.msra.gmra.mrb[8].mxu0 %vm214_vm1, %v340_v34 }
  0x33   :  { %16 = vsyncpa [#allocation3], 0  ;;  %v4891_v35 = vld [vmem:[%s6945_s3 + $0x4] ss:$8 sps:$4 sm:$0xff]   ;;  %v4889_v36 = vld [vmem:[%s6945_s3] ss:$8 sps:$4 sm:$0xff]  }
  0x34   :  { %572 = vmatprep.subr.bf16.mxu1 %v4891_v35  ;;  %v4894_v37 = vld [vmem:[%s6945_s3 + $0x14] ss:$8 sps:$4 sm:$0xff]   ;;  %v4892_v38 = vld [vmem:[%s6945_s3 + $0x10] ss:$8 sps:$4 sm:$0xff]   ;;  %v4897_v39 = vld [vmem:[%s6945_s3 + $0x44] ss:$8 sps:$4 sm:$0xff]  }
  0x35   :  { %573 = vmatpush1.bf16.msra.mxu1 %v4889_v36  ;;  %v4895_v40 = vld [vmem:[%s6945_s3 + $0x40] ss:$8 sps:$4 sm:$0xff]   ;;  %v4900_v41 = vld [vmem:[%s6945_s3 + $0x24] ss:$8 sps:$4 sm:$0xff]   ;;  %488 = vmatprep.subr.bf16.mxu0 %v4897_v39  ;;  %v4903_v43 = vld [vmem:[%s6945_s3 + $0x54] ss:$8 sps:$4 sm:$0xff]  }
  0x36   :  { %574 = vmatprep.subr.bf16.mxu1 %v4894_v37  ;;  %v4898_v42 = vld [vmem:[%s6945_s3 + $0x20] ss:$8 sps:$4 sm:$0xff]   ;;  %489 = vmatpush1.bf16.msra.mxu0 %v4895_v40  ;;  %v4901_v44 = vld [vmem:[%s6945_s3 + $0x50] ss:$8 sps:$4 sm:$0xff]   ;;  %v4906_v45 = vld [vmem:[%s6945_s3 + $0x34] ss:$8 sps:$4 sm:$0xff]  }
  0x37   :  { %490 = vmatprep.subr.bf16.mxu0 %v4903_v43  ;;  %v4904_v46 = vld [vmem:[%s6945_s3 + $0x30] ss:$8 sps:$4 sm:$0xff]   ;;  %v4909_v47 = vld [vmem:[%s6945_s3 + $0x64] ss:$8 sps:$4 sm:$0xff]   ;;  %v4907_v48 = vld [vmem:[%s6945_s3 + $0x60] ss:$8 sps:$4 sm:$0xff]  }
  0x38   :  { %v5411_v49 = vmov 0   ;;  %v4912_v50 = vld [vmem:[%s6945_s3 + $0x74] ss:$8 sps:$4 sm:$0xff]   ;;  %v4910_v51 = vld [vmem:[%s6945_s3 + $0x70] ss:$8 sps:$4 sm:$0xff]   ;;  %vm484_vm3 = vcmask 523264  }
  0x39   :  { %575 = vmatpush1.bf16.msra.mxu1 %v4892_v38  ;;  %604 = vmatprep.mubr.bf16.mxu1 %v5411_v49  ;;  %v5658_v62 = vld [vmem:[%s6944_s2] ss:$0 sm:$0xff]  ;;  %v4140_v38 = vld.sshfl [vmem:[%s6942_s0 + $0x6] sm:$0x13 pattern:$0x75316420] }
  0x3a   :  { %576 = vmatprep.subr.bf16.mxu1 %v4900_v41  ;;  %491 = vmatpush1.bf16.msra.mxu0 %v4901_v44  ;;  %v630_v40 = vrot.slane %v4140_v38, %v5553_v23  ;;  %s5412_s19 = smov [#allocation2]  }
  0x3b   :  { %492 = vmatprep.subr.bf16.mxu0 %v4909_v47  ;;  %520 = vmatprep.mubr.bf16.mxu0 %v5411_v49  ;;  %s4075_s20 = sshll.u32 %s5412_s19, 4  ;;  %s4076_s20 = int_to_ptr.vmem [resolvable:$true] %s4075_s20 }
  0x3c   :  { %s5384_s21 = scalar_lea.vmem %s4076_s20, 64  ;;  %p5389_p1 = scmp.lt.s32.totalorder %s4076_s20, %s4076_s20 }
  0x3d   :  { %577 = vmatpush1.bf16.msra.mxu1 %v4898_v42  ;;  %v623_v42 = vcombine.high %v4140_v38, %v4140_v38  ;;  %v5771_v38 = vld [vmem:[%s6943_s1 + $0x10] sm:$0xff]   ;;  %p5385_p0 = scmp.ne.s32.totalorder %s4076_s20, %s5384_s21  ;;  %p5390_p2 = scmp.lt.s32.totalorder %s5384_s21, %s5384_s21 }
  0x3e   :  { %578 = vmatprep.subr.bf16.mxu1 %v4906_v45  ;;  %493 = vmatpush1.bf16.msra.mxu0 %v4907_v48  ;;  %v638_v45 = vcombine.high %v630_v40, %v630_v40  ;;  %v5678_v48 = vld [vmem:[%s6943_s1] sm:$0xff]  }
  0x3f   :  { %494 = vmatprep.subr.bf16.mxu0 %v4912_v50  ;;  %v5684_v50 = vld [vmem:[%s6943_s1 + $0x48] sm:$0xff]   ;;  %p5391_p3 = por %p5390_p2, %p5389_p1 }
  0x41   :  { %579 = vmatpush1.bf16.msra.mxu1 %v4904_v46  ;;  %v637_v46 = vrot.slane %v623_v42, %v5553_v23  ;;  %v5795_v42 = vld [vmem:[%s6943_s1 + $0x20] sm:$0xff]   ;;  %p5392_p4 = pnand %p5391_p3, %p5385_p0 }
  0x42   :  { %4790 = vmatprep.subr.bf16.mxu1 %v5409_v31  ;;  %495 = vmatpush1.bf16.msra.mxu0 %v4910_v51  ;;  %v5691_v51 = vld [vmem:[%s6943_s1 + $0x8] sm:$0xff]  }
  0x43   :  { %4577 = vmatprep.subr.bf16.mxu0 %v5471_v0 }
  0xf5   :  { %v4543_v52 = vpop.f32.mrb[0].mxu0  ;;  %v4568_v53 = vpop.f32.mrb[0].mxu1 }
  0xf6   :  { %v4544_v54 = vpop.f32.mrb[1].mxu0  ;;  %v4569_v55 = vpop.f32.mrb[1].mxu1 }
  0xf7   :  { %v4545_v56 = vadd.f32 %v4544_v54, %v4543_v52  ;;  %v4546_v57 = vpop.f32.mrb[2].mxu0  ;;  %v4570_v58 = vadd.f32 %v4569_v55, %v4568_v53  ;;  %v4571_v59 = vpop.f32.mrb[2].mxu1  ;;  %v5697_v52 = vld [vmem:[%s6943_s1 + $0x50] sm:$0xff]  }
  0xf8   :  { %v4547_v60 = vpop.f32.mrb[3].mxu0  ;;  %v4572_v61 = vpop.f32.mrb[3].mxu1 }
  0xf9   :  { %v253_v63 = vadd.f32 %v4545_v56, %v5658_v62  ;;  %v381_v14 = vadd.f32 %v4570_v58, %v5658_v62 }
  0xfd   :  { %v292_v1 = vpop.f32.mrb[4].mxu0 }
  0xfe   :  { %v293_v2 = vadd.f32 %v292_v1, %v253_v63  ;;  %v4780_v0 = vpop.f32.mrb[5].mxu0 }
  0xff   :  { %v295_v3 = vpop.f32.mrb[6].mxu0 }
 0x100   :  { %v299_v4 = vmin.f32 %v293_v2, 0.0  ;;  %v4781_v9 = vpop.f32.mrb[7].mxu0  ;;  %vm298_vm2 = vcmp.gt.f32.partialorder %v293_v2, 0.0 }
 0x102   :  { %v300_v12 = vmul.f32 1.442695, %v299_v4 }
 0x104   :  { %5325 = vpow2.f32 %v300_v12 }
 0x105   :  { %v420_v15 = vpop.f32.mrb[8].mxu0 }
 0x106   :  { %v421_v18 = vadd.f32 %v420_v15, %v381_v14  ;;  %v4788_v19 = vpop.f32.mrb[9].mxu0 }
 0x107   :  { %v423_v20 = vpop.f32.mrb[10].mxu0 }
 0x108   :  { %v427_v21 = vmin.f32 %v421_v18, 0.0  ;;  %v4789_v25 = vpop.f32.mrb[11].mxu0  ;;  %vm426_vm4 = vcmp.gt.f32.partialorder %v421_v18, 0.0 }
 0x10a   :  { %v428_v26 = vmul.f32 1.442695, %v427_v21 }
 0x10c   :  { %5327 = vpow2.f32 %v428_v26 }
 0x10e   :  { %v5326_v29 = vpop.eup %5325 }
 0x10f   :  { %v4108_v30 = vadd.f32 -1.0, %v5326_v29 }
 0x111   :  { %v303_v33 = vmul.f32 1.6732632, %v4108_v30 }
 0x113   :  { %v304_v34 = vsel %vm298_vm2, %v293_v2, %v303_v33 }
 0x114   :  { %v305_v35 = vmul.f32 1.050701, %v304_v34 }
 0x116   :  { %v5328_v36 = vpop.eup %5327  ;;  %v306_v37 = vpack.c.bf16 %v305_v35, %v305_v35 }
 0x117   :  { %v4112_v39 = vadd.f32 -1.0, %v5328_v36 }
 0x118   :  { %4138 = vmatmul.mubr.msk.bf16.vlgmr.msra.gmra.mrb[4].mxu1 %vm484_vm3, %v306_v37 }
 0x119   :  { %v431_v41 = vmul.f32 1.6732632, %v4112_v39  ;;  %4791 = vmatpush3.bf16.msra.mxu1 %v5578_v28  ;;  %4794 = vmatprep.mubr.msk.bf16.mxu1 %vm5410_vm0, %v5409_v31  ;;  %v5777_v39 = vld [vmem:[%s6943_s1 + $0x58] sm:$0xff]  }
 0x11a   :  { %4792 = vmatprep.subr.bf16.mxu1 %v5409_v31 }
 0x11b   :  { %v432_v43 = vsel %vm426_vm4, %v421_v18, %v431_v41  ;;  %v5789_v41 = vld [vmem:[%s6943_s1 + $0x60] sm:$0xff]  }
 0x11c   :  { %v433_v44 = vmul.f32 1.050701, %v432_v43  ;;  %v5801_v43 = vld [vmem:[%s6943_s1 + $0x68] sm:$0xff]  }
 0x11d   :  { %4793 = vmatpush3.bf16.msra.mxu1 %v5588_v32 }
 0x11e   :  { %v434_v47 = vpack.c.bf16 %v433_v44, %v433_v44  ;;  %v5807_v44 = vld [vmem:[%s6943_s1 + $0x28] sm:$0xff]  }
 0x120   :  { %4129 = vmatmul.mubr.msk.bf16.vlgmr.msra.gmra.mrb[12].mxu0 %vm484_vm3, %v434_v47  ;;  %4795 = vmatmul.mubr.msk.bf16.vlgmr.msra.gmra.mrb[8].mxu1 %vm214_vm1, %v638_v45  ;;  %v5813_v45 = vld [vmem:[%s6943_s1 + $0x70] sm:$0xff]   ;;  %v5825_v47 = vld [vmem:[%s6943_s1 + $0x78] sm:$0xff]  }
 0x121   :  { %4578 = vmatpush3.bf16.msra.mxu0 %v5678_v48  ;;  %676 = vmatprep.mubr.bf16.mxu0 %v637_v46  ;;  %v5819_v46 = vld [vmem:[%s6943_s1 + $0x30] sm:$0xff]  }
 0x122   :  { %4579 = vmatprep.subr.bf16.mxu0 %v5684_v50  ;;  %817 = vmatprep.mubr.bf16.mxu1 %v5411_v49 }
 0x125   :  { %4580 = vmatpush3.bf16.msra.mxu0 %v5691_v51 }
 0x126   :  { %4581 = vmatprep.subr.bf16.mxu0 %v5697_v52 }
 0x129   :  { %4582 = vmatpush3.bf16.msra.mxu0 %v5490_v5  ;;  %v4915_v5 = vld [vmem:[%s6945_s3 + $0x84] ss:$8 sps:$4 sm:$0xff]  }
 0x12a   :  { %4583 = vmatprep.subr.bf16.mxu0 %v5495_v6  ;;  %v4913_v6 = vld [vmem:[%s6945_s3 + $0x80] ss:$8 sps:$4 sm:$0xff]   ;;  %785 = vmatprep.subr.bf16.mxu1 %v4915_v5  ;;  %v5831_v5 = vld [vmem:[%s6943_s1 + $0x38] sm:$0xff]  }
 0x12b   :  { %786 = vmatpush1.bf16.msra.mxu1 %v4913_v6 }
 0x12d   :  { %4584 = vmatpush3.bf16.msra.mxu0 %v5501_v7  ;;  %v4918_v7 = vld [vmem:[%s6945_s3 + $0x94] ss:$8 sps:$4 sm:$0xff]  }
 0x12e   :  { %4585 = vmatprep.subr.bf16.mxu0 %v5508_v8  ;;  %v4916_v8 = vld [vmem:[%s6945_s3 + $0x90] ss:$8 sps:$4 sm:$0xff]   ;;  %787 = vmatprep.subr.bf16.mxu1 %v4918_v7 }
 0x12f   :  { %788 = vmatpush1.bf16.msra.mxu1 %v4916_v8 }
 0x131   :  { %4586 = vmatpush3.bf16.msra.mxu0 %v5514_v10  ;;  %v4921_v10 = vld [vmem:[%s6945_s3 + $0xa4] ss:$8 sps:$4 sm:$0xff]  }
 0x132   :  { %4587 = vmatprep.subr.bf16.mxu0 %v5520_v11  ;;  %v4919_v11 = vld [vmem:[%s6945_s3 + $0xa0] ss:$8 sps:$4 sm:$0xff]   ;;  %789 = vmatprep.subr.bf16.mxu1 %v4921_v10 }
 0x133   :  { %790 = vmatpush1.bf16.msra.mxu1 %v4919_v11  ;;  %v4927_v11 = vld [vmem:[%s6945_s3 + $0xc4] ss:$8 sps:$4 sm:$0xff]  }
 0x135   :  { %4588 = vmatpush3.bf16.msra.mxu0 %v5531_v13  ;;  %v4924_v13 = vld [vmem:[%s6945_s3 + $0xb4] ss:$8 sps:$4 sm:$0xff]  }
 0x136   :  { %4589 = vmatprep.subr.bf16.mxu0 %v5538_v17  ;;  %v4922_v17 = vld [vmem:[%s6945_s3 + $0xb0] ss:$8 sps:$4 sm:$0xff]   ;;  %791 = vmatprep.subr.bf16.mxu1 %v4924_v13  ;;  %v4925_v13 = vld [vmem:[%s6945_s3 + $0xc0] ss:$8 sps:$4 sm:$0xff]  }
 0x137   :  { %792 = vmatpush1.bf16.msra.mxu1 %v4922_v17  ;;  %v4933_v17 = vld [vmem:[%s6945_s3 + $0xe4] ss:$8 sps:$4 sm:$0xff]  }
 0x139   :  { %4590 = vmatpush3.bf16.msra.mxu0 %v5550_v22  ;;  %v5744_v22 = vld [vmem:[%s6943_s1 + $0x40] sm:$0xff]  }
 0x13a   :  { %4591 = vmatprep.subr.bf16.mxu0 %v5558_v24  ;;  %4602 = vmatprep.subr.bf16.mxu1 %v5744_v22  ;;  %v4161_v24 = vld.sshfl [vmem:[%s6942_s0 + $0x9] sm:$0x13 pattern:$0x75316420] }
 0x13b   :  { %v838_v33 = vcombine.high %v4161_v24, %v4161_v24 }
 0x13d   :  { %4592 = vmatpush3.bf16.msra.mxu0 %v5569_v27  ;;  %v5751_v27 = vrot.slane %v4161_v24, %v5553_v23  ;;  %v852_v36 = vrot.slane %v838_v33, %v5553_v23  ;;  %v4931_v24 = vld [vmem:[%s6945_s3 + $0xe0] ss:$8 sps:$4 sm:$0xff]  }
 0x13e   :  { %4798 = vmatprep.subr.bf16.mxu0 %v5409_v31  ;;  %v5900_v33 = vld [vmem:[%s6943_s1 + $0x80] sm:$0xff]  }
 0x13f   :  { %v853_v53 = vcombine.high %v5751_v27, %v5751_v27 }
 0x140   :  { %677 = vmatmul.mubr.bf16.vlgmr.msra.gmra.mrb[16].mxu0 %v630_v40  ;;  %v5783_v40 = vld [vmem:[%s6943_s1 + $0x18] sm:$0xff]  }
 0x141   :  { %4799 = vmatpush3.bf16.msra.mxu0 %v5578_v28  ;;  %4802 = vmatprep.mubr.msk.bf16.mxu0 %vm5410_vm0, %v5409_v31 }
 0x142   :  { %4800 = vmatprep.subr.bf16.mxu0 %v5409_v31 }
 0x145   :  { %4801 = vmatpush3.bf16.msra.mxu0 %v5588_v32 }
 0x146   :  { %1000 = vmatprep.subr.bf16.mxu0 %v4927_v11  ;;  %v4940_v11 = vld [vmem:[%s6945_s3 + $0x110] ss:$8 sps:$4 sm:$0xff]  }
 0x148   :  { %4803 = vmatmul.mubr.msk.bf16.vlgmr.msra.gmra.mrb[20].mxu0 %vm214_vm1, %v853_v53  ;;  %v4934_v53 = vld [vmem:[%s6945_s3 + $0xf0] ss:$8 sps:$4 sm:$0xff]  }
 0x149   :  { %1032 = vmatprep.mubr.bf16.mxu0 %v5411_v49  ;;  %1001 = vmatpush1.bf16.msra.mxu0 %v4925_v13  ;;  %v4945_v13 = vld [vmem:[%s6945_s3 + $0x124] ss:$8 sps:$4 sm:$0xff]  }
 0x1eb   :  { %v606_v54 = vpop.f32.mrb[4].mxu1 }
 0x1ec   :  { %v608_v55 = vpop.f32.mrb[5].mxu1 }
 0x1ed   :  { %v610_v56 = vpop.f32.mrb[6].mxu1 }
 0x1ee   :  { %v611_v57 = vpop.f32.mrb[7].mxu1 }
 0x1f3   :  { %v522_v58 = vpop.f32.mrb[12].mxu0  ;;  %v718_v59 = vpop.f32.mrb[8].mxu1 }
 0x1f4   :  { %v5757_v60 = vadd.f32 %v606_v54, %v522_v58  ;;  %v524_v61 = vpop.f32.mrb[13].mxu0  ;;  %v4796_v63 = vpop.f32.mrb[9].mxu1  ;;  %v4182_v54 = vld.sshfl [vmem:[%s6942_s0 + $0xc] sm:$0x13 pattern:$0x75316420] }
 0x1f5   :  { %v5759_v1 = vadd.f32 %v608_v55, %v524_v61  ;;  %v526_v2 = vpop.f32.mrb[14].mxu0  ;;  %v721_v0 = vpop.f32.mrb[10].mxu1  ;;  %v1060_v55 = vrot.slane %v4182_v54, %v5553_v23 }
 0x1f6   :  { %v527_v3 = vpop.f32.mrb[15].mxu0  ;;  %v4797_v4 = vpop.f32.mrb[11].mxu1 }
 0x1f7   :  { %v1068_v56 = vcombine.high %v1060_v55, %v1060_v55 }
 0x213   :  { %v4593_v9 = vpop.f32.mrb[16].mxu0 }
 0x214   :  { %v4594_v12 = vpop.f32.mrb[17].mxu0 }
 0x215   :  { %v4595_v14 = vadd.f32 %v4594_v12, %v4593_v9  ;;  %v4596_v15 = vpop.f32.mrb[18].mxu0 }
 0x216   :  { %v4597_v18 = vpop.f32.mrb[19].mxu0 }
 0x217   :  { %v679_v19 = vadd.f32 %v4595_v14, %v5658_v62 }
 0x219   :  { %v719_v20 = vadd.f32 %v718_v59, %v679_v19 }
 0x21b   :  { %v725_v21 = vmin.f32 %v719_v20, 0.0  ;;  %vm724_vm5 = vcmp.gt.f32.partialorder %v719_v20, 0.0  ;;  %v933_v6 = vpop.f32.mrb[20].mxu0 }
 0x21c   :  { %v4804_v7 = vpop.f32.mrb[21].mxu0 }
 0x21d   :  { %v726_v25 = vmul.f32 1.442695, %v725_v21  ;;  %v936_v8 = vpop.f32.mrb[22].mxu0  ;;  %v4939_v7 = vld [vmem:[%s6945_s3 + $0x104] ss:$8 sps:$4 sm:$0xff]  }
 0x21e   :  { %v4805_v10 = vpop.f32.mrb[23].mxu0  ;;  %v4937_v8 = vld [vmem:[%s6945_s3 + $0x100] ss:$8 sps:$4 sm:$0xff]  }
 0x21f   :  { %5329 = vpow2.f32 %v726_v25  ;;  %v1053_v25 = vcombine.high %v4182_v54, %v4182_v54  ;;  %v4942_v10 = vld [vmem:[%s6945_s3 + $0x114] ss:$8 sps:$4 sm:$0xff]  }
 0x229   :  { %v5330_v26 = vpop.eup %5329 }
 0x22a   :  { %v4142_v29 = vadd.f32 -1.0, %v5330_v26 }
 0x22c   :  { %v729_v30 = vmul.f32 1.6732632, %v4142_v29  ;;  %v1067_v29 = vrot.slane %v1053_v25, %v5553_v23 }
 0x22e   :  { %v730_v34 = vsel %vm724_vm5, %v719_v20, %v729_v30 }
 0x22f   :  { %v731_v35 = vmul.f32 1.050701, %v730_v34  ;;  %v5909_v34 = vld [vmem:[%s6943_s1 + $0x88] sm:$0xff]  }
 0x231   :  { %v732_v37 = vpack.c.bf16 %v731_v35, %v731_v35 }
 0x233   :  { %4159 = vmatmul.mubr.msk.bf16.vlgmr.msra.gmra.mrb[12].mxu1 %vm484_vm3, %v732_v37 }
 0x234   :  { %4603 = vmatpush3.bf16.msra.mxu1 %v5678_v48  ;;  %891 = vmatprep.mubr.bf16.mxu1 %v852_v36 }
 0x235   :  { %4604 = vmatprep.subr.bf16.mxu1 %v5684_v50 }
 0x238   :  { %4605 = vmatpush3.bf16.msra.mxu1 %v5691_v51 }
 0x239   :  { %4606 = vmatprep.subr.bf16.mxu1 %v5697_v52 }
 0x23c   :  { %4607 = vmatpush3.bf16.msra.mxu1 %v5771_v38 }
 0x23d   :  { %4608 = vmatprep.subr.bf16.mxu1 %v5777_v39 }
 0x240   :  { %4609 = vmatpush3.bf16.msra.mxu1 %v5783_v40 }
 0x241   :  { %4610 = vmatprep.subr.bf16.mxu1 %v5789_v41 }
 0x244   :  { %4611 = vmatpush3.bf16.msra.mxu1 %v5795_v42 }
 0x245   :  { %4612 = vmatprep.subr.bf16.mxu1 %v5801_v43 }
 0x248   :  { %4613 = vmatpush3.bf16.msra.mxu1 %v5807_v44 }
 0x249   :  { %4614 = vmatprep.subr.bf16.mxu1 %v5813_v45 }
 0x24c   :  { %4615 = vmatpush3.bf16.msra.mxu1 %v5819_v46 }
 0x24d   :  { %4616 = vmatprep.subr.bf16.mxu1 %v5825_v47 }
 0x250   :  { %4617 = vmatpush3.bf16.msra.mxu1 %v5831_v5 }
 0x251   :  { %4806 = vmatprep.subr.bf16.mxu1 %v5409_v31 }
 0x253   :  { %892 = vmatmul.mubr.bf16.vlgmr.msra.gmra.mrb[16].mxu1 %v5751_v27  ;;  %v4936_v27 = vld [vmem:[%s6945_s3 + $0xf4] ss:$8 sps:$4 sm:$0xff]  }
 0x254   :  { %4807 = vmatpush3.bf16.msra.mxu1 %v5578_v28  ;;  %4810 = vmatprep.mubr.msk.bf16.mxu1 %vm5410_vm0, %v5409_v31  ;;  %v4930_v28 = vld [vmem:[%s6945_s3 + $0xd4] ss:$8 sps:$4 sm:$0xff]  }
 0x255   :  { %4808 = vmatprep.subr.bf16.mxu1 %v5409_v31  ;;  %1002 = vmatprep.subr.bf16.mxu0 %v4930_v28  ;;  %v4943_v28 = vld [vmem:[%s6945_s3 + $0x120] ss:$8 sps:$4 sm:$0xff]  }
 0x258   :  { %4809 = vmatpush3.bf16.msra.mxu1 %v5588_v32  ;;  %v4928_v32 = vld [vmem:[%s6945_s3 + $0xd0] ss:$8 sps:$4 sm:$0xff]  }
 0x259   :  { %1003 = vmatpush1.bf16.msra.mxu0 %v4928_v32  ;;  %1215 = vmatprep.subr.bf16.mxu1 %v4939_v7  ;;  %v4948_v32 = vld [vmem:[%s6945_s3 + $0x134] ss:$8 sps:$4 sm:$0xff]   ;;  %v4952_v7 = vld [vmem:[%s6945_s3 + $0x150] ss:$8 sps:$4 sm:$0xff]  }
 0x25a   :  { %1004 = vmatprep.subr.bf16.mxu0 %v4933_v17  ;;  %v4946_v17 = vld [vmem:[%s6945_s3 + $0x130] ss:$8 sps:$4 sm:$0xff]  }
 0x25b   :  { %4811 = vmatmul.mubr.msk.bf16.vlgmr.msra.gmra.mrb[20].mxu1 %vm214_vm1, %v1068_v56 }
 0x25c   :  { %1247 = vmatprep.mubr.bf16.mxu1 %v5411_v49  ;;  %1216 = vmatpush1.bf16.msra.mxu1 %v4937_v8  ;;  %v4957_v8 = vld [vmem:[%s6945_s3 + $0x164] ss:$8 sps:$4 sm:$0xff]  }
 0x25d   :  { %1005 = vmatpush1.bf16.msra.mxu0 %v4931_v24  ;;  %1217 = vmatprep.subr.bf16.mxu1 %v4942_v10  ;;  %v4203_v24 = vld.sshfl [vmem:[%s6942_s0 + $0xf] sm:$0x13 pattern:$0x75316420]  ;;  %v4955_v10 = vld [vmem:[%s6945_s3 + $0x160] ss:$8 sps:$4 sm:$0xff]  }
 0x25e   :  { %1006 = vmatprep.subr.bf16.mxu0 %v4936_v27  ;;  %v1275_v27 = vrot.slane %v4203_v24, %v5553_v23 }
 0x260   :  { %1218 = vmatpush1.bf16.msra.mxu1 %v4940_v11  ;;  %v4960_v11 = vld [vmem:[%s6945_s3 + $0x174] ss:$8 sps:$4 sm:$0xff]  }
 0x261   :  { %1007 = vmatpush1.bf16.msra.mxu0 %v4934_v53  ;;  %1219 = vmatprep.subr.bf16.mxu1 %v4945_v13  ;;  %v1283_v53 = vcombine.high %v1275_v27, %v1275_v27  ;;  %v4958_v13 = vld [vmem:[%s6945_s3 + $0x170] ss:$8 sps:$4 sm:$0xff]  }
 0x262   :  { %4627 = vmatprep.subr.bf16.mxu0 %v5744_v22 }
 0x264   :  { %1220 = vmatpush1.bf16.msra.mxu1 %v4943_v28  ;;  %v4224_v28 = vld.sshfl [vmem:[%s6942_s0 + $0x12] sm:$0x13 pattern:$0x75316420] }
 0x265   :  { %1221 = vmatprep.subr.bf16.mxu1 %v4948_v32  ;;  %v1490_v32 = vrot.slane %v4224_v28, %v5553_v23 }
 0x268   :  { %1222 = vmatpush1.bf16.msra.mxu1 %v4946_v17  ;;  %v1498_v17 = vcombine.high %v1490_v32, %v1490_v32 }
 0x269   :  { %4652 = vmatprep.subr.bf16.mxu1 %v5744_v22 }
 0x306   :  { %v819_v57 = vpop.f32.mrb[12].mxu1 }
 0x307   :  { %v5873_v58 = vadd.f32 %v819_v57, %v5757_v60  ;;  %v821_v59 = vpop.f32.mrb[13].mxu1 }
 0x308   :  { %v5876_v61 = vadd.f32 %v821_v59, %v5759_v1  ;;  %v823_v63 = vpop.f32.mrb[14].mxu1 }
 0x309   :  { %v824_v2 = vpop.f32.mrb[15].mxu1 }
 0x326   :  { %v4618_v0 = vpop.f32.mrb[16].mxu1 }
 0x327   :  { %v4619_v3 = vpop.f32.mrb[17].mxu1 }
 0x328   :  { %v4620_v4 = vadd.f32 %v4619_v3, %v4618_v0  ;;  %v4621_v9 = vpop.f32.mrb[18].mxu1 }
 0x329   :  { %v4622_v12 = vpop.f32.mrb[19].mxu1 }
 0x32a   :  { %v894_v14 = vadd.f32 %v4620_v4, %v5658_v62 }
 0x32c   :  { %v934_v15 = vadd.f32 %v933_v6, %v894_v14 }
 0x32e   :  { %v940_v18 = vmin.f32 %v934_v15, 0.0  ;;  %vm939_vm6 = vcmp.gt.f32.partialorder %v934_v15, 0.0  ;;  %v1148_v35 = vpop.f32.mrb[20].mxu1 }
 0x32f   :  { %v4812_v36 = vpop.f32.mrb[21].mxu1 }
 0x330   :  { %v941_v19 = vmul.f32 1.442695, %v940_v18  ;;  %v1151_v37 = vpop.f32.mrb[22].mxu1  ;;  %v4951_v36 = vld [vmem:[%s6945_s3 + $0x144] ss:$8 sps:$4 sm:$0xff]  }
 0x331   :  { %v4813_v6 = vpop.f32.mrb[23].mxu1  ;;  %v4949_v37 = vld [vmem:[%s6945_s3 + $0x140] ss:$8 sps:$4 sm:$0xff]  }
 0x332   :  { %5331 = vpow2.f32 %v941_v19  ;;  %v4954_v6 = vld [vmem:[%s6945_s3 + $0x154] ss:$8 sps:$4 sm:$0xff]  }
 0x33c   :  { %v5332_v20 = vpop.eup %5331 }
 0x33d   :  { %v4163_v60 = vadd.f32 -1.0, %v5332_v20 }
 0x33f   :  { %v944_v21 = vmul.f32 1.6732632, %v4163_v60  ;;  %v1268_v60 = vcombine.high %v4203_v24, %v4203_v24 }
 0x341   :  { %v945_v1 = vsel %vm939_vm6, %v934_v15, %v944_v21  ;;  %v1282_v25 = vrot.slane %v1268_v60, %v5553_v23 }
 0x342   :  { %v946_v26 = vmul.f32 1.050701, %v945_v1 }
 0x344   :  { %v947_v30 = vpack.c.bf16 %v946_v26, %v946_v26 }
 0x346   :  { %4180 = vmatmul.mubr.msk.bf16.vlgmr.msra.gmra.mrb[24].mxu0 %vm484_vm3, %v947_v30 }
 0x347   :  { %4628 = vmatpush3.bf16.msra.mxu0 %v5678_v48  ;;  %1106 = vmatprep.mubr.bf16.mxu0 %v1067_v29 }
 0x348   :  { %4629 = vmatprep.subr.bf16.mxu0 %v5684_v50 }
 0x34b   :  { %4630 = vmatpush3.bf16.msra.mxu0 %v5691_v51 }
 0x34c   :  { %4631 = vmatprep.subr.bf16.mxu0 %v5697_v52 }
 0x34f   :  { %4632 = vmatpush3.bf16.msra.mxu0 %v5771_v38 }
 0x350   :  { %4633 = vmatprep.subr.bf16.mxu0 %v5777_v39 }
 0x353   :  { %4634 = vmatpush3.bf16.msra.mxu0 %v5783_v40 }
 0x354   :  { %4635 = vmatprep.subr.bf16.mxu0 %v5789_v41 }
 0x357   :  { %4636 = vmatpush3.bf16.msra.mxu0 %v5795_v42 }
 0x358   :  { %4637 = vmatprep.subr.bf16.mxu0 %v5801_v43 }
 0x35b   :  { %4638 = vmatpush3.bf16.msra.mxu0 %v5807_v44 }
 0x35c   :  { %4639 = vmatprep.subr.bf16.mxu0 %v5813_v45 }
 0x35f   :  { %4640 = vmatpush3.bf16.msra.mxu0 %v5819_v46 }
 0x360   :  { %4641 = vmatprep.subr.bf16.mxu0 %v5825_v47 }
 0x363   :  { %4642 = vmatpush3.bf16.msra.mxu0 %v5831_v5 }
 0x364   :  { %4814 = vmatprep.subr.bf16.mxu0 %v5409_v31 }
 0x366   :  { %1107 = vmatmul.mubr.bf16.vlgmr.msra.gmra.mrb[28].mxu0 %v1060_v55 }
 0x367   :  { %4815 = vmatpush3.bf16.msra.mxu0 %v5900_v33  ;;  %4818 = vmatprep.mubr.msk.bf16.mxu0 %vm5410_vm0, %v5409_v31 }
 0x368   :  { %4816 = vmatprep.subr.bf16.mxu0 %v5409_v31 }
 0x36b   :  { %4817 = vmatpush3.bf16.msra.mxu0 %v5909_v34 }
 0x36c   :  { %1430 = vmatprep.subr.bf16.mxu0 %v4951_v36  ;;  %v4964_v36 = vld [vmem:[%s6945_s3 + $0x190] ss:$8 sps:$4 sm:$0xff]  }
 0x36e   :  { %4819 = vmatmul.mubr.msk.bf16.vlgmr.msra.gmra.mrb[32].mxu0 %vm214_vm1, %v1283_v53 }
 0x36f   :  { %1462 = vmatprep.mubr.bf16.mxu0 %v5411_v49  ;;  %1431 = vmatpush1.bf16.msra.mxu0 %v4949_v37  ;;  %v4969_v37 = vld [vmem:[%s6945_s3 + $0x1a4] ss:$8 sps:$4 sm:$0xff]  }
 0x370   :  { %1432 = vmatprep.subr.bf16.mxu0 %v4954_v6  ;;  %v4967_v6 = vld [vmem:[%s6945_s3 + $0x1a0] ss:$8 sps:$4 sm:$0xff]  }
 0x373   :  { %1433 = vmatpush1.bf16.msra.mxu0 %v4952_v7  ;;  %v4972_v7 = vld [vmem:[%s6945_s3 + $0x1b4] ss:$8 sps:$4 sm:$0xff]  }
 0x374   :  { %1434 = vmatprep.subr.bf16.mxu0 %v4957_v8  ;;  %v4970_v8 = vld [vmem:[%s6945_s3 + $0x1b0] ss:$8 sps:$4 sm:$0xff]  }
 0x377   :  { %1435 = vmatpush1.bf16.msra.mxu0 %v4955_v10  ;;  %v4245_v10 = vld.sshfl [vmem:[%s6942_s0 + $0x15] sm:$0x13 pattern:$0x75316420] }
 0x378   :  { %1436 = vmatprep.subr.bf16.mxu0 %v4960_v11  ;;  %v1705_v11 = vrot.slane %v4245_v10, %v5553_v23 }
 0x37b   :  { %1437 = vmatpush1.bf16.msra.mxu0 %v4958_v13  ;;  %v1713_v13 = vcombine.high %v1705_v11, %v1705_v11 }
 0x37c   :  { %4677 = vmatprep.subr.bf16.mxu0 %v5744_v22 }
 0x419   :  { %v1034_v54 = vpop.f32.mrb[24].mxu0 }
 0x41a   :  { %v5944_v55 = vadd.f32 %v1034_v54, %v5873_v58  ;;  %v1036_v56 = vpop.f32.mrb[25].mxu0 }
 0x41b   :  { %v5947_v57 = vadd.f32 %v1036_v56, %v5876_v61  ;;  %v1038_v59 = vpop.f32.mrb[26].mxu0 }
 0x41c   :  { %v1039_v63 = vpop.f32.mrb[27].mxu0 }
 0x439   :  { %v4643_v2 = vpop.f32.mrb[28].mxu0 }
 0x43a   :  { %v4644_v0 = vpop.f32.mrb[29].mxu0 }
 0x43b   :  { %v4645_v3 = vadd.f32 %v4644_v0, %v4643_v2  ;;  %v4646_v4 = vpop.f32.mrb[30].mxu0 }
 0x43c   :  { %v4647_v9 = vpop.f32.mrb[31].mxu0 }
 0x43d   :  { %v1109_v12 = vadd.f32 %v4645_v3, %v5658_v62 }
 0x43f   :  { %v1149_v14 = vadd.f32 %v1148_v35, %v1109_v12 }
 0x441   :  { %v1155_v15 = vmin.f32 %v1149_v14, 0.0  ;;  %vm1154_vm7 = vcmp.gt.f32.partialorder %v1149_v14, 0.0  ;;  %v1363_v26 = vpop.f32.mrb[32].mxu0 }
 0x442   :  { %v4820_v29 = vpop.f32.mrb[33].mxu0 }
 0x443   :  { %v1156_v18 = vmul.f32 1.442695, %v1155_v15  ;;  %v1366_v30 = vpop.f32.mrb[34].mxu0  ;;  %v4963_v29 = vld [vmem:[%s6945_s3 + $0x184] ss:$8 sps:$4 sm:$0xff]  }
 0x444   :  { %v4821_v35 = vpop.f32.mrb[35].mxu0  ;;  %v4961_v30 = vld [vmem:[%s6945_s3 + $0x180] ss:$8 sps:$4 sm:$0xff]  }
 0x445   :  { %5333 = vpow2.f32 %v1156_v18  ;;  %v4966_v35 = vld [vmem:[%s6945_s3 + $0x194] ss:$8 sps:$4 sm:$0xff]  }
 0x44f   :  { %v5334_v19 = vpop.eup %5333 }
 0x450   :  { %v4184_v58 = vadd.f32 -1.0, %v5334_v19 }
 0x452   :  { %v1159_v20 = vmul.f32 1.6732632, %v4184_v58  ;;  %v1483_v58 = vcombine.high %v4224_v28, %v4224_v28 }
 0x454   :  { %v1160_v61 = vsel %vm1154_vm7, %v1149_v14, %v1159_v20  ;;  %v1497_v60 = vrot.slane %v1483_v58, %v5553_v23 }
 0x455   :  { %v1161_v21 = vmul.f32 1.050701, %v1160_v61 }
 0x457   :  { %v1162_v1 = vpack.c.bf16 %v1161_v21, %v1161_v21 }
 0x459   :  { %4201 = vmatmul.mubr.msk.bf16.vlgmr.msra.gmra.mrb[24].mxu1 %vm484_vm3, %v1162_v1 }
 0x45a   :  { %4653 = vmatpush3.bf16.msra.mxu1 %v5678_v48  ;;  %1321 = vmatprep.mubr.bf16.mxu1 %v1282_v25 }
 0x45b   :  { %4654 = vmatprep.subr.bf16.mxu1 %v5684_v50 }
 0x45e   :  { %4655 = vmatpush3.bf16.msra.mxu1 %v5691_v51 }
 0x45f   :  { %4656 = vmatprep.subr.bf16.mxu1 %v5697_v52 }
 0x462   :  { %4657 = vmatpush3.bf16.msra.mxu1 %v5771_v38 }
 0x463   :  { %4658 = vmatprep.subr.bf16.mxu1 %v5777_v39 }
 0x466   :  { %4659 = vmatpush3.bf16.msra.mxu1 %v5783_v40 }
 0x467   :  { %4660 = vmatprep.subr.bf16.mxu1 %v5789_v41 }
 0x46a   :  { %4661 = vmatpush3.bf16.msra.mxu1 %v5795_v42 }
 0x46b   :  { %4662 = vmatprep.subr.bf16.mxu1 %v5801_v43 }
 0x46e   :  { %4663 = vmatpush3.bf16.msra.mxu1 %v5807_v44 }
 0x46f   :  { %4664 = vmatprep.subr.bf16.mxu1 %v5813_v45 }
 0x472   :  { %4665 = vmatpush3.bf16.msra.mxu1 %v5819_v46 }
 0x473   :  { %4666 = vmatprep.subr.bf16.mxu1 %v5825_v47 }
 0x476   :  { %4667 = vmatpush3.bf16.msra.mxu1 %v5831_v5 }
 0x477   :  { %4822 = vmatprep.subr.bf16.mxu1 %v5409_v31 }
 0x479   :  { %1322 = vmatmul.mubr.bf16.vlgmr.msra.gmra.mrb[28].mxu1 %v1275_v27 }
 0x47a   :  { %4823 = vmatpush3.bf16.msra.mxu1 %v5900_v33  ;;  %4826 = vmatprep.mubr.msk.bf16.mxu1 %vm5410_vm0, %v5409_v31 }
 0x47b   :  { %4824 = vmatprep.subr.bf16.mxu1 %v5409_v31 }
 0x47e   :  { %4825 = vmatpush3.bf16.msra.mxu1 %v5909_v34 }
 0x47f   :  { %1645 = vmatprep.subr.bf16.mxu1 %v4963_v29  ;;  %v4984_v29 = vld [vmem:[%s6945_s3 + $0x1f4] ss:$8 sps:$4 sm:$0xff]  }
 0x481   :  { %4827 = vmatmul.mubr.msk.bf16.vlgmr.msra.gmra.mrb[32].mxu1 %vm214_vm1, %v1498_v17 }
 0x482   :  { %1677 = vmatprep.mubr.bf16.mxu1 %v5411_v49  ;;  %1646 = vmatpush1.bf16.msra.mxu1 %v4961_v30  ;;  %v4982_v30 = vld [vmem:[%s6945_s3 + $0x1f0] ss:$8 sps:$4 sm:$0xff]  }
 0x483   :  { %1647 = vmatprep.subr.bf16.mxu1 %v4966_v35  ;;  %v4266_v35 = vld.sshfl [vmem:[%s6942_s0 + $0x18] sm:$0x13 pattern:$0x75316420] }
 0x486   :  { %1648 = vmatpush1.bf16.msra.mxu1 %v4964_v36  ;;  %v1920_v36 = vrot.slane %v4266_v35, %v5553_v23 }
 0x487   :  { %1649 = vmatprep.subr.bf16.mxu1 %v4969_v37 }
 0x488   :  { %v1928_v37 = vcombine.high %v1920_v36, %v1920_v36 }
 0x48a   :  { %1650 = vmatpush1.bf16.msra.mxu1 %v4967_v6 }
 0x48b   :  { %1651 = vmatprep.subr.bf16.mxu1 %v4972_v7 }
 0x48e   :  { %1652 = vmatpush1.bf16.msra.mxu1 %v4970_v8 }
 0x48f   :  { %4702 = vmatprep.subr.bf16.mxu1 %v5744_v22 }
 0x52c   :  { %v1249_v24 = vpop.f32.mrb[24].mxu1 }
 0x52d   :  { %v6005_v27 = vadd.f32 %v1249_v24, %v5944_v55  ;;  %v1251_v53 = vpop.f32.mrb[25].mxu1 }
 0x52e   :  { %v6008_v54 = vadd.f32 %v1251_v53, %v5947_v57  ;;  %v1253_v56 = vpop.f32.mrb[26].mxu1 }
 0x52f   :  { %v1254_v59 = vpop.f32.mrb[27].mxu1 }
 0x54c   :  { %v4668_v63 = vpop.f32.mrb[28].mxu1 }
 0x54d   :  { %v4669_v2 = vpop.f32.mrb[29].mxu1 }
 0x54e   :  { %v4670_v0 = vadd.f32 %v4669_v2, %v4668_v63  ;;  %v4671_v3 = vpop.f32.mrb[30].mxu1 }
 0x54f   :  { %v4672_v4 = vpop.f32.mrb[31].mxu1 }
 0x550   :  { %v1324_v9 = vadd.f32 %v4670_v0, %v5658_v62 }
 0x552   :  { %v1364_v12 = vadd.f32 %v1363_v26, %v1324_v9 }
 0x554   :  { %v1370_v14 = vmin.f32 %v1364_v12, 0.0  ;;  %vm1369_vm8 = vcmp.gt.f32.partialorder %v1364_v12, 0.0  ;;  %v1578_v21 = vpop.f32.mrb[32].mxu1 }
 0x555   :  { %v4828_v25 = vpop.f32.mrb[33].mxu1 }
 0x556   :  { %v1371_v15 = vmul.f32 1.442695, %v1370_v14  ;;  %v1581_v1 = vpop.f32.mrb[34].mxu1  ;;  %v4975_v25 = vld [vmem:[%s6945_s3 + $0x1c4] ss:$8 sps:$4 sm:$0xff]  }
 0x557   :  { %v4829_v26 = vpop.f32.mrb[35].mxu1  ;;  %v4973_v1 = vld [vmem:[%s6945_s3 + $0x1c0] ss:$8 sps:$4 sm:$0xff]  }
 0x558   :  { %5335 = vpow2.f32 %v1371_v15  ;;  %v4979_v26 = vld [vmem:[%s6945_s3 + $0x1e0] ss:$8 sps:$4 sm:$0xff]  }
 0x562   :  { %v5336_v18 = vpop.eup %5335 }
 0x563   :  { %v4205_v55 = vadd.f32 -1.0, %v5336_v18 }
 0x565   :  { %v1374_v19 = vmul.f32 1.6732632, %v4205_v55  ;;  %v1698_v55 = vcombine.high %v4245_v10, %v4245_v10 }
 0x567   :  { %v1375_v57 = vsel %vm1369_vm8, %v1364_v12, %v1374_v19  ;;  %v1712_v58 = vrot.slane %v1698_v55, %v5553_v23  ;;  %v5014_v55 = vld [vmem:[%s6947_s5 + $0x5c] ss:$20 sps:$4 sm:$0xff]  }
 0x568   :  { %v1376_v20 = vmul.f32 1.050701, %v1375_v57 }
 0x56a   :  { %v1377_v61 = vpack.c.bf16 %v1376_v20, %v1376_v20 }
 0x56c   :  { %4222 = vmatmul.mubr.msk.bf16.vlgmr.msra.gmra.mrb[36].mxu0 %vm484_vm3, %v1377_v61 }
 0x56d   :  { %4678 = vmatpush3.bf16.msra.mxu0 %v5678_v48  ;;  %1536 = vmatprep.mubr.bf16.mxu0 %v1497_v60 }
 0x56e   :  { %4679 = vmatprep.subr.bf16.mxu0 %v5684_v50 }
 0x571   :  { %4680 = vmatpush3.bf16.msra.mxu0 %v5691_v51 }
 0x572   :  { %4681 = vmatprep.subr.bf16.mxu0 %v5697_v52 }
 0x575   :  { %4682 = vmatpush3.bf16.msra.mxu0 %v5771_v38 }
 0x576   :  { %4683 = vmatprep.subr.bf16.mxu0 %v5777_v39 }
 0x579   :  { %4684 = vmatpush3.bf16.msra.mxu0 %v5783_v40 }
 0x57a   :  { %4685 = vmatprep.subr.bf16.mxu0 %v5789_v41 }
 0x57d   :  { %4686 = vmatpush3.bf16.msra.mxu0 %v5795_v42 }
 0x57e   :  { %4687 = vmatprep.subr.bf16.mxu0 %v5801_v43 }
 0x581   :  { %4688 = vmatpush3.bf16.msra.mxu0 %v5807_v44 }
 0x582   :  { %4689 = vmatprep.subr.bf16.mxu0 %v5813_v45 }
 0x585   :  { %4690 = vmatpush3.bf16.msra.mxu0 %v5819_v46 }
 0x586   :  { %4691 = vmatprep.subr.bf16.mxu0 %v5825_v47 }
 0x589   :  { %4692 = vmatpush3.bf16.msra.mxu0 %v5831_v5 }
 0x58a   :  { %4830 = vmatprep.subr.bf16.mxu0 %v5409_v31 }
 0x58c   :  { %1537 = vmatmul.mubr.bf16.vlgmr.msra.gmra.mrb[40].mxu0 %v1490_v32 }
 0x58d   :  { %4831 = vmatpush3.bf16.msra.mxu0 %v5900_v33  ;;  %4834 = vmatprep.mubr.msk.bf16.mxu0 %vm5410_vm0, %v5409_v31 }
 0x58e   :  { %4832 = vmatprep.subr.bf16.mxu0 %v5409_v31 }
 0x591   :  { %4833 = vmatpush3.bf16.msra.mxu0 %v5909_v34 }
 0x592   :  { %1860 = vmatprep.subr.bf16.mxu0 %v4975_v25  ;;  %v5042_v25 = vld [vmem:[%s6947_s5 + $0x120] ss:$20 sps:$4 sm:$0xff]  }
 0x594   :  { %4835 = vmatmul.mubr.msk.bf16.vlgmr.msra.gmra.mrb[44].mxu0 %vm214_vm1, %v1713_v13 }
 0x595   :  { %1892 = vmatprep.mubr.bf16.mxu0 %v5411_v49  ;;  %1861 = vmatpush1.bf16.msra.mxu0 %v4973_v1  ;;  %v5044_v1 = vld [vmem:[%s6947_s5 + $0x124] ss:$20 sps:$4 sm:$0xff]  }
 0x63f   :  { %v1464_v28 = vpop.f32.mrb[36].mxu0 }
 0x640   :  { %v6066_v32 = vadd.f32 %v1464_v28, %v6005_v27  ;;  %v1466_v17 = vpop.f32.mrb[37].mxu0 }
 0x641   :  { %v6069_v24 = vadd.f32 %v1466_v17, %v6008_v54  ;;  %v1468_v53 = vpop.f32.mrb[38].mxu0 }
 0x642   :  { %v1469_v56 = vpop.f32.mrb[39].mxu0 }
 0x65f   :  { %v4693_v59 = vpop.f32.mrb[40].mxu0 }
 0x660   :  { %v4694_v63 = vpop.f32.mrb[41].mxu0 }
 0x661   :  { %v4695_v2 = vadd.f32 %v4694_v63, %v4693_v59  ;;  %v4696_v0 = vpop.f32.mrb[42].mxu0 }
 0x662   :  { %v4697_v3 = vpop.f32.mrb[43].mxu0 }
 0x663   :  { %v1539_v4 = vadd.f32 %v4695_v2, %v5658_v62 }
 0x665   :  { %v1579_v9 = vadd.f32 %v1578_v21, %v1539_v4 }
 0x667   :  { %v1585_v12 = vmin.f32 %v1579_v9, 0.0  ;;  %vm1584_vm9 = vcmp.gt.f32.partialorder %v1579_v9, 0.0  ;;  %v1793_v20 = vpop.f32.mrb[44].mxu0 }
 0x668   :  { %v4836_v60 = vpop.f32.mrb[45].mxu0 }
 0x669   :  { %v1586_v14 = vmul.f32 1.442695, %v1585_v12  ;;  %v1796_v61 = vpop.f32.mrb[46].mxu0  ;;  %v5032_v60 = vld [vmem:[%s6947_s5 + $0xd4] ss:$20 sps:$4 sm:$0xff]  }
 0x66a   :  { %v4837_v21 = vpop.f32.mrb[47].mxu0  ;;  %v5036_v61 = vld [vmem:[%s6947_s5 + $0xf8] ss:$20 sps:$4 sm:$0xff]  }
 0x66b   :  { %5337 = vpow2.f32 %v1586_v14  ;;  %v5038_v21 = vld [vmem:[%s6947_s5 + $0xfc] ss:$20 sps:$4 sm:$0xff]  }
 0x675   :  { %v5338_v15 = vpop.eup %5337 }
 0x676   :  { %v4226_v27 = vadd.f32 -1.0, %v5338_v15 }
 0x678   :  { %v1589_v18 = vmul.f32 1.6732632, %v4226_v27  ;;  %v5008_v27 = vld [vmem:[%s6947_s5 + $0x34] ss:$20 sps:$4 sm:$0xff]  }
 0x67a   :  { %v1590_v54 = vsel %vm1584_vm9, %v1579_v9, %v1589_v18  ;;  %v1913_v9 = vcombine.high %v4266_v35, %v4266_v35  ;;  %v5012_v18 = vld [vmem:[%s6947_s5 + $0x58] ss:$20 sps:$4 sm:$0xff]  }
 0x67b   :  { %v1591_v19 = vmul.f32 1.050701, %v1590_v54  ;;  %v5018_v54 = vld [vmem:[%s6947_s5 + $0x80] ss:$20 sps:$4 sm:$0xff]  }
 0x67c   :  { %v1927_v14 = vrot.slane %v1913_v9, %v5553_v23  ;;  %v5011_v9 = vld [vmem:[%s6947_s5 + $0x54] ss:$20 sps:$4 sm:$0xff]  }
 0x67d   :  { %v1592_v57 = vpack.c.bf16 %v1591_v19, %v1591_v19  ;;  %v5020_v19 = vld [vmem:[%s6947_s5 + $0x84] ss:$20 sps:$4 sm:$0xff]  }
 0x67f   :  { %4243 = vmatmul.mubr.msk.bf16.vlgmr.msra.gmra.mrb[36].mxu1 %vm484_vm3, %v1592_v57  ;;  %v5026_v57 = vld [vmem:[%s6947_s5 + $0xac] ss:$20 sps:$4 sm:$0xff]  }
 0x680   :  { %4703 = vmatpush3.bf16.msra.mxu1 %v5678_v48  ;;  %1751 = vmatprep.mubr.bf16.mxu1 %v1712_v58  ;;  %v5024_v58 = vld [vmem:[%s6947_s5 + $0xa8] ss:$20 sps:$4 sm:$0xff]  }
 0x681   :  { %4704 = vmatprep.subr.bf16.mxu1 %v5684_v50 }
 0x684   :  { %4705 = vmatpush3.bf16.msra.mxu1 %v5691_v51 }
 0x685   :  { %4706 = vmatprep.subr.bf16.mxu1 %v5697_v52 }
 0x688   :  { %4707 = vmatpush3.bf16.msra.mxu1 %v5771_v38 }
 0x689   :  { %4708 = vmatprep.subr.bf16.mxu1 %v5777_v39 }
 0x68c   :  { %4709 = vmatpush3.bf16.msra.mxu1 %v5783_v40 }
 0x68d   :  { %4710 = vmatprep.subr.bf16.mxu1 %v5789_v41 }
 0x690   :  { %4711 = vmatpush3.bf16.msra.mxu1 %v5795_v42 }
 0x691   :  { %4712 = vmatprep.subr.bf16.mxu1 %v5801_v43 }
 0x694   :  { %4713 = vmatpush3.bf16.msra.mxu1 %v5807_v44 }
 0x695   :  { %4714 = vmatprep.subr.bf16.mxu1 %v5813_v45 }
 0x698   :  { %4715 = vmatpush3.bf16.msra.mxu1 %v5819_v46 }
 0x699   :  { %4716 = vmatprep.subr.bf16.mxu1 %v5825_v47 }
 0x69c   :  { %4717 = vmatpush3.bf16.msra.mxu1 %v5831_v5 }
 0x69d   :  { %4838 = vmatprep.subr.bf16.mxu1 %v5409_v31 }
 0x69f   :  { %1752 = vmatmul.mubr.bf16.vlgmr.msra.gmra.mrb[40].mxu1 %v1705_v11 }
 0x6a0   :  { %4839 = vmatpush3.bf16.msra.mxu1 %v5900_v33  ;;  %4842 = vmatprep.mubr.msk.bf16.mxu1 %vm5410_vm0, %v5409_v31  ;;  %v4976_v33 = vld [vmem:[%s6945_s3 + $0x1d0] ss:$8 sps:$4 sm:$0xff]  }
 0x6a1   :  { %4840 = vmatprep.subr.bf16.mxu1 %v5409_v31  ;;  %v4978_v31 = vld [vmem:[%s6945_s3 + $0x1d4] ss:$8 sps:$4 sm:$0xff]  }
 0x6a2   :  { %1862 = vmatprep.subr.bf16.mxu0 %v4978_v31  ;;  %v5048_v31 = vld [vmem:[%s6947_s5 + $0x148] ss:$20 sps:$4 sm:$0xff]  }
 0x6a3   :  { %1863 = vmatpush1.bf16.msra.mxu0 %v4976_v33  ;;  %v5050_v33 = vld [vmem:[%s6947_s5 + $0x14c] ss:$20 sps:$4 sm:$0xff]  }
 0x6a4   :  { %4841 = vmatpush3.bf16.msra.mxu1 %v5909_v34  ;;  %v4981_v34 = vld [vmem:[%s6945_s3 + $0x1e4] ss:$8 sps:$4 sm:$0xff]  }
 0x6a5   :  { %1864 = vmatprep.subr.bf16.mxu0 %v4981_v34 }
 0x6a7   :  { %1865 = vmatpush1.bf16.msra.mxu0 %v4979_v26  ;;  %4843 = vmatmul.mubr.msk.bf16.vlgmr.msra.gmra.mrb[44].mxu1 %vm214_vm1, %v1928_v37 }
 0x6a8   :  { %1866 = vmatprep.subr.bf16.mxu0 %v4984_v29  ;;  %2107 = vmatprep.mubr.bf16.mxu1 %v5411_v49 }
 0x6ab   :  { %1867 = vmatpush1.bf16.msra.mxu0 %v4982_v30 }
 0x6ac   :  { %4727 = vmatprep.subr.bf16.mxu0 %v5744_v22 }
 0x752   :  { %v1679_v6 = vpop.f32.mrb[36].mxu1 }
 0x753   :  { %v6127_v7 = vadd.f32 %v1679_v6, %v6066_v32  ;;  %v1681_v8 = vpop.f32.mrb[37].mxu1 }
 0x754   :  { %v6130_v10 = vadd.f32 %v1681_v8, %v6069_v24  ;;  %v1683_v22 = vpop.f32.mrb[38].mxu1 }
 0x755   :  { %v1684_v11 = vpop.f32.mrb[39].mxu1 }
 0x772   :  { %v4718_v13 = vpop.f32.mrb[40].mxu1 }
 0x773   :  { %v4719_v28 = vpop.f32.mrb[41].mxu1 }
 0x774   :  { %v4720_v17 = vadd.f32 %v4719_v28, %v4718_v13  ;;  %v4721_v53 = vpop.f32.mrb[42].mxu1  ;;  %v5383_v13 = vld [vmem:[%s6944_s2] ss:$0 sm:$0xff] }
 0x775   :  { %v4722_v56 = vpop.f32.mrb[43].mxu1 }
 0x776   :  { %v1754_v59 = vadd.f32 %v4720_v17, %v5658_v62 }
 0x778   :  { %v1794_v63 = vadd.f32 %v1793_v20, %v1754_v59  ;;  %v5030_v20 = vld [vmem:[%s6947_s5 + $0xd0] ss:$20 sps:$4 sm:$0xff]  }
 0x77a   :  { %v1800_v2 = vmin.f32 %v1794_v63, 0.0  ;;  %vm1799_vm10 = vcmp.gt.f32.partialorder %v1794_v63, 0.0  ;;  %v6150_v62 = vpop.f32.mrb[44].mxu1 }
 0x77c   :  { %v1801_v0 = vmul.f32 1.442695, %v1800_v2 }
 0x77e   :  { %5339 = vpow2.f32 %v1801_v0  ;;  %v4997_v0 = vld [vmem:[%s6947_s5] ss:$20 sps:$4 sm:$0xff]  }
 0x788   :  { %v5340_v3 = vpop.eup %5339 }
 0x789   :  { %v4247_v32 = vadd.f32 -1.0, %v5340_v3 }
 0x78b   :  { %v1804_v4 = vmul.f32 1.6732632, %v4247_v32  ;;  %v5005_v32 = vld [vmem:[%s6947_s5 + $0x2c] ss:$20 sps:$4 sm:$0xff]  }
 0x78d   :  { %v1805_v24 = vsel %vm1799_vm10, %v1794_v63, %v1804_v4  ;;  %v5003_v4 = vld [vmem:[%s6947_s5 + $0x28] ss:$20 sps:$4 sm:$0xff]  }
 0x78e   :  { %v1806_v12 = vmul.f32 1.050701, %v1805_v24  ;;  %v5009_v24 = vld [vmem:[%s6947_s5 + $0x50] ss:$20 sps:$4 sm:$0xff]  }
 0x790   :  { %v1807_v15 = vpack.c.bf16 %v1806_v12, %v1806_v12  ;;  %v5017_v12 = vld [vmem:[%s6947_s5 + $0x7c] ss:$20 sps:$4 sm:$0xff]  }
 0x792   :  { %4264 = vmatmul.mubr.msk.bf16.vlgmr.msra.gmra.mrb[48].mxu0 %vm484_vm3, %v1807_v15  ;;  %v5023_v15 = vld [vmem:[%s6947_s5 + $0xa4] ss:$20 sps:$4 sm:$0xff]  }
 0x793   :  { %4728 = vmatpush3.bf16.msra.mxu0 %v5678_v48  ;;  %1966 = vmatprep.mubr.bf16.mxu0 %v1927_v14  ;;  %v4844_v48 = vpop.f32.mrb[45].mxu1  ;;  %v5015_v14 = vld [vmem:[%s6947_s5 + $0x78] ss:$20 sps:$4 sm:$0xff]  }
 0x794   :  { %4729 = vmatprep.subr.bf16.mxu0 %v5684_v50  ;;  %v2011_v50 = vpop.f32.mrb[46].mxu1  ;;  %v5029_v48 = vld [vmem:[%s6947_s5 + $0xcc] ss:$20 sps:$4 sm:$0xff]  }
 0x795   :  { %v5027_v50 = vld [vmem:[%s6947_s5 + $0xc8] ss:$20 sps:$4 sm:$0xff]  }
 0x797   :  { %4730 = vmatpush3.bf16.msra.mxu0 %v5691_v51  ;;  %v4845_v51 = vpop.f32.mrb[47].mxu1 }
 0x798   :  { %4731 = vmatprep.subr.bf16.mxu0 %v5697_v52  ;;  %v4987_v52 = vld [vmem:[%s6945_s3 + $0x204] ss:$8 sps:$4 sm:$0xff]   ;;  %v5035_v51 = vld [vmem:[%s6947_s5 + $0xf4] ss:$20 sps:$4 sm:$0xff]  }
 0x799   :  { %2075 = vmatprep.subr.bf16.mxu1 %v4987_v52  ;;  %v5033_v52 = vld [vmem:[%s6947_s5 + $0xf0] ss:$20 sps:$4 sm:$0xff]  }
 0x79b   :  { %4732 = vmatpush3.bf16.msra.mxu0 %v5771_v38  ;;  %v4985_v38 = vld [vmem:[%s6945_s3 + $0x200] ss:$8 sps:$4 sm:$0xff]  }
 0x79c   :  { %4733 = vmatprep.subr.bf16.mxu0 %v5777_v39  ;;  %2076 = vmatpush1.bf16.msra.mxu1 %v4985_v38  ;;  %v4990_v39 = vld [vmem:[%s6945_s3 + $0x214] ss:$8 sps:$4 sm:$0xff]  }
 0x79d   :  { %2077 = vmatprep.subr.bf16.mxu1 %v4990_v39  ;;  %v5041_v38 = vld [vmem:[%s6947_s5 + $0x11c] ss:$20 sps:$4 sm:$0xff]   ;;  %v5039_v39 = vld [vmem:[%s6947_s5 + $0x118] ss:$20 sps:$4 sm:$0xff]  }
 0x79f   :  { %4734 = vmatpush3.bf16.msra.mxu0 %v5783_v40  ;;  %v4988_v40 = vld [vmem:[%s6945_s3 + $0x210] ss:$8 sps:$4 sm:$0xff]  }
 0x7a0   :  { %4735 = vmatprep.subr.bf16.mxu0 %v5789_v41  ;;  %2078 = vmatpush1.bf16.msra.mxu1 %v4988_v40  ;;  %v4993_v41 = vld [vmem:[%s6945_s3 + $0x224] ss:$8 sps:$4 sm:$0xff]  }
 0x7a1   :  { %2079 = vmatprep.subr.bf16.mxu1 %v4993_v41  ;;  %v5047_v40 = vld [vmem:[%s6947_s5 + $0x144] ss:$20 sps:$4 sm:$0xff]   ;;  %v5045_v41 = vld [vmem:[%s6947_s5 + $0x140] ss:$20 sps:$4 sm:$0xff]  }
 0x7a3   :  { %4736 = vmatpush3.bf16.msra.mxu0 %v5795_v42  ;;  %v4991_v42 = vld [vmem:[%s6945_s3 + $0x220] ss:$8 sps:$4 sm:$0xff]  }
 0x7a4   :  { %4737 = vmatprep.subr.bf16.mxu0 %v5801_v43  ;;  %2080 = vmatpush1.bf16.msra.mxu1 %v4991_v42  ;;  %v4996_v43 = vld [vmem:[%s6945_s3 + $0x234] ss:$8 sps:$4 sm:$0xff]   ;;  %v5053_v42 = vld [vmem:[%s6947_s5 + $0x16c] ss:$20 sps:$4 sm:$0xff]  }
 0x7a5   :  { %2081 = vmatprep.subr.bf16.mxu1 %v4996_v43  ;;  %v5051_v43 = vld [vmem:[%s6947_s5 + $0x168] ss:$20 sps:$4 sm:$0xff]  }
 0x7a7   :  { %4738 = vmatpush3.bf16.msra.mxu0 %v5807_v44  ;;  %v4994_v44 = vld [vmem:[%s6945_s3 + $0x230] ss:$8 sps:$4 sm:$0xff]  }
 0x7a8   :  { %4739 = vmatprep.subr.bf16.mxu0 %v5813_v45  ;;  %2082 = vmatpush1.bf16.msra.mxu1 %v4994_v44  ;;  %v4999_v45 = vld [vmem:[%s6947_s5 + $0x4] ss:$20 sps:$4 sm:$0xff]   ;;  %v5056_v44 = vld [vmem:[%s6947_s5 + $0x174] ss:$20 sps:$4 sm:$0xff]  }
 0x7a9   :  { %2701 = vmatprep.subr.bf16.mxu1 %v4999_v45  ;;  %v5054_v45 = vld [vmem:[%s6947_s5 + $0x170] ss:$20 sps:$4 sm:$0xff]  }
 0x7ab   :  { %4740 = vmatpush3.bf16.msra.mxu0 %v5819_v46  ;;  %v5000_v46 = vld [vmem:[%s6947_s5 + $0x8] ss:$20 sps:$4 sm:$0xff]  }
 0x7ac   :  { %4741 = vmatprep.subr.bf16.mxu0 %v5825_v47  ;;  %v5002_v47 = vld [vmem:[%s6947_s5 + $0xc] ss:$20 sps:$4 sm:$0xff]  }
 0x7af   :  { %4742 = vmatpush3.bf16.msra.mxu0 %v5831_v5  ;;  %v5006_v5 = vld [vmem:[%s6947_s5 + $0x30] ss:$20 sps:$4 sm:$0xff]  }
 0x7b0   :  { %2742 = vmatprep.subr.bf16.mxu0 %v5002_v47  ;;  %v5057_v47 = vld [vmem:[%s6947_s5 + $0x190] ss:$20 sps:$4 sm:$0xff]  }
 0x7b2   :  { %1967 = vmatmul.mubr.bf16.vlgmr.msra.gmra.mrb[52].mxu0 %v1920_v36 }
 0x7b3   :  { %2743 = vmatpush1.bf16.msra.mxu0 %v5000_v46  ;;  %v5059_v46 = vld [vmem:[%s6947_s5 + $0x194] ss:$20 sps:$4 sm:$0xff]  }
 0x7b4   :  { %2744 = vmatprep.subr.bf16.mxu0 %v5008_v27  ;;  %v5060_v27 = vld [vmem:[%s6947_s5 + $0x198] ss:$20 sps:$4 sm:$0xff]  }
 0x7b7   :  { %2745 = vmatpush1.bf16.msra.mxu0 %v5006_v5  ;;  %v5062_v5 = vld [vmem:[%s6947_s5 + $0x19c] ss:$20 sps:$4 sm:$0xff]  }
 0x7b8   :  { %2746 = vmatprep.subr.bf16.mxu0 %v5014_v55  ;;  %v5063_v55 = vld [vmem:[%s6947_s5 + $0x1b8] ss:$20 sps:$4 sm:$0xff]  }
 0x7bb   :  { %2747 = vmatpush1.bf16.msra.mxu0 %v5012_v18  ;;  %v5065_v18 = vld [vmem:[%s6947_s5 + $0x1bc] ss:$20 sps:$4 sm:$0xff]  }
 0x7bc   :  { %2748 = vmatprep.subr.bf16.mxu0 %v5020_v19  ;;  %v5066_v19 = vld [vmem:[%s6947_s5 + $0x1c0] ss:$20 sps:$4 sm:$0xff]  }
 0x7bf   :  { %2749 = vmatpush1.bf16.msra.mxu0 %v5018_v54  ;;  %v5068_v54 = vld [vmem:[%s6947_s5 + $0x1c4] ss:$20 sps:$4 sm:$0xff]  }
 0x7c0   :  { %2750 = vmatprep.subr.bf16.mxu0 %v5026_v57  ;;  %v5069_v57 = vld [vmem:[%s6947_s5 + $0x1e0] ss:$20 sps:$4 sm:$0xff]  }
 0x7c3   :  { %2751 = vmatpush1.bf16.msra.mxu0 %v5024_v58  ;;  %v5071_v58 = vld [vmem:[%s6947_s5 + $0x1e4] ss:$20 sps:$4 sm:$0xff]  }
 0x7c4   :  { %2752 = vmatprep.subr.bf16.mxu0 %v5032_v60  ;;  %v5072_v60 = vld [vmem:[%s6947_s5 + $0x1e8] ss:$20 sps:$4 sm:$0xff]  }
 0x7c7   :  { %2753 = vmatpush1.bf16.msra.mxu0 %v5030_v20  ;;  %v5074_v20 = vld [vmem:[%s6947_s5 + $0x1ec] ss:$20 sps:$4 sm:$0xff]  }
 0x7c8   :  { %2754 = vmatprep.subr.bf16.mxu0 %v5038_v21  ;;  %v5075_v21 = vld [vmem:[%s6947_s5 + $0x208] ss:$20 sps:$4 sm:$0xff]  }
 0x7cb   :  { %2755 = vmatpush1.bf16.msra.mxu0 %v5036_v61  ;;  %v5077_v61 = vld [vmem:[%s6947_s5 + $0x20c] ss:$20 sps:$4 sm:$0xff]  }
 0x7cc   :  { %2756 = vmatprep.subr.bf16.mxu0 %v5044_v1  ;;  %v5078_v1 = vld [vmem:[%s6947_s5 + $0x210] ss:$20 sps:$4 sm:$0xff]  }
 0x7cf   :  { %2757 = vmatpush1.bf16.msra.mxu0 %v5042_v25  ;;  %v5080_v25 = vld [vmem:[%s6947_s5 + $0x214] ss:$20 sps:$4 sm:$0xff]  }
 0x7d0   :  { %2758 = vmatprep.subr.bf16.mxu0 %v5050_v33  ;;  %v5081_v33 = vld [vmem:[%s6947_s5 + $0x230] ss:$20 sps:$4 sm:$0xff]  }
 0x7d3   :  { %2759 = vmatpush1.bf16.msra.mxu0 %v5048_v31  ;;  %v5083_v31 = vld [vmem:[%s6947_s5 + $0x234] ss:$20 sps:$4 sm:$0xff]  }
 0x7d4   :  { %2760 = vmatprep.subr.bf16.mxu0 %v5056_v44  ;;  %v5117_v44 = vld [vmem:[%s6949_s7 + $0x24] ss:$16 sps:$4 sm:$0xff]  }
 0x7d7   :  { %2761 = vmatpush1.bf16.msra.mxu0 %v5054_v45  ;;  %v5096_v45 = vld [vmem:[%s6947_s5 + $0x38] ss:$20 sps:$4 sm:$0xff]  }
 0x7d8   :  { %2762 = vmatprep.subr.bf16.mxu0 %v5062_v5  ;;  %v5123_v5 = vld [vmem:[%s6949_s7 + $0x44] ss:$16 sps:$4 sm:$0xff]  }
 0x7db   :  { %2763 = vmatpush1.bf16.msra.mxu0 %v5060_v27  ;;  %v5098_v27 = vld [vmem:[%s6947_s5 + $0x60] ss:$20 sps:$4 sm:$0xff]  }
 0x7dc   :  { %2764 = vmatprep.subr.bf16.mxu0 %v5068_v54  ;;  %v5129_v54 = vld [vmem:[%s6949_s7 + $0x64] ss:$16 sps:$4 sm:$0xff]  }
 0x7df   :  { %2765 = vmatpush1.bf16.msra.mxu0 %v5066_v19  ;;  %v5100_v19 = vld [vmem:[%s6947_s5 + $0x88] ss:$20 sps:$4 sm:$0xff]  }
 0x7e0   :  { %2766 = vmatprep.subr.bf16.mxu0 %v5074_v20  ;;  %v5135_v20 = vld [vmem:[%s6949_s7 + $0x84] ss:$16 sps:$4 sm:$0xff]  }
 0x7e3   :  { %2767 = vmatpush1.bf16.msra.mxu0 %v5072_v60  ;;  %v5102_v60 = vld [vmem:[%s6947_s5 + $0xb0] ss:$20 sps:$4 sm:$0xff]  }
 0x7e4   :  { %2768 = vmatprep.subr.bf16.mxu0 %v5080_v25  ;;  %v5141_v25 = vld [vmem:[%s6949_s7 + $0xa4] ss:$16 sps:$4 sm:$0xff]  }
 0x7e7   :  { %2769 = vmatpush1.bf16.msra.mxu0 %v5078_v1  ;;  %v5104_v1 = vld [vmem:[%s6947_s5 + $0xd8] ss:$20 sps:$4 sm:$0xff]  }
 0x865   :  { %v1894_v34 = vpop.f32.mrb[48].mxu0 }
 0x866   :  { %v6234_v26 = vadd.f32 %v1894_v34, %v6127_v7  ;;  %v1896_v29 = vpop.f32.mrb[49].mxu0  ;;  %v5086_v34 = vld [vmem:[%s6947_s5 + $0x23c] ss:$20 sps:$4 sm:$0xff]  }
 0x867   :  { %v6237_v30 = vadd.f32 %v1896_v29, %v6130_v10  ;;  %v1898_v35 = vpop.f32.mrb[50].mxu0  ;;  %v5084_v29 = vld [vmem:[%s6947_s5 + $0x238] ss:$20 sps:$4 sm:$0xff]   ;;  %2770 = vmatprep.subr.bf16.mxu0 %v5086_v34  ;;  %v5147_v34 = vld [vmem:[%s6949_s7 + $0xc4] ss:$16 sps:$4 sm:$0xff]  }
 0x868   :  { %v1899_v36 = vpop.f32.mrb[51].mxu0  ;;  %2771 = vmatpush1.bf16.msra.mxu0 %v5084_v29  ;;  %v5089_v35 = vld [vmem:[%s6947_s5 + $0x25c] ss:$20 sps:$4 sm:$0xff]   ;;  %v5106_v29 = vld [vmem:[%s6947_s5 + $0x100] ss:$20 sps:$4 sm:$0xff]  }
 0x869   :  { %v5087_v36 = vld [vmem:[%s6947_s5 + $0x258] ss:$20 sps:$4 sm:$0xff]  }
 0x885   :  { %v4743_v37 = vpop.f32.mrb[52].mxu0 }
 0x886   :  { %v4744_v6 = vpop.f32.mrb[53].mxu0 }
 0x887   :  { %v4745_v8 = vadd.f32 %v4744_v6, %v4743_v37  ;;  %v4746_v22 = vpop.f32.mrb[54].mxu0  ;;  %v5090_v37 = vld [vmem:[%s6947_s5 + $0x260] ss:$20 sps:$4 sm:$0xff]   ;;  %v5092_v6 = vld [vmem:[%s6947_s5 + $0x264] ss:$20 sps:$4 sm:$0xff]  }
 0x888   :  { %v4747_v11 = vpop.f32.mrb[55].mxu0  ;;  %2772 = vmatprep.subr.bf16.mxu0 %v5092_v6  ;;  %v5111_v22 = vld [vmem:[%s6949_s7 + $0x4] ss:$16 sps:$4 sm:$0xff]   ;;  %v5108_v6 = vld [vmem:[%s6947_s5 + $0x128] ss:$20 sps:$4 sm:$0xff]  }
 0x889   :  { %v1969_v28 = vadd.f32 %v5383_v13, %v4745_v8  ;;  %2773 = vmatpush1.bf16.msra.mxu0 %v5090_v37  ;;  %v5093_v8 = vld [vmem:[%s6947_s5 + $0x150] ss:$20 sps:$4 sm:$0xff]   ;;  %v6386_v11 = vsub.s32 0, %v5533_v16  ;;  %v2118_v13 = vld [vmem:[%s6946_s4] sm:$0x3] }
 0x88a   :  { %3757 = vmatprep.subr.bf16.mxu0 %v5111_v22  ;;  %v5153_v37 = vld [vmem:[%s6949_s7 + $0xe4] ss:$16 sps:$4 sm:$0xff]   ;;  %v5151_v22 = vld [vmem:[%s6949_s7 + $0xe0] ss:$16 sps:$4 sm:$0xff]  }
 0x88b   :  { %v2009_v17 = vadd.f32 %v6150_v62, %v1969_v28  ;;  %v5021_v62 = vld [vmem:[%s6947_s5 + $0xa0] ss:$20 sps:$4 sm:$0xff]   ;;  %v6392_v28 = vsub.s32 1, %v5533_v16 }
 0x88d   :  { %v2015_v7 = vmin.f32 %v2009_v17, 0.0  ;;  %vm2014_vm11 = vcmp.gt.f32.partialorder %v2009_v17, 0.0 }
 0x88f   :  { %v2016_v53 = vmul.f32 1.442695, %v2015_v7 }
 0x891   :  { %5341 = vpow2.f32 %v2016_v53  ;;  %v2127_v53 = vrot.slane %v2118_v13, %v6392_v28 }
 0x89b   :  { %v5342_v56 = vpop.eup %5341 }
 0x89c   :  { %v4268_v10 = vadd.f32 -1.0, %v5342_v56 }
 0x89e   :  { %v2019_v59 = vmul.f32 1.6732632, %v4268_v10 }
 0x8a0   :  { %v2020_v63 = vsel %vm2014_vm11, %v2009_v17, %v2019_v59  ;;  %v2123_v17 = vrot.slane %v2118_v13, %v6386_v11  ;;  %v5159_v13 = vld [vmem:[%s6949_s7 + $0x104] ss:$16 sps:$4 sm:$0xff]  }
 0x8a1   :  { %v2021_v2 = vmul.f32 1.050701, %v2020_v63 }
 0x8a3   :  { %v2022_v3 = vpack.c.bf16 %v2021_v2, %v2021_v2 }
 0x8a5   :  { %4285 = vmatmul.mubr.msk.bf16.vlgmr.msra.gmra.mrb[48].mxu1 %vm484_vm3, %v2022_v3 }
 0x8a6   :  { %2702 = vmatpush1.bf16.msra.mxu1 %v4997_v0 }
 0x8a7   :  { %2703 = vmatprep.subr.bf16.mxu1 %v5005_v32 }
 0x8aa   :  { %2704 = vmatpush1.bf16.msra.mxu1 %v5003_v4 }
 0x8ab   :  { %2705 = vmatprep.subr.bf16.mxu1 %v5011_v9 }
 0x8ae   :  { %2706 = vmatpush1.bf16.msra.mxu1 %v5009_v24 }
 0x8af   :  { %2707 = vmatprep.subr.bf16.mxu1 %v5017_v12 }
 0x8b2   :  { %2708 = vmatpush1.bf16.msra.mxu1 %v5015_v14 }
 0x8b3   :  { %2709 = vmatprep.subr.bf16.mxu1 %v5023_v15 }
 0x8b6   :  { %2710 = vmatpush1.bf16.msra.mxu1 %v5021_v62 }
 0x8b7   :  { %2711 = vmatprep.subr.bf16.mxu1 %v5029_v48 }
 0x8ba   :  { %2712 = vmatpush1.bf16.msra.mxu1 %v5027_v50 }
 0x8bb   :  { %2713 = vmatprep.subr.bf16.mxu1 %v5035_v51 }
 0x8be   :  { %2714 = vmatpush1.bf16.msra.mxu1 %v5033_v52 }
 0x8bf   :  { %2715 = vmatprep.subr.bf16.mxu1 %v5041_v38 }
 0x8c2   :  { %2716 = vmatpush1.bf16.msra.mxu1 %v5039_v39  ;;  %v5094_v39 = vld [vmem:[%s6947_s5 + $0x10] ss:$20 sps:$4 sm:$0xff]  }
 0x8c3   :  { %2717 = vmatprep.subr.bf16.mxu1 %v5047_v40 }
 0x8c6   :  { %2718 = vmatpush1.bf16.msra.mxu1 %v5045_v41 }
 0x8c7   :  { %2719 = vmatprep.subr.bf16.mxu1 %v5053_v42  ;;  %v5095_v42 = vld [vmem:[%s6947_s5 + $0x178] ss:$20 sps:$4 sm:$0xff]  }
 0x8ca   :  { %2720 = vmatpush1.bf16.msra.mxu1 %v5051_v43  ;;  %v5109_v43 = vld [vmem:[%s6949_s7] ss:$16 sps:$4 sm:$0xff]  }
 0x8cb   :  { %2721 = vmatprep.subr.bf16.mxu1 %v5059_v46  ;;  %v5097_v46 = vld [vmem:[%s6947_s5 + $0x1a0] ss:$20 sps:$4 sm:$0xff]  }
 0x8ce   :  { %2722 = vmatpush1.bf16.msra.mxu1 %v5057_v47  ;;  %v5115_v47 = vld [vmem:[%s6949_s7 + $0x20] ss:$16 sps:$4 sm:$0xff]  }
 0x8cf   :  { %2723 = vmatprep.subr.bf16.mxu1 %v5065_v18  ;;  %v5099_v18 = vld [vmem:[%s6947_s5 + $0x1c8] ss:$20 sps:$4 sm:$0xff]  }
 0x8d2   :  { %2724 = vmatpush1.bf16.msra.mxu1 %v5063_v55  ;;  %v5121_v55 = vld [vmem:[%s6949_s7 + $0x40] ss:$16 sps:$4 sm:$0xff]  }
 0x8d3   :  { %2725 = vmatprep.subr.bf16.mxu1 %v5071_v58  ;;  %v5101_v58 = vld [vmem:[%s6947_s5 + $0x1f0] ss:$20 sps:$4 sm:$0xff]  }
 0x8d6   :  { %2726 = vmatpush1.bf16.msra.mxu1 %v5069_v57  ;;  %v5127_v57 = vld [vmem:[%s6949_s7 + $0x60] ss:$16 sps:$4 sm:$0xff]  }
 0x8d7   :  { %2727 = vmatprep.subr.bf16.mxu1 %v5077_v61  ;;  %v5103_v61 = vld [vmem:[%s6947_s5 + $0x218] ss:$20 sps:$4 sm:$0xff]  }
 0x8da   :  { %2728 = vmatpush1.bf16.msra.mxu1 %v5075_v21  ;;  %v5133_v21 = vld [vmem:[%s6949_s7 + $0x80] ss:$16 sps:$4 sm:$0xff]  }
 0x8db   :  { %2729 = vmatprep.subr.bf16.mxu1 %v5083_v31  ;;  %v5105_v31 = vld [vmem:[%s6947_s5 + $0x240] ss:$20 sps:$4 sm:$0xff]  }
 0x8de   :  { %2730 = vmatpush1.bf16.msra.mxu1 %v5081_v33  ;;  %v5139_v33 = vld [vmem:[%s6949_s7 + $0xa0] ss:$16 sps:$4 sm:$0xff]  }
 0x8df   :  { %2731 = vmatprep.subr.bf16.mxu1 %v5089_v35  ;;  %v5107_v35 = vld [vmem:[%s6947_s5 + $0x268] ss:$20 sps:$4 sm:$0xff]  }
 0x8e2   :  { %2732 = vmatpush1.bf16.msra.mxu1 %v5087_v36  ;;  %v5145_v36 = vld [vmem:[%s6949_s7 + $0xc0] ss:$16 sps:$4 sm:$0xff]  }
 0x8e3   :  { %4752 = vmatprep.subr.bf16.mxu1 %v5093_v8  ;;  %v5114_v8 = vld [vmem:[%s6949_s7 + $0xc] ss:$16 sps:$4 sm:$0xff]  }
 0x978   :  { %v2109_v7 = vpop.f32.mrb[48].mxu1 }
 0x979   :  { %v2116_v56 = vadd.f32 %v2109_v7, %v6234_v26  ;;  %v2111_v10 = vpop.f32.mrb[49].mxu1  ;;  %v5120_v7 = vld [vmem:[%s6949_s7 + $0x2c] ss:$16 sps:$4 sm:$0xff]  }
 0x97a   :  { %v2117_v59 = vadd.f32 %v2111_v10, %v6237_v30  ;;  %v2113_v63 = vpop.f32.mrb[50].mxu1  ;;  %v5126_v10 = vld [vmem:[%s6949_s7 + $0x4c] ss:$16 sps:$4 sm:$0xff]  }
 0x97b   :  { %v2130_v2 = vadd.f32 %v2123_v17, %v2116_v56  ;;  %v2114_v0 = vpop.f32.mrb[51].mxu1  ;;  %v5112_v17 = vld [vmem:[%s6949_s7 + $0x8] ss:$16 sps:$4 sm:$0xff]   ;;  %v5132_v63 = vld [vmem:[%s6949_s7 + $0x6c] ss:$16 sps:$4 sm:$0xff]  }
 0x97c   :  { %v2131_v3 = vadd.f32 %v2127_v53, %v2117_v59  ;;  %v5157_v53 = vld [vmem:[%s6949_s7 + $0x100] ss:$16 sps:$4 sm:$0xff]   ;;  %v5118_v56 = vld [vmem:[%s6949_s7 + $0x28] ss:$16 sps:$4 sm:$0xff]   ;;  %v5138_v0 = vld [vmem:[%s6949_s7 + $0x8c] ss:$16 sps:$4 sm:$0xff]  }
 0x97d   :  { %v2134_v32 = vmin.f32 %v2130_v2, 0.0  ;;  %vm2132_vm12 = vcmp.gt.f32.partialorder %v2130_v2, 0.0  ;;  %v5124_v59 = vld [vmem:[%s6949_s7 + $0x48] ss:$16 sps:$4 sm:$0xff]  }
 0x97e   :  { %v2135_v4 = vmin.f32 %v2131_v3, 0.0  ;;  %vm2133_vm13 = vcmp.gt.f32.partialorder %v2131_v3, 0.0 }
 0x97f   :  { %v2136_v9 = vmul.f32 1.442695, %v2134_v32  ;;  %v5144_v32 = vld [vmem:[%s6949_s7 + $0xac] ss:$16 sps:$4 sm:$0xff]  }
 0x980   :  { %v2138_v24 = vmul.f32 1.442695, %v2135_v4  ;;  %v5142_v4 = vld [vmem:[%s6949_s7 + $0xa8] ss:$16 sps:$4 sm:$0xff]  }
 0x981   :  { %5343 = vpow2.f32 %v2136_v9  ;;  %v5150_v9 = vld [vmem:[%s6949_s7 + $0xcc] ss:$16 sps:$4 sm:$0xff]  }
 0x982   :  { %5345 = vpow2.f32 %v2138_v24  ;;  %v5148_v24 = vld [vmem:[%s6949_s7 + $0xc8] ss:$16 sps:$4 sm:$0xff]  }
 0x98b   :  { %v5344_v12 = vpop.eup %5343 }
 0x98c   :  { %v5346_v14 = vpop.eup %5345  ;;  %v4286_v15 = vadd.f32 -1.0, %v5344_v12  ;;  %v5156_v12 = vld [vmem:[%s6949_s7 + $0xec] ss:$16 sps:$4 sm:$0xff]  }
 0x98d   :  { %v4287_v62 = vadd.f32 -1.0, %v5346_v14  ;;  %v5154_v14 = vld [vmem:[%s6949_s7 + $0xe8] ss:$16 sps:$4 sm:$0xff]  }
 0x98e   :  { %v2142_v48 = vmul.f32 1.6732632, %v4286_v15  ;;  %v5162_v15 = vld [vmem:[%s6949_s7 + $0x10c] ss:$16 sps:$4 sm:$0xff]  }
 0x98f   :  { %v2143_v26 = vmul.f32 1.6732632, %v4287_v62  ;;  %v5160_v62 = vld [vmem:[%s6949_s7 + $0x108] ss:$16 sps:$4 sm:$0xff]  }
 0x990   :  { %v2144_v50 = vsel %vm2132_vm12, %v2130_v2, %v2142_v48  ;;  %v5130_v2 = vld [vmem:[%s6949_s7 + $0x68] ss:$16 sps:$4 sm:$0xff]   ;;  %v5165_v48 = vld [vmem:[%s6949_s7 + $0x124] ss:$16 sps:$4 sm:$0xff]  }
 0x991   :  { %v2146_v30 = vmul.f32 1.050701, %v2144_v50  ;;  %v2145_v51 = vsel %vm2133_vm13, %v2131_v3, %v2143_v26  ;;  %v5136_v3 = vld [vmem:[%s6949_s7 + $0x88] ss:$16 sps:$4 sm:$0xff]   ;;  %v5168_v26 = vld [vmem:[%s6949_s7 + $0x12c] ss:$16 sps:$4 sm:$0xff]  }
 0x992   :  { %v2147_v52 = vmul.f32 1.050701, %v2145_v51  ;;  %v5163_v50 = vld [vmem:[%s6949_s7 + $0x120] ss:$16 sps:$4 sm:$0xff]   ;;  %v5171_v51 = vld [vmem:[%s6949_s7 + $0x144] ss:$16 sps:$4 sm:$0xff]  }
 0x993   :  { %v6401_v41 = vpack.c.bf16 %v2146_v30, %v2146_v30 }
 0x994   :  { %v2161_v38 = vpack.c.bf16 %v2147_v52, %v2147_v52  ;;  %v2150_v40 = vcombine.low %v2146_v30, %v2147_v52  ;;  %v5166_v30 = vld [vmem:[%s6949_s7 + $0x128] ss:$16 sps:$4 sm:$0xff]   ;;  %v5174_v52 = vld [vmem:[%s6949_s7 + $0x14c] ss:$16 sps:$4 sm:$0xff]  }
 0x996   :  { %2733 = vmatprep.mubr.bf16.mxu1 %v2161_v38  ;;  %2774 = vmatprep.mubr.bf16.mxu0 %v2161_v38  ;;  %4288 = vst.sshfl [vmem:[#allocation2] sm:$0x33 pattern:$0x76325410] %v2150_v40  ;;  %v5177_v40 = vld [vmem:[%s6949_s7 + $0x164] ss:$16 sps:$4 sm:$0xff]  }
 0x997   :  { %2734 = vmatmul.mubr.bf16.vlgmr.msra.gmra.mrb[52].mxu1 %v6401_v41  ;;  %2775 = vmatmul.mubr.bf16.vlgmr.msra.gmra.mrb[56].mxu0 %v6401_v41 }
 0x998   :  { %4753 = vmatpush3.bf16.msra.mxu1 %v5094_v39  ;;  %2815 = vmatprep.mubr.bf16.mxu1 %v2161_v38  ;;  %v5169_v38 = vld [vmem:[%s6949_s7 + $0x140] ss:$16 sps:$4 sm:$0xff]   ;;  %v5172_v39 = vld [vmem:[%s6949_s7 + $0x148] ss:$16 sps:$4 sm:$0xff]  }
 0x999   :  { %4754 = vmatprep.subr.bf16.mxu1 %v5095_v42  ;;  %3758 = vmatpush1.bf16.msra.mxu0 %v5109_v43  ;;  %v5175_v42 = vld [vmem:[%s6949_s7 + $0x160] ss:$16 sps:$4 sm:$0xff]   ;;  %v5178_v43 = vld [vmem:[%s6949_s7 + $0x168] ss:$16 sps:$4 sm:$0xff]  }
 0x99a   :  { %3759 = vmatprep.subr.bf16.mxu0 %v5117_v44  ;;  %v5183_v44 = vld [vmem:[%s6949_s7 + $0x184] ss:$16 sps:$4 sm:$0xff]  }
 0x99c   :  { %4755 = vmatpush3.bf16.msra.mxu1 %v5096_v45  ;;  %v5186_v45 = vld [vmem:[%s6949_s7 + $0x18c] ss:$16 sps:$4 sm:$0xff]  }
 0x99d   :  { %4756 = vmatprep.subr.bf16.mxu1 %v5097_v46  ;;  %3760 = vmatpush1.bf16.msra.mxu0 %v5115_v47  ;;  %v5181_v46 = vld [vmem:[%s6949_s7 + $0x180] ss:$16 sps:$4 sm:$0xff]   ;;  %v5184_v47 = vld [vmem:[%s6949_s7 + $0x188] ss:$16 sps:$4 sm:$0xff]  }
 0x99e   :  { %3761 = vmatprep.subr.bf16.mxu0 %v5123_v5  ;;  %v5189_v5 = vld [vmem:[%s6949_s7 + $0x1a4] ss:$16 sps:$4 sm:$0xff]  }
 0x9a0   :  { %4757 = vmatpush3.bf16.msra.mxu1 %v5098_v27  ;;  %v5192_v27 = vld [vmem:[%s6949_s7 + $0x1ac] ss:$16 sps:$4 sm:$0xff]  }
 0x9a1   :  { %4758 = vmatprep.subr.bf16.mxu1 %v5099_v18  ;;  %3762 = vmatpush1.bf16.msra.mxu0 %v5121_v55  ;;  %v5187_v18 = vld [vmem:[%s6949_s7 + $0x1a0] ss:$16 sps:$4 sm:$0xff]   ;;  %v5190_v55 = vld [vmem:[%s6949_s7 + $0x1a8] ss:$16 sps:$4 sm:$0xff]  }
 0x9a2   :  { %3763 = vmatprep.subr.bf16.mxu0 %v5129_v54  ;;  %v5195_v54 = vld [vmem:[%s6949_s7 + $0x1c4] ss:$16 sps:$4 sm:$0xff]  }
 0x9a4   :  { %4759 = vmatpush3.bf16.msra.mxu1 %v5100_v19  ;;  %v5198_v19 = vld [vmem:[%s6949_s7 + $0x1cc] ss:$16 sps:$4 sm:$0xff]  }
 0x9a5   :  { %4760 = vmatprep.subr.bf16.mxu1 %v5101_v58  ;;  %3764 = vmatpush1.bf16.msra.mxu0 %v5127_v57  ;;  %v5193_v58 = vld [vmem:[%s6949_s7 + $0x1c0] ss:$16 sps:$4 sm:$0xff]   ;;  %v5196_v57 = vld [vmem:[%s6949_s7 + $0x1c8] ss:$16 sps:$4 sm:$0xff]  }
 0x9a6   :  { %3765 = vmatprep.subr.bf16.mxu0 %v5135_v20  ;;  %v5201_v20 = vld [vmem:[%s6949_s7 + $0x1e4] ss:$16 sps:$4 sm:$0xff]  }
 0x9a8   :  { %4761 = vmatpush3.bf16.msra.mxu1 %v5102_v60  ;;  %v5204_v60 = vld [vmem:[%s6949_s7 + $0x1ec] ss:$16 sps:$4 sm:$0xff]  }
 0x9a9   :  { %4762 = vmatprep.subr.bf16.mxu1 %v5103_v61  ;;  %3766 = vmatpush1.bf16.msra.mxu0 %v5133_v21  ;;  %v5199_v61 = vld [vmem:[%s6949_s7 + $0x1e0] ss:$16 sps:$4 sm:$0xff]   ;;  %v5202_v21 = vld [vmem:[%s6949_s7 + $0x1e8] ss:$16 sps:$4 sm:$0xff]  }
 0x9aa   :  { %3767 = vmatprep.subr.bf16.mxu0 %v5141_v25  ;;  %v5207_v25 = vld [vmem:[%s6949_s7 + $0x204] ss:$16 sps:$4 sm:$0xff]  }
 0x9ac   :  { %4763 = vmatpush3.bf16.msra.mxu1 %v5104_v1  ;;  %v5210_v1 = vld [vmem:[%s6949_s7 + $0x20c] ss:$16 sps:$4 sm:$0xff]  }
 0x9ad   :  { %4764 = vmatprep.subr.bf16.mxu1 %v5105_v31  ;;  %3768 = vmatpush1.bf16.msra.mxu0 %v5139_v33  ;;  %v6646_v31 = vld [vmem:[%s6948_s6] sm:$0x1f]  ;;  %v2274_v33 = vsub.s32 3, %v5533_v16 }
 0x9ae   :  { %3769 = vmatprep.subr.bf16.mxu0 %v5147_v34  ;;  %v2263_v34 = vrot.slane %v6646_v31, %v6386_v11 }
 0x9b0   :  { %4765 = vmatpush3.bf16.msra.mxu1 %v5106_v29  ;;  %v2267_v29 = vrot.slane %v6646_v31, %v6392_v28 }
 0x9b1   :  { %4766 = vmatprep.subr.bf16.mxu1 %v5107_v35  ;;  %3770 = vmatpush1.bf16.msra.mxu0 %v5145_v36  ;;  %v2275_v35 = vrot.slane %v6646_v31, %v2274_v33 }
 0x9b2   :  { %3771 = vmatprep.subr.bf16.mxu0 %v5153_v37 }
 0x9b4   :  { %4767 = vmatpush3.bf16.msra.mxu1 %v5108_v6 }
 0x9b5   :  { %3880 = vmatprep.subr.bf16.mxu1 %v5114_v8  ;;  %3772 = vmatpush1.bf16.msra.mxu0 %v5151_v22 }
 0x9b6   :  { %3773 = vmatprep.subr.bf16.mxu0 %v5159_v13 }
 0x9b7   :  { %2816 = vmatmul.mubr.bf16.vlgmr.msra.gmra.mrb[56].mxu1 %v6401_v41  ;;  %v5180_v41 = vld [vmem:[%s6949_s7 + $0x16c] ss:$16 sps:$4 sm:$0xff]  }
 0x9b8   :  { %3881 = vmatpush1.bf16.msra.mxu1 %v5112_v17 }
 0x9b9   :  { %3882 = vmatprep.subr.bf16.mxu1 %v5120_v7  ;;  %3774 = vmatpush1.bf16.msra.mxu0 %v5157_v53 }
 0x9ba   :  { %3775 = vmatprep.subr.bf16.mxu0 %v5165_v48 }
 0x9bc   :  { %3883 = vmatpush1.bf16.msra.mxu1 %v5118_v56 }
 0x9bd   :  { %3884 = vmatprep.subr.bf16.mxu1 %v5126_v10  ;;  %3776 = vmatpush1.bf16.msra.mxu0 %v5163_v50 }
 0x9be   :  { %3777 = vmatprep.subr.bf16.mxu0 %v5171_v51 }
 0x9c0   :  { %3885 = vmatpush1.bf16.msra.mxu1 %v5124_v59 }
 0x9c1   :  { %3886 = vmatprep.subr.bf16.mxu1 %v5132_v63  ;;  %3778 = vmatpush1.bf16.msra.mxu0 %v5169_v38 }
 0x9c2   :  { %3779 = vmatprep.subr.bf16.mxu0 %v5177_v40 }
 0x9c4   :  { %3887 = vmatpush1.bf16.msra.mxu1 %v5130_v2 }
 0x9c5   :  { %3888 = vmatprep.subr.bf16.mxu1 %v5138_v0  ;;  %3780 = vmatpush1.bf16.msra.mxu0 %v5175_v42  ;;  %v5208_v42 = vld [vmem:[%s6949_s7 + $0x208] ss:$16 sps:$4 sm:$0xff]  }
 0x9c6   :  { %3781 = vmatprep.subr.bf16.mxu0 %v5183_v44  ;;  %v5213_v44 = vld [vmem:[%s6949_s7 + $0x224] ss:$16 sps:$4 sm:$0xff]  }
 0x9c8   :  { %3889 = vmatpush1.bf16.msra.mxu1 %v5136_v3 }
 0x9c9   :  { %3890 = vmatprep.subr.bf16.mxu1 %v5144_v32  ;;  %3782 = vmatpush1.bf16.msra.mxu0 %v5181_v46 }
 0x9ca   :  { %3783 = vmatprep.subr.bf16.mxu0 %v5189_v5  ;;  %v5214_v5 = vld [vmem:[%s6949_s7 + $0x228] ss:$16 sps:$4 sm:$0xff]  }
 0x9cc   :  { %3891 = vmatpush1.bf16.msra.mxu1 %v5142_v4 }
 0x9cd   :  { %3892 = vmatprep.subr.bf16.mxu1 %v5150_v9  ;;  %3784 = vmatpush1.bf16.msra.mxu0 %v5187_v18  ;;  %v5219_v18 = vld [vmem:[%s6949_s7 + $0x244] ss:$16 sps:$4 sm:$0xff]  }
 0x9ce   :  { %3785 = vmatprep.subr.bf16.mxu0 %v5195_v54 }
 0x9d0   :  { %3893 = vmatpush1.bf16.msra.mxu1 %v5148_v24 }
 0x9d1   :  { %3894 = vmatprep.subr.bf16.mxu1 %v5156_v12  ;;  %3786 = vmatpush1.bf16.msra.mxu0 %v5193_v58 }
 0x9d2   :  { %3787 = vmatprep.subr.bf16.mxu0 %v5201_v20  ;;  %v5217_v20 = vld [vmem:[%s6949_s7 + $0x240] ss:$16 sps:$4 sm:$0xff]  }
 0x9d4   :  { %3895 = vmatpush1.bf16.msra.mxu1 %v5154_v14 }
 0x9d5   :  { %3896 = vmatprep.subr.bf16.mxu1 %v5162_v15  ;;  %3788 = vmatpush1.bf16.msra.mxu0 %v5199_v61  ;;  %v5225_v61 = vld [vmem:[%s6949_s7 + $0x264] ss:$16 sps:$4 sm:$0xff]  }
 0x9d6   :  { %3798 = vmatprep.subr.bf16.mxu0 %v5207_v25  ;;  %v5223_v25 = vld [vmem:[%s6949_s7 + $0x260] ss:$16 sps:$4 sm:$0xff]  }
 0x9d8   :  { %3897 = vmatpush1.bf16.msra.mxu1 %v5160_v62 }
 0x9d9   :  { %3898 = vmatprep.subr.bf16.mxu1 %v5168_v26 }
 0x9dc   :  { %3899 = vmatpush1.bf16.msra.mxu1 %v5166_v30 }
 0x9dd   :  { %3900 = vmatprep.subr.bf16.mxu1 %v5174_v52 }
 0x9e0   :  { %3901 = vmatpush1.bf16.msra.mxu1 %v5172_v39 }
 0x9e1   :  { %3902 = vmatprep.subr.bf16.mxu1 %v5180_v41  ;;  %v5205_v41 = vld [vmem:[%s6949_s7 + $0x200] ss:$16 sps:$4 sm:$0xff]  }
 0x9e4   :  { %3903 = vmatpush1.bf16.msra.mxu1 %v5178_v43 }
 0x9e5   :  { %3904 = vmatprep.subr.bf16.mxu1 %v5186_v45  ;;  %v5216_v45 = vld [vmem:[%s6949_s7 + $0x22c] ss:$16 sps:$4 sm:$0xff]  }
 0x9e8   :  { %3905 = vmatpush1.bf16.msra.mxu1 %v5184_v47  ;;  %v5211_v47 = vld [vmem:[%s6949_s7 + $0x220] ss:$16 sps:$4 sm:$0xff]  }
 0x9e9   :  { %3906 = vmatprep.subr.bf16.mxu1 %v5192_v27 }
 0x9ec   :  { %3907 = vmatpush1.bf16.msra.mxu1 %v5190_v55  ;;  %v5222_v55 = vld [vmem:[%s6949_s7 + $0x24c] ss:$16 sps:$4 sm:$0xff]  }
 0x9ed   :  { %3908 = vmatprep.subr.bf16.mxu1 %v5198_v19 }
 0x9f0   :  { %3909 = vmatpush1.bf16.msra.mxu1 %v5196_v57 }
 0x9f1   :  { %3910 = vmatprep.subr.bf16.mxu1 %v5204_v60  ;;  %v5220_v60 = vld [vmem:[%s6949_s7 + $0x248] ss:$16 sps:$4 sm:$0xff]  }
 0x9f4   :  { %3911 = vmatpush1.bf16.msra.mxu1 %v5202_v21  ;;  %v5228_v21 = vld [vmem:[%s6949_s7 + $0x26c] ss:$16 sps:$4 sm:$0xff]  }
 0x9f5   :  { %3921 = vmatprep.subr.bf16.mxu1 %v5210_v1  ;;  %v5226_v1 = vld [vmem:[%s6949_s7 + $0x268] ss:$16 sps:$4 sm:$0xff]  }
 0xa6a   :  { %v2735_v36 = vpop.f32.mrb[52].mxu1  ;;  %v6656_v37 = vpop.f32.mrb[56].mxu0 }
 0xa6b   :  { %v2736_v6 = vadd.f32 %v2735_v36, %v2263_v34  ;;  %v2737_v8 = vpop.f32.mrb[53].mxu1  ;;  %v2778_v22 = vpop.f32.mrb[57].mxu0  ;;  %v5231_v34 = vld [vmem:[%s6949_s7 + $0x284] ss:$16 sps:$4 sm:$0xff]   ;;  %v5232_v36 = vld [vmem:[%s6949_s7 + $0x288] ss:$16 sps:$4 sm:$0xff]  }
 0xa6c   :  { %v2738_v13 = vadd.f32 %v2737_v8, %v2267_v29  ;;  %v2779_v17 = vadd.f32 %v2778_v22, %v2275_v35  ;;  %v2739_v7 = vpop.f32.mrb[54].mxu1  ;;  %v2780_v53 = vpop.f32.mrb[58].mxu0  ;;  %v5234_v29 = vld [vmem:[%s6949_s7 + $0x28c] ss:$16 sps:$4 sm:$0xff]   ;;  %v5229_v35 = vld [vmem:[%s6949_s7 + $0x280] ss:$16 sps:$4 sm:$0xff]  }
 0xa6d   :  { %v2828_v56 = vmin.f32 %v2736_v6, 0.0  ;;  %v2740_v10 = vpop.f32.mrb[55].mxu1  ;;  %v2781_v59 = vpop.f32.mrb[59].mxu0  ;;  %vm2823_vm14 = vcmp.gt.f32.partialorder %v2736_v6, 0.0  ;;  %v5237_v8 = vld [vmem:[%s6949_s7 + $0x2a4] ss:$16 sps:$4 sm:$0xff]  }
 0xa6e   :  { %v2829_v63 = vmin.f32 %v2738_v13, 0.0  ;;  %v2831_v2 = vmin.f32 %v2779_v17, 0.0  ;;  %vm2824_vm15 = vcmp.gt.f32.partialorder %v2738_v13, 0.0  ;;  %vm2826_vm0 = vcmp.gt.f32.partialorder %v2779_v17, 0.0  ;;  %v5240_v22 = vld [vmem:[%s6949_s7 + $0x2ac] ss:$16 sps:$4 sm:$0xff]  }
 0xa6f   :  { %v2833_v0 = vmul.f32 1.442695, %v2828_v56  ;;  %v5243_v53 = vld [vmem:[%s6949_s7 + $0x2c4] ss:$16 sps:$4 sm:$0xff]   ;;  %v5246_v56 = vld [vmem:[%s6949_s7 + $0x2cc] ss:$16 sps:$4 sm:$0xff]  }
 0xa70   :  { %v2835_v3 = vmul.f32 1.442695, %v2829_v63  ;;  %v2839_v32 = vmul.f32 1.442695, %v2831_v2  ;;  %v5241_v10 = vld [vmem:[%s6949_s7 + $0x2c0] ss:$16 sps:$4 sm:$0xff]  }
 0xa71   :  { %5347 = vpow2.f32 %v2833_v0  ;;  %v5244_v59 = vld [vmem:[%s6949_s7 + $0x2c8] ss:$16 sps:$4 sm:$0xff]   ;;  %v5249_v2 = vld [vmem:[%s6949_s7 + $0x2e4] ss:$16 sps:$4 sm:$0xff]   ;;  %v5252_v0 = vld [vmem:[%s6949_s7 + $0x2ec] ss:$16 sps:$4 sm:$0xff]  }
 0xa72   :  { %5349 = vpow2.f32 %v2835_v3  ;;  %v5247_v3 = vld [vmem:[%s6949_s7 + $0x2e0] ss:$16 sps:$4 sm:$0xff]  }
 0xa73   :  { %5351 = vpow2.f32 %v2839_v32 }
 0xa7b   :  { %v5348_v4 = vpop.eup %5347 }
 0xa7c   :  { %v4369_v9 = vadd.f32 -1.0, %v5348_v4  ;;  %v5350_v24 = vpop.eup %5349  ;;  %v5255_v4 = vld [vmem:[%s6949_s7 + $0x304] ss:$16 sps:$4 sm:$0xff]  }
 0xa7d   :  { %v5352_v12 = vpop.eup %5351  ;;  %v4370_v15 = vadd.f32 -1.0, %v5350_v24  ;;  %v2278_v24 = vsub.s32 4, %v5533_v16 }
 0xa7e   :  { %v2848_v14 = vmul.f32 1.6732632, %v4369_v9  ;;  %v4372_v62 = vadd.f32 -1.0, %v5352_v12  ;;  %v5258_v9 = vld [vmem:[%s6949_s7 + $0x30c] ss:$16 sps:$4 sm:$0xff]  }
 0xa7f   :  { %v2849_v26 = vmul.f32 1.6732632, %v4370_v15  ;;  %v5253_v12 = vld [vmem:[%s6949_s7 + $0x300] ss:$16 sps:$4 sm:$0xff]  }
 0xa80   :  { %v2853_v48 = vsel %vm2823_vm14, %v2736_v6, %v2848_v14  ;;  %v2851_v50 = vmul.f32 1.6732632, %v4372_v62  ;;  %v2270_v6 = vsub.s32 2, %v5533_v16  ;;  %v5256_v14 = vld [vmem:[%s6949_s7 + $0x308] ss:$16 sps:$4 sm:$0xff]  }
 0xa81   :  { %v2858_v30 = vmul.f32 1.050701, %v2853_v48  ;;  %v2854_v51 = vsel %vm2824_vm15, %v2738_v13, %v2849_v26  ;;  %v5235_v13 = vld [vmem:[%s6949_s7 + $0x2a0] ss:$16 sps:$4 sm:$0xff]   ;;  %v5261_v62 = vld [vmem:[%s6949_s7 + $0x324] ss:$16 sps:$4 sm:$0xff]  }
 0xa82   :  { %v2859_v52 = vmul.f32 1.050701, %v2854_v51  ;;  %v2856_v38 = vsel %vm2826_vm0, %v2779_v17, %v2851_v50  ;;  %v5238_v17 = vld [vmem:[%s6949_s7 + $0x2a8] ss:$16 sps:$4 sm:$0xff]   ;;  %v2271_v7 = vrot.slane %v6646_v31, %v2270_v6  ;;  %v5264_v48 = vld [vmem:[%s6949_s7 + $0x32c] ss:$16 sps:$4 sm:$0xff]  }
 0xa83   :  { %v2861_v39 = vmul.f32 1.050701, %v2856_v38  ;;  %v2863_v43 = vpack.c.bf16 %v2858_v30, %v2858_v30  ;;  %v5259_v26 = vld [vmem:[%s6949_s7 + $0x320] ss:$16 sps:$4 sm:$0xff]   ;;  %v5262_v50 = vld [vmem:[%s6949_s7 + $0x328] ss:$16 sps:$4 sm:$0xff]   ;;  %v2279_v30 = vrot.slane %v6646_v31, %v2278_v24 }
 0xa84   :  { %v2864_v40 = vpack.c.bf16 %v2859_v52, %v2859_v52  ;;  %v6743_v63 = vadd.f32 %v6656_v37, %v2271_v7  ;;  %v5250_v37 = vld [vmem:[%s6949_s7 + $0x2e8] ss:$16 sps:$4 sm:$0xff]   ;;  %v5267_v51 = vld [vmem:[%s6949_s7 + $0x344] ss:$16 sps:$4 sm:$0xff]   ;;  %v5270_v52 = vld [vmem:[%s6949_s7 + $0x34c] ss:$16 sps:$4 sm:$0xff]  }
 0xa85   :  { %v2866_v46 = vpack.c.bf16 %v2861_v39, %v2861_v39  ;;  %v5265_v38 = vld [vmem:[%s6949_s7 + $0x340] ss:$16 sps:$4 sm:$0xff]   ;;  %v5268_v31 = vld [vmem:[%s6949_s7 + $0x348] ss:$16 sps:$4 sm:$0xff]   ;;  %v5321_v24 = vld [vmem:[%s6949_s7 + $0x464] ss:$16 sps:$4 sm:$0xff]  }
 0xa86   :  { %3789 = vmatprep.mubr.bf16.mxu0 %v2864_v40  ;;  %3912 = vmatprep.mubr.bf16.mxu1 %v2864_v40  ;;  %v2830_v32 = vmin.f32 %v6743_v63, 0.0  ;;  %v5273_v40 = vld [vmem:[%s6949_s7 + $0x364] ss:$16 sps:$4 sm:$0xff]   ;;  %vm2825_vm1 = vcmp.gt.f32.partialorder %v6743_v63, 0.0  ;;  %v5301_v7 = vld [vmem:[%s6949_s7 + $0x400] ss:$16 sps:$4 sm:$0xff]  }
 0xa87   :  { %3790 = vmatmul.mubr.bf16.vlgmr.msra.gmra.mrb[60].mxu0 %v2863_v43  ;;  %3913 = vmatmul.mubr.bf16.vlgmr.msra.gmra.mrb[60].mxu1 %v2863_v43  ;;  %v5274_v43 = vld [vmem:[%s6949_s7 + $0x368] ss:$16 sps:$4 sm:$0xff]  }
 0xa88   :  { %3799 = vmatpush1.bf16.msra.mxu0 %v5205_v41  ;;  %3922 = vmatpush1.bf16.msra.mxu1 %v5208_v42  ;;  %v2837_v15 = vmul.f32 1.442695, %v2830_v32  ;;  %v5276_v41 = vld [vmem:[%s6949_s7 + $0x36c] ss:$16 sps:$4 sm:$0xff]   ;;  %v5271_v42 = vld [vmem:[%s6949_s7 + $0x360] ss:$16 sps:$4 sm:$0xff]  }
 0xa89   :  { %3830 = vmatprep.mubr.bf16.mxu0 %v2866_v46  ;;  %3953 = vmatprep.mubr.bf16.mxu1 %v2866_v46  ;;  %v5282_v46 = vld [vmem:[%s6949_s7 + $0x38c] ss:$16 sps:$4 sm:$0xff]  }
 0xa8a   :  { %v4768_v27 = vpop.f32.mrb[56].mxu1  ;;  %3800 = vmatprep.subr.bf16.mxu0 %v5213_v44  ;;  %3923 = vmatprep.subr.bf16.mxu1 %v5216_v45  ;;  %5353 = vpow2.f32 %v2837_v15  ;;  %v5279_v45 = vld [vmem:[%s6949_s7 + $0x384] ss:$16 sps:$4 sm:$0xff]   ;;  %v5322_v15 = vld [vmem:[%s6949_s7 + $0x468] ss:$16 sps:$4 sm:$0xff]  }
 0xa8b   :  { %v4769_v54 = vpop.f32.mrb[57].mxu1 }
 0xa8c   :  { %v6682_v19 = vadd.f32 %v4769_v54, %v4768_v27  ;;  %v4771_v58 = vpop.f32.mrb[58].mxu1  ;;  %3801 = vmatpush1.bf16.msra.mxu0 %v5211_v47  ;;  %3924 = vmatpush1.bf16.msra.mxu1 %v5214_v5  ;;  %v5277_v5 = vld [vmem:[%s6949_s7 + $0x380] ss:$16 sps:$4 sm:$0xff]   ;;  %v5280_v27 = vld [vmem:[%s6949_s7 + $0x388] ss:$16 sps:$4 sm:$0xff]  }
 0xa8d   :  { %v4772_v57 = vpop.f32.mrb[59].mxu1  ;;  %3802 = vmatprep.subr.bf16.mxu0 %v5219_v18  ;;  %3925 = vmatprep.subr.bf16.mxu1 %v5222_v55  ;;  %v5285_v55 = vld [vmem:[%s6949_s7 + $0x3a4] ss:$16 sps:$4 sm:$0xff]   ;;  %v5288_v54 = vld [vmem:[%s6949_s7 + $0x3ac] ss:$16 sps:$4 sm:$0xff]  }
 0xa8e   :  { %v6797_v39 = vadd.f32 %v6682_v19, %v2279_v30  ;;  %v5283_v58 = vld [vmem:[%s6949_s7 + $0x3a0] ss:$16 sps:$4 sm:$0xff]   ;;  %v5286_v57 = vld [vmem:[%s6949_s7 + $0x3a8] ss:$16 sps:$4 sm:$0xff]  }
 0xa90   :  { %3803 = vmatpush1.bf16.msra.mxu0 %v5217_v20  ;;  %3926 = vmatpush1.bf16.msra.mxu1 %v5220_v60  ;;  %v2832_v44 = vmin.f32 %v6797_v39, 0.0  ;;  %v5291_v20 = vld [vmem:[%s6949_s7 + $0x3c4] ss:$16 sps:$4 sm:$0xff]   ;;  %v5294_v60 = vld [vmem:[%s6949_s7 + $0x3cc] ss:$16 sps:$4 sm:$0xff]   ;;  %vm2827_vm2 = vcmp.gt.f32.partialorder %v6797_v39, 0.0 }
 0xa91   :  { %3804 = vmatprep.subr.bf16.mxu0 %v5225_v61  ;;  %3927 = vmatprep.subr.bf16.mxu1 %v5228_v21  ;;  %v5289_v21 = vld [vmem:[%s6949_s7 + $0x3c0] ss:$16 sps:$4 sm:$0xff]  }
 0xa92   :  { %v2841_v18 = vmul.f32 1.442695, %v2832_v44 }
 0xa94   :  { %3805 = vmatpush1.bf16.msra.mxu0 %v5223_v25  ;;  %3928 = vmatpush1.bf16.msra.mxu1 %v5226_v1  ;;  %v5354_v47 = vpop.eup %5353  ;;  %5355 = vpow2.f32 %v2841_v18  ;;  %v5292_v25 = vld [vmem:[%s6949_s7 + $0x3c8] ss:$16 sps:$4 sm:$0xff]   ;;  %v5297_v1 = vld [vmem:[%s6949_s7 + $0x3e4] ss:$16 sps:$4 sm:$0xff]  }
 0xa95   :  { %3806 = vmatprep.subr.bf16.mxu0 %v5231_v34  ;;  %3929 = vmatprep.subr.bf16.mxu1 %v5234_v29  ;;  %v4371_v19 = vadd.f32 -1.0, %v5354_v47  ;;  %v5300_v34 = vld [vmem:[%s6949_s7 + $0x3ec] ss:$16 sps:$4 sm:$0xff]  }
 0xa97   :  { %v2850_v61 = vmul.f32 1.6732632, %v4371_v19 }
 0xa98   :  { %3807 = vmatpush1.bf16.msra.mxu0 %v5229_v35  ;;  %3930 = vmatpush1.bf16.msra.mxu1 %v5232_v36  ;;  %v5295_v35 = vld [vmem:[%s6949_s7 + $0x3e0] ss:$16 sps:$4 sm:$0xff]   ;;  %v5298_v36 = vld [vmem:[%s6949_s7 + $0x3e8] ss:$16 sps:$4 sm:$0xff]  }
 0xa99   :  { %3808 = vmatprep.subr.bf16.mxu0 %v5237_v8  ;;  %3931 = vmatprep.subr.bf16.mxu1 %v5240_v22  ;;  %v2855_v29 = vsel %vm2825_vm1, %v6743_v63, %v2850_v61  ;;  %v5303_v22 = vld [vmem:[%s6949_s7 + $0x404] ss:$16 sps:$4 sm:$0xff]  }
 0xa9a   :  { %v2860_v8 = vmul.f32 1.050701, %v2855_v29 }
 0xa9c   :  { %3809 = vmatpush1.bf16.msra.mxu0 %v5235_v13  ;;  %3932 = vmatpush1.bf16.msra.mxu1 %v5238_v17  ;;  %v5306_v13 = vld [vmem:[%s6949_s7 + $0x40c] ss:$16 sps:$4 sm:$0xff]  }
 0xa9d   :  { %3810 = vmatprep.subr.bf16.mxu0 %v5243_v53  ;;  %3933 = vmatprep.subr.bf16.mxu1 %v5246_v56  ;;  %v5304_v53 = vld [vmem:[%s6949_s7 + $0x408] ss:$16 sps:$4 sm:$0xff]   ;;  %v2865_v56 = vpack.c.bf16 %v2860_v8, %v2860_v8 }
 0xa9e   :  { %v5356_v17 = vpop.eup %5355 }
 0xa9f   :  { %v4373_v63 = vadd.f32 -1.0, %v5356_v17 }
 0xaa0   :  { %3811 = vmatpush1.bf16.msra.mxu0 %v5241_v10  ;;  %3934 = vmatpush1.bf16.msra.mxu1 %v5244_v59  ;;  %v5309_v10 = vld [vmem:[%s6949_s7 + $0x424] ss:$16 sps:$4 sm:$0xff]   ;;  %v5312_v59 = vld [vmem:[%s6949_s7 + $0x42c] ss:$16 sps:$4 sm:$0xff]  }
 0xaa1   :  { %3812 = vmatprep.subr.bf16.mxu0 %v5249_v2  ;;  %3935 = vmatprep.subr.bf16.mxu1 %v5252_v0  ;;  %v5307_v2 = vld [vmem:[%s6949_s7 + $0x420] ss:$16 sps:$4 sm:$0xff]   ;;  %v5310_v0 = vld [vmem:[%s6949_s7 + $0x428] ss:$16 sps:$4 sm:$0xff]   ;;  %v2852_v32 = vmul.f32 1.6732632, %v4373_v63 }
 0xaa4   :  { %3813 = vmatpush1.bf16.msra.mxu0 %v5247_v3  ;;  %3936 = vmatpush1.bf16.msra.mxu1 %v5250_v37  ;;  %v5315_v3 = vld [vmem:[%s6949_s7 + $0x444] ss:$16 sps:$4 sm:$0xff]   ;;  %v5318_v37 = vld [vmem:[%s6949_s7 + $0x44c] ss:$16 sps:$4 sm:$0xff]  }
 0xaa5   :  { %3814 = vmatprep.subr.bf16.mxu0 %v5255_v4  ;;  %3937 = vmatprep.subr.bf16.mxu1 %v5258_v9  ;;  %v5313_v4 = vld [vmem:[%s6949_s7 + $0x440] ss:$16 sps:$4 sm:$0xff]   ;;  %v5316_v9 = vld [vmem:[%s6949_s7 + $0x448] ss:$16 sps:$4 sm:$0xff]  }
 0xaa8   :  { %3815 = vmatpush1.bf16.msra.mxu0 %v5253_v12  ;;  %3938 = vmatpush1.bf16.msra.mxu1 %v5256_v14  ;;  %v2857_v12 = vsel %vm2827_vm2, %v6797_v39, %v2852_v32  ;;  %v5319_v14 = vld [vmem:[%s6949_s7 + $0x460] ss:$16 sps:$4 sm:$0xff]  }
 0xaa9   :  { %3816 = vmatprep.subr.bf16.mxu0 %v5261_v62  ;;  %3939 = vmatprep.subr.bf16.mxu1 %v5264_v48  ;;  %v2862_v62 = vmul.f32 1.050701, %v2857_v12 }
 0xaab   :  { %v2867_v48 = vpack.c.bf16 %v2862_v62, %v2862_v62 }
 0xaac   :  { %3817 = vmatpush1.bf16.msra.mxu0 %v5259_v26  ;;  %3940 = vmatpush1.bf16.msra.mxu1 %v5262_v50 }
 0xaad   :  { %3818 = vmatprep.subr.bf16.mxu0 %v5267_v51  ;;  %3941 = vmatprep.subr.bf16.mxu1 %v5270_v52 }
 0xab0   :  { %3819 = vmatpush1.bf16.msra.mxu0 %v5265_v38  ;;  %3942 = vmatpush1.bf16.msra.mxu1 %v5268_v31 }
 0xab1   :  { %3820 = vmatprep.subr.bf16.mxu0 %v5273_v40  ;;  %3943 = vmatprep.subr.bf16.mxu1 %v5276_v41 }
 0xab4   :  { %3821 = vmatpush1.bf16.msra.mxu0 %v5271_v42  ;;  %3944 = vmatpush1.bf16.msra.mxu1 %v5274_v43 }
 0xab5   :  { %3822 = vmatprep.subr.bf16.mxu0 %v5279_v45  ;;  %3945 = vmatprep.subr.bf16.mxu1 %v5282_v46 }
 0xab8   :  { %3823 = vmatpush1.bf16.msra.mxu0 %v5277_v5  ;;  %3946 = vmatpush1.bf16.msra.mxu1 %v5280_v27 }
 0xab9   :  { %3824 = vmatprep.subr.bf16.mxu0 %v5285_v55  ;;  %3947 = vmatprep.subr.bf16.mxu1 %v5288_v54 }
 0xabc   :  { %3825 = vmatpush1.bf16.msra.mxu0 %v5283_v58  ;;  %3948 = vmatpush1.bf16.msra.mxu1 %v5286_v57 }
 0xabd   :  { %3826 = vmatprep.subr.bf16.mxu0 %v5291_v20  ;;  %3949 = vmatprep.subr.bf16.mxu1 %v5294_v60 }
 0xac0   :  { %3827 = vmatpush1.bf16.msra.mxu0 %v5289_v21  ;;  %3950 = vmatpush1.bf16.msra.mxu1 %v5292_v25 }
 0xac1   :  { %3828 = vmatprep.subr.bf16.mxu0 %v5297_v1  ;;  %3951 = vmatprep.subr.bf16.mxu1 %v5300_v34 }
 0xac4   :  { %3829 = vmatpush1.bf16.msra.mxu0 %v5295_v35  ;;  %3952 = vmatpush1.bf16.msra.mxu1 %v5298_v36 }
 0xac5   :  { %3839 = vmatprep.subr.bf16.mxu0 %v5303_v22  ;;  %3962 = vmatprep.subr.bf16.mxu1 %v5306_v13 }
 0xac7   :  { %3831 = vmatmul.mubr.bf16.vlgmr.msra.gmra.mrb[60].mxu0 %v2865_v56  ;;  %3954 = vmatmul.mubr.bf16.vlgmr.msra.gmra.mrb[60].mxu1 %v2865_v56 }
 0xac8   :  { %3840 = vmatpush1.bf16.msra.mxu0 %v5301_v7  ;;  %3963 = vmatpush1.bf16.msra.mxu1 %v5304_v53 }
 0xac9   :  { %3841 = vmatprep.subr.bf16.mxu0 %v5309_v10  ;;  %3964 = vmatprep.subr.bf16.mxu1 %v5312_v59 }
 0xaca   :  { %3871 = vmatprep.mubr.bf16.mxu0 %v5411_v49  ;;  %3994 = vmatprep.mubr.bf16.mxu1 %v5411_v49  ;;  %v5324_v49 = vld [vmem:[%s6949_s7 + $0x46c] ss:$16 sps:$4 sm:$0xff]  }
 0xacc   :  { %3842 = vmatpush1.bf16.msra.mxu0 %v5307_v2  ;;  %3965 = vmatpush1.bf16.msra.mxu1 %v5310_v0 }
 0xacd   :  { %3843 = vmatprep.subr.bf16.mxu0 %v5315_v3  ;;  %3966 = vmatprep.subr.bf16.mxu1 %v5318_v37 }
 0xad0   :  { %3844 = vmatpush1.bf16.msra.mxu0 %v5313_v4  ;;  %3967 = vmatpush1.bf16.msra.mxu1 %v5316_v9 }
 0xad1   :  { %3845 = vmatprep.subr.bf16.mxu0 %v5321_v24  ;;  %3968 = vmatprep.subr.bf16.mxu1 %v5324_v49 }
 0xad4   :  { %3846 = vmatpush1.bf16.msra.mxu0 %v5319_v14  ;;  %3969 = vmatpush1.bf16.msra.mxu1 %v5322_v15 }
 0xad7   :  { %4518 = vmatmul.mubr.msk.bf16.vlgmr.msra.gmra.mrb[60].mxu0 %vm484_vm3, %v2867_v48  ;;  %4519 = vmatmul.mubr.msk.bf16.vlgmr.msra.gmra.mrb[60].mxu1 %vm484_vm3, %v2867_v48 }
 0xad8   :  { %5395 = shalt.err (!%p5392_p4)
}
 0xad9   :  { %s5396_s22 = scalar_lea.hbm %s6951_s9, 64 }
 0xada   :  { %p5397_p5 = scmp.ne.s32.totalorder %s6951_s9, %s5396_s22  ;;  %p5400_p6 = scmp.lt.u32.totalorder %s5396_s22, %s6951_s9 }
 0xadc   :  { %p5402_p7 = pnand %p5400_p6, %p5397_p5 }
 0xade   :  { %5405 = shalt.err (!%p5402_p7)
}
 0xadf   :  { %4078 = dma.vmem_to_hbm [thread:$0]  %s4076_s20, 64, %s6951_s9, [#allocation3]   ;;  %v3012_v26 = vld [vmem:[%s6950_s8] sm:$0xf] }
 0xae0   :  { %v3017_v50 = vrot.slane %v3012_v26, %v6386_v11  ;;  %v3025_v30 = vrot.slane %v3012_v26, %v2270_v6  ;;  %v3021_v51 = vrot.slane %v3012_v26, %v6392_v28  ;;  %v3029_v52 = vrot.slane %v3012_v26, %v2274_v33 }
 0xbaa   :  { %v3873_v38 = vpop.f32.mrb[60].mxu0  ;;  %v3996_v31 = vpop.f32.mrb[60].mxu1 }
 0xbab   :  { %v4846_v39 = vadd.f32 %v3873_v38, %v3017_v50  ;;  %v4848_v40 = vadd.f32 %v3996_v31, %v3025_v30  ;;  %v3875_v41 = vpop.f32.mrb[61].mxu0  ;;  %v3998_v42 = vpop.f32.mrb[61].mxu1 }
 0xbac   :  { %v4847_v43 = vadd.f32 %v3875_v41, %v3021_v51  ;;  %v4849_v44 = vadd.f32 %v3998_v42, %v3029_v52  ;;  %v3877_v45 = vpop.f32.mrb[62].mxu0  ;;  %v4000_v46 = vpop.f32.mrb[62].mxu1 }
 0xbad   :  { %v4007_v47 = vmin.f32 %v4846_v39, 0.0  ;;  %v4009_v11 = vmin.f32 %v4848_v40, 0.0  ;;  %v3878_v5 = vpop.f32.mrb[63].mxu0  ;;  %v4001_v27 = vpop.f32.mrb[63].mxu1  ;;  %vm4003_vm3 = vcmp.gt.f32.partialorder %v4846_v39, 0.0  ;;  %vm4005_vm4 = vcmp.gt.f32.partialorder %v4848_v40, 0.0 }
 0xbae   :  { %v4008_v6 = vmin.f32 %v4847_v43, 0.0  ;;  %v4010_v18 = vmin.f32 %v4849_v44, 0.0  ;;  %vm4004_vm5 = vcmp.gt.f32.partialorder %v4847_v43, 0.0  ;;  %vm4006_vm6 = vcmp.gt.f32.partialorder %v4849_v44, 0.0 }
 0xbaf   :  { %v4011_v28 = vmul.f32 1.442695, %v4007_v47  ;;  %v4015_v55 = vmul.f32 1.442695, %v4009_v11 }
 0xbb0   :  { %v4013_v16 = vmul.f32 1.442695, %v4008_v6  ;;  %v4017_v33 = vmul.f32 1.442695, %v4010_v18 }
 0xbb1   :  { %5357 = vpow2.f32 %v4011_v28 }
 0xbb2   :  { %5359 = vpow2.f32 %v4015_v55 }
 0xbb3   :  { %5361 = vpow2.f32 %v4013_v16 }
 0xbb4   :  { %5363 = vpow2.f32 %v4017_v33 }
 0xbbb   :  { %v5358_v54 = vpop.eup %5357 }
 0xbbc   :  { %v5360_v19 = vpop.eup %5359  ;;  %v4520_v58 = vadd.f32 -1.0, %v5358_v54 }
 0xbbd   :  { %v5362_v57 = vpop.eup %5361  ;;  %v4522_v20 = vadd.f32 -1.0, %v5360_v19 }
 0xbbe   :  { %v5364_v60 = vpop.eup %5363  ;;  %v4023_v61 = vmul.f32 1.6732632, %v4520_v58  ;;  %v4521_v21 = vadd.f32 -1.0, %v5362_v57 }
 0xbbf   :  { %v4025_v25 = vmul.f32 1.6732632, %v4522_v20  ;;  %v4523_v1 = vadd.f32 -1.0, %v5364_v60 }
 0xbc0   :  { %v4027_v34 = vsel %vm4003_vm3, %v4846_v39, %v4023_v61  ;;  %v4024_v29 = vmul.f32 1.6732632, %v4521_v21 }
 0xbc1   :  { %v4031_v35 = vmul.f32 1.050701, %v4027_v34  ;;  %v4029_v36 = vsel %vm4005_vm4, %v4848_v40, %v4025_v25  ;;  %v4026_v8 = vmul.f32 1.6732632, %v4523_v1 }
 0xbc2   :  { %v4033_v22 = vmul.f32 1.050701, %v4029_v36  ;;  %v4028_v13 = vsel %vm4004_vm5, %v4847_v43, %v4024_v29 }
 0xbc3   :  { %v4032_v17 = vmul.f32 1.050701, %v4028_v13  ;;  %v4030_v7 = vsel %vm4006_vm6, %v4849_v44, %v4026_v8 }
 0xbc4   :  { %v4034_v53 = vmul.f32 1.050701, %v4030_v7 }
 0xbc5   :  { %v4524_v56 = vpack.c.bf16 %v4032_v17, %v4031_v35 }
 0xbc6   :  { %v4525_v10 = vpack.c.bf16 %v4034_v53, %v4033_v22 }
 0xbc7   :  { %v4051_v59 = vrot.slane %v4524_v56, %v5553_v23 }
 0xbc8   :  { %v4058_v63 = vrot.slane %v4525_v10, %v5553_v23 }
 0xbca   :  { %v4059_v2 = vcombine.low %v4051_v59, %v4058_v63 }
 0xbcc   :  { %4526 = vst.sshfl [vmem:[%s6952_s10] sm:$0x55 pattern:$0x73625140] %v4059_v2 }
 0xbcd   :  { %5406 = dma.done.wait [#allocation3], 64  }
 0xbce   :  { %5407 = vsyncadd [#allocation3], 4294967232 }
 0xbcf   :  { %4086 = vsyncpa [#allocation3], 1 }

</bundles_post_ra>
